<compile_context>
chip_gen: v5e
topology: v5e:2x2
jax: 0.10.0
libtpu: 0.0.40
codegen_flags: <defaults>
</compile_context>

<pallas_src>
import functools

import jax
import jax.numpy as jnp
from jax.experimental import pallas as pl
from jax.experimental.pallas import tpu as pltpu


def _leaky_relu(x, slope=0.01):
    return jnp.where(x > 0, x, slope * x)


def _round_up(x, m):
    return ((x + m - 1) // m) * m


def _vmem_budget_bytes():
    """~70% of the per-core VMEM capacity (64 MiB fallback is safe on all gens)."""
    cap = 64 << 20
    try:
        info = pltpu.get_tpu_info()
        cap = int(getattr(info, "vmem_capacity_bytes", cap)) or cap
    except Exception:
        pass
    return int(0.7 * cap)


def _pick_tile(n_pad, budget):
    """Largest square tile whose double-buffered A tiles fit ~1/3 of the budget,
    preferring >= 2 row strips so the 'parallel' grid axis feeds both v7x cores."""
    candidates = [t for t in (2048, 1024, 512, 256)
                  if n_pad % t == 0 and 2 * t * t * 2 <= budget // 3]
    if not candidates:
        return 256 if n_pad % 256 == 0 else n_pad
    for t in candidates:                # candidates are sorted large -> small
        if n_pad // t >= 2:
            return t
    return candidates[-1]


def gcn_layer_kernel(*refs, apply_act, fuse_w, tk, h_resident):
    """Grid step (i, k): acc += A[i,k] @ H[k]; on last k: out = act(epilogue)."""
    if fuse_w:
        a_ref, h_ref, w_ref, b_ref, o_ref, acc_ref = refs
    else:
        a_ref, h_ref, b_ref, o_ref, acc_ref = refs
        w_ref = None

    k = pl.program_id(1)

    @pl.when(k == 0)
    def _():
        acc_ref[...] = jnp.zeros_like(acc_ref)

    if h_resident:
        # H lives fully in VMEM; slice the current k-slab (aligned to tk).
        h_blk = h_ref[pl.ds(pl.multiple_of(k * tk, tk), tk), :]
    else:
        h_blk = h_ref[...]

    # bf16 operands into the MXU, f32 accumulation.
    acc_ref[...] += jnp.dot(a_ref[...], h_blk, preferred_element_type=jnp.float32)

    @pl.when(k == pl.num_programs(1) - 1)
    def _():
        acc = acc_ref[...]
        if fuse_w:
            # Keep the accumulator in f32 for the (small) W matmul (W passed f32).
            z = jnp.dot(acc, w_ref[...], preferred_element_type=jnp.float32)
        else:
            z = acc
        z = z + b_ref[...]
        if apply_act:
            z = _leaky_relu(z)
        o_ref[...] = z.astype(o_ref.dtype)


def gcn_layer(a, h, b, *, w=None, apply_act, out_dtype, tm, tk, vmem_budget):
    """out = act(A @ H @ W + b)   if w is given   (W fused in the epilogue)
       out = act(A @ H + b)       otherwise       (W pre-applied to H by caller)
    A is streamed HBM->VMEM in (tm, tk) bf16 tiles over a (row, k) grid."""
    n = a.shape[0]
    f_in = h.shape[1]
    fuse_w = w is not None
    f_out = w.shape[1] if fuse_w else f_in
    assert n % tm == 0 and n % tk == 0

    out_itemsize = jnp.dtype(out_dtype).itemsize
    h_itemsize = h.dtype.itemsize
    h_bytes = n * f_in * h_itemsize
    # H fully resident in VMEM when it (conservatively double-buffered) fits.
    h_resident = 2 * h_bytes <= vmem_budget // 3

    # VMEM estimate: double-buffered A/out tiles, H (resident or streamed k-slab),
    # resident W/bias, f32 accumulator.  2x headroom, capped by the chip budget.
    h_vmem = 2 * (h_bytes if h_resident else tk * f_in * h_itemsize)
    w_vmem = 2 * f_in * f_out * 4 if fuse_w else 0
    est = (2 * tm * tk * a.dtype.itemsize + h_vmem + w_vmem + 2 * f_out * 4
           + 2 * tm * f_out * out_itemsize + tm * f_in * 4)
    vmem_limit = int(min(max(2 * est, 16 << 20), vmem_budget))

    h_reads = 1 if h_resident else (n // tm)
    cost = pl.CostEstimate(
        flops=2 * n * n * f_in + (2 * n * f_in * f_out if fuse_w else 0),
        transcendentals=0,
        bytes_accessed=(n * n * a.dtype.itemsize
                        + h_reads * n * f_in * h_itemsize
                        + (f_in * f_out * 4 if fuse_w else 0)
                        + f_out * 4
                        + n * f_out * out_itemsize),
    )

    kernel = functools.partial(gcn_layer_kernel, apply_act=apply_act,
                               fuse_w=fuse_w, tk=tk, h_resident=h_resident)

    if h_resident:
        h_spec = pl.BlockSpec((n, f_in), lambda i, k: (0, 0))      # resident H
    else:
        h_spec = pl.BlockSpec((tk, f_in), lambda i, k: (k, 0))     # streamed k-slab

    in_specs = [pl.BlockSpec((tm, tk), lambda i, k: (i, k)), h_spec]  # A streamed
    args = [a, h]
    if fuse_w:
        in_specs.append(pl.BlockSpec((f_in, f_out), lambda i, k: (0, 0)))  # W res.
        args.append(w)
    in_specs.append(pl.BlockSpec((1, f_out), lambda i, k: (0, 0)))         # bias
    args.append(b)

    return pl.pallas_call(
        kernel,
        out_shape=jax.ShapeDtypeStruct((n, f_out), out_dtype),
        grid_spec=pltpu.PrefetchScalarGridSpec(
            num_scalar_prefetch=0,
            grid=(n // tm, n // tk),
            in_specs=in_specs,
            out_specs=pl.BlockSpec((tm, f_out), lambda i, k: (i, 0)),
            scratch_shapes=[pltpu.VMEM((tm, f_in), jnp.float32)],
        ),
        compiler_params=pltpu.CompilerParams(
            dimension_semantics=("parallel", "arbitrary"),
            vmem_limit_bytes=vmem_limit,
        ),
        cost_estimate=cost,
    )(*args)


def simple_gcn_forward(a_hat, x, params, pool):
    """Full forward: 3 Pallas GCN layers + tiny XLA pool/linear tail."""
    n, f = x.shape
    hidden = params["w1"].shape[1]
    budget = _vmem_budget_bytes()
    n_pad = _round_up(n, 256)
    tile = _pick_tile(n_pad, budget)
    f_pad = _round_up(f, 128)
    bf16 = jnp.bfloat16

    # Zero-pad N (and F) to tile / lane multiples; padded A rows/cols are zero
    # so padded nodes never influence real nodes or the pooled output.
    a = jnp.zeros((n_pad, n_pad), bf16).at[:n, :n].set(a_hat.astype(bf16))
    h0 = jnp.zeros((n_pad, f_pad), bf16).at[:n, :f].set(x.astype(bf16))
    # W1 stays f32: the fused epilogue matmul uses the f32 accumulator directly.
    w1 = jnp.zeros((f_pad, hidden), jnp.float32).at[:f, :].set(params["w1"])

    # Layer 1: f_in (128) < f_out (256) -> fuse W into the kernel epilogue.
    h1 = gcn_layer(a, h0, params["b1"], w=w1, apply_act=True, out_dtype=bf16,
                   tm=tile, tk=tile, vmem_budget=budget)

    # Layers 2/3: f_in == f_out -> hoist W out of the streamed kernel as
    # H' = H @ W (tiny XLA matmul), so the kernel only does act(A @ H' + b).
    h1w = jnp.dot(h1, params["w2"].astype(bf16),
                  preferred_element_type=jnp.float32).astype(bf16)
    h2 = gcn_layer(a, h1w, params["b2"], apply_act=True, out_dtype=bf16,
                   tm=tile, tk=tile, vmem_budget=budget)

    h2w = jnp.dot(h2, params["w3"].astype(bf16),
                  preferred_element_type=jnp.float32).astype(bf16)
    h3 = gcn_layer(a, h2w, params["b3"], apply_act=False, out_dtype=jnp.float32,
                   tm=tile, tk=tile, vmem_budget=budget)

    # Tail (global_mean_pool + lin + lin2) in plain XLA: G=2 rows / <=64,3 lanes
    # of work — microseconds, and avoids masked partial stores in the kernel.
    p = jnp.zeros((pool.shape[0], n_pad), jnp.float32).at[:, :n].set(pool)
    g = jnp.dot(p, h3)
    g = jnp.dot(g, params["wl"]) + params["bl"]
    return jnp.dot(g, params["wl2"]) + params["bl2"]


def reference_forward(a_hat, x, params, pool):
    """Pure-JAX f32 reference (dense equivalent of the PyTorch module)."""
    def layer(h, w, b, act):
        z = jnp.dot(a_hat, jnp.dot(h, w)) + b
        return _leaky_relu(z) if act else z
    h = layer(x, params["w1"], params["b1"], True)
    h = layer(h, params["w2"], params["b2"], True)
    h = layer(h, params["w3"], params["b3"], False)
    g = jnp.dot(pool, h)
    g = jnp.dot(g, params["wl"]) + params["bl"]
    return jnp.dot(g, params["wl2"]) + params["bl2"]


def build_norm_adj(edge_index, num_nodes):
    """Dense D^-1/2 (A + I) D^-1/2, matching GCNConv normalization w/ self-loops."""
    src, dst = edge_index[0], edge_index[1]
    a = jnp.zeros((num_nodes, num_nodes), jnp.float32).at[dst, src].set(1.0)
    eye = jnp.eye(num_nodes, dtype=jnp.float32)
    a = a * (1.0 - eye) + eye  # force unit self-loops (dedupe pre-existing ones)
    d = jax.lax.rsqrt(a.sum(axis=1))
    return a * d[:, None] * d[None, :]


def build_mean_pool(batch, num_graphs):
    """P[g, n] = 1/count_g if batch[n] == g else 0 (so P @ H = global_mean_pool)."""
    onehot = (batch[None, :] == jnp.arange(num_graphs)[:, None]).astype(jnp.float32)
    counts = jnp.maximum(onehot.sum(axis=1, keepdims=True), 1.0)
    return onehot / counts


def init_params(key, num_node_features, num_output_channels, hidden=256):
    ks = jax.random.split(key, 5)
    scale = 0.1

    def lin(k, fan_in, fan_out):
        return scale * jax.random.normal(k, (fan_in, fan_out), jnp.float32)

    return {
        "w1": lin(ks[0], num_node_features, hidden),
        "b1": jnp.zeros((1, hidden), jnp.float32),
        "w2": lin(ks[1], hidden, hidden),
        "b2": jnp.zeros((1, hidden), jnp.float32),
        "w3": lin(ks[2], hidden, hidden),
        "b3": jnp.zeros((1, hidden), jnp.float32),
        "wl": lin(ks[3], hidden, 64),
        "bl": jnp.zeros((1, 64), jnp.float32),
        "wl2": lin(ks[4], 64, num_output_channels),
        "bl2": jnp.zeros((1, num_output_channels), jnp.float32),
    }


if __name__ == "__main__":
    num_nodes = 8
    num_node_features = 4
    num_output_channels = 3
    num_graphs = 2

    key = jax.random.PRNGKey(0)
    k_x, k_p = jax.random.split(key)

    # Node features [N, F]
    x = jax.random.normal(k_x, (num_nodes, num_node_features), jnp.float32)

    # Two 4-node ring graphs, undirected (both directions), shape [2, E]
    src = jnp.array([0, 1, 1, 2, 2, 3, 3, 0, 4, 5, 5, 6, 6, 7, 7, 4], jnp.int32)
    dst = jnp.array([1, 0, 2, 1, 3, 2, 0, 3, 5, 4, 6, 5, 7, 6, 4, 7], jnp.int32)
    edge_index = jnp.stack([src, dst], axis=0)

    # Graph assignment per node
    batch = jnp.array([0, 0, 0, 0, 1, 1, 1, 1], jnp.int32)

    a_hat = build_norm_adj(edge_index, num_nodes)
    pool = build_mean_pool(batch, num_graphs)
    params = init_params(k_p, num_node_features, num_output_channels)

    fwd = jax.jit(simple_gcn_forward)
    out = jax.block_until_ready(fwd(a_hat, x, params, pool))

    assert out.shape == (num_graphs, num_output_channels)
    assert bool(jnp.all(jnp.isfinite(out)))

    # Loose tolerance: bf16 MXU operands with f32 accumulation vs f32 reference.
    ref = reference_forward(a_hat, x, params, pool)
    assert bool(jnp.allclose(out, ref, rtol=5e-2, atol=5e-2)), (out, ref)

    print("KERNEL_OK")
</pallas_src>

<mosaic_0001>
module attributes {stable_mosaic.version = 11 : i64} {
  func.func @gcn_layer_kernel(%arg0: i32, %arg1: i32, %arg2: memref<256x256xbf16, #tpu.memory_space<vmem>>, %arg3: memref<256x128xbf16, #tpu.memory_space<vmem>>, %arg4: memref<128x256xf32, #tpu.memory_space<vmem>>, %arg5: memref<1x256xf32, #tpu.memory_space<vmem>>, %arg6: memref<256x256xbf16, #tpu.memory_space<vmem>>, %arg7: memref<256x128xf32, #tpu.memory_space<vmem>>) attributes {dimension_semantics = [#tpu.dimension_semantics<parallel>, #tpu.dimension_semantics<arbitrary>], iteration_bounds = array<i64: 1, 1>, scalar_prefetch = 0 : i64, scratch_operands = 1 : i64, tpu.core_type = #tpu.core_type<tc>, window_params = [{transform_indices = @transform_0, window_bounds = array<i64: 256, 256>}, {pipeline_mode = #tpu.pipeline_mode<synchronous>, transform_indices = @transform_1, window_bounds = array<i64: 256, 128>}, {pipeline_mode = #tpu.pipeline_mode<synchronous>, transform_indices = @transform_2, window_bounds = array<i64: 128, 256>}, {pipeline_mode = #tpu.pipeline_mode<synchronous>, transform_indices = @transform_3, window_bounds = array<i64: 1, 256>}, {transform_indices = @transform_4, window_bounds = array<i64: 256, 256>}]} {
    %c0_i32 = arith.constant 0 : i32
    %0 = arith.cmpi eq, %arg1, %c0_i32 : i32
    %1 = arith.extui %0 : i1 to i32
    %c0_i32_0 = arith.constant 0 : i32
    %2 = arith.cmpi ne, %1, %c0_i32_0 : i32
    scf.if %2 {
      %cst_9 = arith.constant 0.000000e+00 : f32
      %15 = vector.broadcast %cst_9 : f32 to vector<256x128xf32>
      %c0_10 = arith.constant 0 : index
      %c0_11 = arith.constant 0 : index
      %16 = vector.load %arg7[%c0_10, %c0_11] : memref<256x128xf32, #tpu.memory_space<vmem>>, vector<256x128xf32>
      tpu.vector_store %arg7[%c0_10, %c0_11], %15 {strides = array<i32>} : memref<256x128xf32, #tpu.memory_space<vmem>>, vector<256x128xf32>,
    } else {
    }
    %c256_i32 = arith.constant 256 : i32
    %3 = arith.muli %arg1, %c256_i32 : i32
    %4 = tpu.assume_multiple %3, 256 : i32
    %5 = arith.index_cast %4 : i32 to index
    %c0 = arith.constant 0 : index
    %6 = vector.load %arg3[%5, %c0] : memref<256x128xbf16, #tpu.memory_space<vmem>>, vector<256x128xbf16>
    %c0_1 = arith.constant 0 : index
    %c0_2 = arith.constant 0 : index
    %7 = vector.load %arg7[%c0_1, %c0_2] : memref<256x128xf32, #tpu.memory_space<vmem>>, vector<256x128xf32>
    %c0_3 = arith.constant 0 : index
    %c0_4 = arith.constant 0 : index
    %8 = vector.load %arg2[%c0_3, %c0_4] : memref<256x256xbf16, #tpu.memory_space<vmem>>, vector<256x256xbf16>
    %cst = arith.constant dense<0.000000e+00> : vector<256x128xf32>
    %9 = tpu.matmul %8, %6, %cst {dimension_numbers = #tpu.dot_dimension_numbers<[1], [0], [0], [1], [0, 0, 1, 1], [], []>} : vector<256x256xbf16>, vector<256x128xbf16>, vector<256x128xf32> -> vector<256x128xf32>
    %10 = arith.addf %7, %9 : vector<256x128xf32>
    %c0_5 = arith.constant 0 : index
    %c0_6 = arith.constant 0 : index
    %11 = vector.load %arg7[%c0_5, %c0_6] : memref<256x128xf32, #tpu.memory_space<vmem>>, vector<256x128xf32>
    tpu.vector_store %arg7[%c0_5, %c0_6], %10 {strides = array<i32>} : memref<256x128xf32, #tpu.memory_space<vmem>>, vector<256x128xf32>,
    %c0_i32_7 = arith.constant 0 : i32
    %12 = arith.cmpi eq, %arg1, %c0_i32_7 : i32
    %13 = arith.extui %12 : i1 to i32
    %c0_i32_8 = arith.constant 0 : i32
    %14 = arith.cmpi ne, %13, %c0_i32_8 : i32
    scf.if %14 {
      %c0_9 = arith.constant 0 : index
      %c0_10 = arith.constant 0 : index
      %15 = vector.load %arg7[%c0_9, %c0_10] : memref<256x128xf32, #tpu.memory_space<vmem>>, vector<256x128xf32>
      %c0_11 = arith.constant 0 : index
      %c0_12 = arith.constant 0 : index
      %16 = vector.load %arg4[%c0_11, %c0_12] : memref<128x256xf32, #tpu.memory_space<vmem>>, vector<128x256xf32>
      %cst_13 = arith.constant dense<0.000000e+00> : vector<256x256xf32>
      %17 = tpu.matmul %15, %16, %cst_13 {dimension_numbers = #tpu.dot_dimension_numbers<[1], [0], [0], [1], [0, 0, 1, 1], [], []>} : vector<256x128xf32>, vector<128x256xf32>, vector<256x256xf32> -> vector<256x256xf32>
      %c0_14 = arith.constant 0 : index
      %c0_15 = arith.constant 0 : index
      %18 = vector.load %arg5[%c0_14, %c0_15] : memref<1x256xf32, #tpu.memory_space<vmem>>, vector<1x256xf32>
      %19 = vector.broadcast %18 : vector<1x256xf32> to vector<256x256xf32>
      %20 = arith.addf %17, %19 : vector<256x256xf32>
      %cst_16 = arith.constant 0.000000e+00 : f32
      %21 = vector.broadcast %cst_16 : f32 to vector<256x256xf32>
      %22 = arith.cmpf ogt, %20, %21 : vector<256x256xf32>
      %cst_17 = arith.constant 0.00999999977 : f32
      %23 = vector.broadcast %cst_17 : f32 to vector<256x256xf32>
      %24 = arith.mulf %23, %20 : vector<256x256xf32>
      %25 = arith.select %22, %20, %24 : vector<256x256xi1>, vector<256x256xf32>
      %26 = arith.truncf %25 : vector<256x256xf32> to vector<256x256xbf16>
      %c0_18 = arith.constant 0 : index
      %c0_19 = arith.constant 0 : index
      %27 = vector.load %arg6[%c0_18, %c0_19] : memref<256x256xbf16, #tpu.memory_space<vmem>>, vector<256x256xbf16>
      tpu.vector_store %arg6[%c0_18, %c0_19], %26 {strides = array<i32>} : memref<256x256xbf16, #tpu.memory_space<vmem>>, vector<256x256xbf16>,
    } else {
    }
    return
  }
  func.func @transform_0(%arg0: i32, %arg1: i32) -> (i32, i32) {
    %c0_i32 = arith.constant 0 : i32
    return %arg0, %arg1 : i32, i32
  }
  func.func @transform_1(%arg0: i32, %arg1: i32) -> (i32, i32) {
    %c0_i32 = arith.constant 0 : i32
    %c0_i32_0 = arith.constant 0 : i32
    %c0_i32_1 = arith.constant 0 : i32
    return %c0_i32, %c0_i32_0 : i32, i32
  }
  func.func @transform_2(%arg0: i32, %arg1: i32) -> (i32, i32) {
    %c0_i32 = arith.constant 0 : i32
    %c0_i32_0 = arith.constant 0 : i32
    %c0_i32_1 = arith.constant 0 : i32
    return %c0_i32, %c0_i32_0 : i32, i32
  }
  func.func @transform_3(%arg0: i32, %arg1: i32) -> (i32, i32) {
    %c0_i32 = arith.constant 0 : i32
    %c0_i32_0 = arith.constant 0 : i32
    %c0_i32_1 = arith.constant 0 : i32
    return %c0_i32, %c0_i32_0 : i32, i32
  }
  func.func @transform_4(%arg0: i32, %arg1: i32) -> (i32, i32) {
    %c0_i32 = arith.constant 0 : i32
    %c0_i32_0 = arith.constant 0 : i32
    return %arg0, %c0_i32 : i32, i32
  }
}

module attributes {stable_mosaic.version = 11 : i64} {
  func.func @gcn_layer_kernel(%arg0: i32, %arg1: i32, %arg2: memref<256x256xbf16, #tpu.memory_space<vmem>>, %arg3: memref<256x256xbf16, #tpu.memory_space<vmem>>, %arg4: memref<1x256xf32, #tpu.memory_space<vmem>>, %arg5: memref<256x256xf32, #tpu.memory_space<vmem>>, %arg6: memref<256x256xf32, #tpu.memory_space<vmem>>) attributes {dimension_semantics = [#tpu.dimension_semantics<parallel>, #tpu.dimension_semantics<arbitrary>], iteration_bounds = array<i64: 1, 1>, scalar_prefetch = 0 : i64, scratch_operands = 1 : i64, tpu.core_type = #tpu.core_type<tc>, window_params = [{transform_indices = @transform_0, window_bounds = array<i64: 256, 256>}, {pipeline_mode = #tpu.pipeline_mode<synchronous>, transform_indices = @transform_1, window_bounds = array<i64: 256, 256>}, {pipeline_mode = #tpu.pipeline_mode<synchronous>, transform_indices = @transform_2, window_bounds = array<i64: 1, 256>}, {transform_indices = @transform_3, window_bounds = array<i64: 256, 256>}]} {
    %c0_i32 = arith.constant 0 : i32
    %0 = arith.cmpi eq, %arg1, %c0_i32 : i32
    %1 = arith.extui %0 : i1 to i32
    %c0_i32_0 = arith.constant 0 : i32
    %2 = arith.cmpi ne, %1, %c0_i32_0 : i32
    scf.if %2 {
      %cst_9 = arith.constant 0.000000e+00 : f32
      %15 = vector.broadcast %cst_9 : f32 to vector<256x256xf32>
      %c0_10 = arith.constant 0 : index
      %c0_11 = arith.constant 0 : index
      %16 = vector.load %arg6[%c0_10, %c0_11] : memref<256x256xf32, #tpu.memory_space<vmem>>, vector<256x256xf32>
      tpu.vector_store %arg6[%c0_10, %c0_11], %15 {strides = array<i32>} : memref<256x256xf32, #tpu.memory_space<vmem>>, vector<256x256xf32>,
    } else {
    }
    %c256_i32 = arith.constant 256 : i32
    %3 = arith.muli %arg1, %c256_i32 : i32
    %4 = tpu.assume_multiple %3, 256 : i32
    %5 = arith.index_cast %4 : i32 to index
    %c0 = arith.constant 0 : index
    %6 = vector.load %arg3[%5, %c0] : memref<256x256xbf16, #tpu.memory_space<vmem>>, vector<256x256xbf16>
    %c0_1 = arith.constant 0 : index
    %c0_2 = arith.constant 0 : index
    %7 = vector.load %arg6[%c0_1, %c0_2] : memref<256x256xf32, #tpu.memory_space<vmem>>, vector<256x256xf32>
    %c0_3 = arith.constant 0 : index
    %c0_4 = arith.constant 0 : index
    %8 = vector.load %arg2[%c0_3, %c0_4] : memref<256x256xbf16, #tpu.memory_space<vmem>>, vector<256x256xbf16>
    %cst = arith.constant dense<0.000000e+00> : vector<256x256xf32>
    %9 = tpu.matmul %8, %6, %cst {dimension_numbers = #tpu.dot_dimension_numbers<[1], [0], [0], [1], [0, 0, 1, 1], [], []>} : vector<256x256xbf16>, vector<256x256xbf16>, vector<256x256xf32> -> vector<256x256xf32>
    %10 = arith.addf %7, %9 : vector<256x256xf32>
    %c0_5 = arith.constant 0 : index
    %c0_6 = arith.constant 0 : index
    %11 = vector.load %arg6[%c0_5, %c0_6] : memref<256x256xf32, #tpu.memory_space<vmem>>, vector<256x256xf32>
    tpu.vector_store %arg6[%c0_5, %c0_6], %10 {strides = array<i32>} : memref<256x256xf32, #tpu.memory_space<vmem>>, vector<256x256xf32>,
    %c0_i32_7 = arith.constant 0 : i32
    %12 = arith.cmpi eq, %arg1, %c0_i32_7 : i32
    %13 = arith.extui %12 : i1 to i32
    %c0_i32_8 = arith.constant 0 : i32
    %14 = arith.cmpi ne, %13, %c0_i32_8 : i32
    scf.if %14 {
      %c0_9 = arith.constant 0 : index
      %c0_10 = arith.constant 0 : index
      %15 = vector.load %arg6[%c0_9, %c0_10] : memref<256x256xf32, #tpu.memory_space<vmem>>, vector<256x256xf32>
      %c0_11 = arith.constant 0 : index
      %c0_12 = arith.constant 0 : index
      %16 = vector.load %arg4[%c0_11, %c0_12] : memref<1x256xf32, #tpu.memory_space<vmem>>, vector<1x256xf32>
      %17 = vector.broadcast %16 : vector<1x256xf32> to vector<256x256xf32>
      %18 = arith.addf %15, %17 : vector<256x256xf32>
      %c0_13 = arith.constant 0 : index
      %c0_14 = arith.constant 0 : index
      %19 = vector.load %arg5[%c0_13, %c0_14] : memref<256x256xf32, #tpu.memory_space<vmem>>, vector<256x256xf32>
      tpu.vector_store %arg5[%c0_13, %c0_14], %18 {strides = array<i32>} : memref<256x256xf32, #tpu.memory_space<vmem>>, vector<256x256xf32>,
    } else {
    }
    return
  }
  func.func @transform_0(%arg0: i32, %arg1: i32) -> (i32, i32) {
    %c0_i32 = arith.constant 0 : i32
    return %arg0, %arg1 : i32, i32
  }
  func.func @transform_1(%arg0: i32, %arg1: i32) -> (i32, i32) {
    %c0_i32 = arith.constant 0 : i32
    %c0_i32_0 = arith.constant 0 : i32
    %c0_i32_1 = arith.constant 0 : i32
    return %c0_i32, %c0_i32_0 : i32, i32
  }
  func.func @transform_2(%arg0: i32, %arg1: i32) -> (i32, i32) {
    %c0_i32 = arith.constant 0 : i32
    %c0_i32_0 = arith.constant 0 : i32
    %c0_i32_1 = arith.constant 0 : i32
    return %c0_i32, %c0_i32_0 : i32, i32
  }
  func.func @transform_3(%arg0: i32, %arg1: i32) -> (i32, i32) {
    %c0_i32 = arith.constant 0 : i32
    %c0_i32_0 = arith.constant 0 : i32
    return %arg0, %c0_i32 : i32, i32
  }
}

module attributes {stable_mosaic.version = 11 : i64} {
  func.func @gcn_layer_kernel(%arg0: i32, %arg1: i32, %arg2: memref<256x256xbf16, #tpu.memory_space<vmem>>, %arg3: memref<256x256xbf16, #tpu.memory_space<vmem>>, %arg4: memref<1x256xf32, #tpu.memory_space<vmem>>, %arg5: memref<256x256xbf16, #tpu.memory_space<vmem>>, %arg6: memref<256x256xf32, #tpu.memory_space<vmem>>) attributes {dimension_semantics = [#tpu.dimension_semantics<parallel>, #tpu.dimension_semantics<arbitrary>], iteration_bounds = array<i64: 1, 1>, scalar_prefetch = 0 : i64, scratch_operands = 1 : i64, tpu.core_type = #tpu.core_type<tc>, window_params = [{transform_indices = @transform_0, window_bounds = array<i64: 256, 256>}, {pipeline_mode = #tpu.pipeline_mode<synchronous>, transform_indices = @transform_1, window_bounds = array<i64: 256, 256>}, {pipeline_mode = #tpu.pipeline_mode<synchronous>, transform_indices = @transform_2, window_bounds = array<i64: 1, 256>}, {transform_indices = @transform_3, window_bounds = array<i64: 256, 256>}]} {
    %c0_i32 = arith.constant 0 : i32
    %0 = arith.cmpi eq, %arg1, %c0_i32 : i32
    %1 = arith.extui %0 : i1 to i32
    %c0_i32_0 = arith.constant 0 : i32
    %2 = arith.cmpi ne, %1, %c0_i32_0 : i32
    scf.if %2 {
      %cst_9 = arith.constant 0.000000e+00 : f32
      %15 = vector.broadcast %cst_9 : f32 to vector<256x256xf32>
      %c0_10 = arith.constant 0 : index
      %c0_11 = arith.constant 0 : index
      %16 = vector.load %arg6[%c0_10, %c0_11] : memref<256x256xf32, #tpu.memory_space<vmem>>, vector<256x256xf32>
      tpu.vector_store %arg6[%c0_10, %c0_11], %15 {strides = array<i32>} : memref<256x256xf32, #tpu.memory_space<vmem>>, vector<256x256xf32>,
    } else {
    }
    %c256_i32 = arith.constant 256 : i32
    %3 = arith.muli %arg1, %c256_i32 : i32
    %4 = tpu.assume_multiple %3, 256 : i32
    %5 = arith.index_cast %4 : i32 to index
    %c0 = arith.constant 0 : index
    %6 = vector.load %arg3[%5, %c0] : memref<256x256xbf16, #tpu.memory_space<vmem>>, vector<256x256xbf16>
    %c0_1 = arith.constant 0 : index
    %c0_2 = arith.constant 0 : index
    %7 = vector.load %arg6[%c0_1, %c0_2] : memref<256x256xf32, #tpu.memory_space<vmem>>, vector<256x256xf32>
    %c0_3 = arith.constant 0 : index
    %c0_4 = arith.constant 0 : index
    %8 = vector.load %arg2[%c0_3, %c0_4] : memref<256x256xbf16, #tpu.memory_space<vmem>>, vector<256x256xbf16>
    %cst = arith.constant dense<0.000000e+00> : vector<256x256xf32>
    %9 = tpu.matmul %8, %6, %cst {dimension_numbers = #tpu.dot_dimension_numbers<[1], [0], [0], [1], [0, 0, 1, 1], [], []>} : vector<256x256xbf16>, vector<256x256xbf16>, vector<256x256xf32> -> vector<256x256xf32>
    %10 = arith.addf %7, %9 : vector<256x256xf32>
    %c0_5 = arith.constant 0 : index
    %c0_6 = arith.constant 0 : index
    %11 = vector.load %arg6[%c0_5, %c0_6] : memref<256x256xf32, #tpu.memory_space<vmem>>, vector<256x256xf32>
    tpu.vector_store %arg6[%c0_5, %c0_6], %10 {strides = array<i32>} : memref<256x256xf32, #tpu.memory_space<vmem>>, vector<256x256xf32>,
    %c0_i32_7 = arith.constant 0 : i32
    %12 = arith.cmpi eq, %arg1, %c0_i32_7 : i32
    %13 = arith.extui %12 : i1 to i32
    %c0_i32_8 = arith.constant 0 : i32
    %14 = arith.cmpi ne, %13, %c0_i32_8 : i32
    scf.if %14 {
      %c0_9 = arith.constant 0 : index
      %c0_10 = arith.constant 0 : index
      %15 = vector.load %arg6[%c0_9, %c0_10] : memref<256x256xf32, #tpu.memory_space<vmem>>, vector<256x256xf32>
      %c0_11 = arith.constant 0 : index
      %c0_12 = arith.constant 0 : index
      %16 = vector.load %arg4[%c0_11, %c0_12] : memref<1x256xf32, #tpu.memory_space<vmem>>, vector<1x256xf32>
      %17 = vector.broadcast %16 : vector<1x256xf32> to vector<256x256xf32>
      %18 = arith.addf %15, %17 : vector<256x256xf32>
      %cst_13 = arith.constant 0.000000e+00 : f32
      %19 = vector.broadcast %cst_13 : f32 to vector<256x256xf32>
      %20 = arith.cmpf ogt, %18, %19 : vector<256x256xf32>
      %cst_14 = arith.constant 0.00999999977 : f32
      %21 = vector.broadcast %cst_14 : f32 to vector<256x256xf32>
      %22 = arith.mulf %21, %18 : vector<256x256xf32>
      %23 = arith.select %20, %18, %22 : vector<256x256xi1>, vector<256x256xf32>
      %24 = arith.truncf %23 : vector<256x256xf32> to vector<256x256xbf16>
      %c0_15 = arith.constant 0 : index
      %c0_16 = arith.constant 0 : index
      %25 = vector.load %arg5[%c0_15, %c0_16] : memref<256x256xbf16, #tpu.memory_space<vmem>>, vector<256x256xbf16>
      tpu.vector_store %arg5[%c0_15, %c0_16], %24 {strides = array<i32>} : memref<256x256xbf16, #tpu.memory_space<vmem>>, vector<256x256xbf16>,
    } else {
    }
    return
  }
  func.func @transform_0(%arg0: i32, %arg1: i32) -> (i32, i32) {
    %c0_i32 = arith.constant 0 : i32
    return %arg0, %arg1 : i32, i32
  }
  func.func @transform_1(%arg0: i32, %arg1: i32) -> (i32, i32) {
    %c0_i32 = arith.constant 0 : i32
    %c0_i32_0 = arith.constant 0 : i32
    %c0_i32_1 = arith.constant 0 : i32
    return %c0_i32, %c0_i32_0 : i32, i32
  }
  func.func @transform_2(%arg0: i32, %arg1: i32) -> (i32, i32) {
    %c0_i32 = arith.constant 0 : i32
    %c0_i32_0 = arith.constant 0 : i32
    %c0_i32_1 = arith.constant 0 : i32
    return %c0_i32, %c0_i32_0 : i32, i32
  }
  func.func @transform_3(%arg0: i32, %arg1: i32) -> (i32, i32) {
    %c0_i32 = arith.constant 0 : i32
    %c0_i32_0 = arith.constant 0 : i32
    return %arg0, %c0_i32 : i32, i32
  }
}

</mosaic_0001>

<bundles_post_ra>
// kernel: simple_gcn_forward.3
= control target key start
LH: loop header
LB: loop body
LE: loop exit
PB: predicated region body
PF: predicated region fallthrough
CT: control target
= control target key end

     0   :  { %s1981_s1 = inlined_call_operand.vmem [shape: bf16[256,128], index: 1, kind: input, shape index: {}]   ;;  %s1982_s0 = inlined_call_operand.vmem [shape: bf16[256,256], index: 0, kind: input, shape index: {}]   ;;  %s1983_s2 = inlined_call_operand.vmem [shape: f32[128,256], index: 2, kind: input, shape index: {}]   ;;  %s1984_s3 = inlined_call_operand.vmem [shape: f32[1,256], index: 3, kind: input, shape index: {}]   ;;  %s1985_s4 = inlined_call_operand.vmem [shape: bf16[256,256], index: 4, kind: output, shape index: {}]  }
   0x1   :  { %v1412_v0 = vld [vmem:[%s1981_s1 + $0x38] sm:$0xff]  ;;  %v1411_v2 = vld [vmem:[%s1981_s1 + $0x30] sm:$0xff]  ;;  %v1410_v4 = vld [vmem:[%s1981_s1 + $0x28] sm:$0xff] }
   0x2   :  { %v1420_v1 = vld [vmem:[%s1981_s1 + $0x78] sm:$0xff]  ;;  %410 = vmatpush.bf16.msra.mxu0 %v1412_v0  ;;  %v1419_v3 = vld [vmem:[%s1981_s1 + $0x70] sm:$0xff]  ;;  %v1418_v5 = vld [vmem:[%s1981_s1 + $0x68] sm:$0xff] }
   0x3   :  { %499 = vmatpush.bf16.msra.mxu1 %v1420_v1  ;;  %v1409_v6 = vld [vmem:[%s1981_s1 + $0x20] sm:$0xff]  ;;  %v1408_v8 = vld [vmem:[%s1981_s1 + $0x18] sm:$0xff]  ;;  %v1407_v10 = vld [vmem:[%s1981_s1 + $0x10] sm:$0xff] }
   0x4   :  { %v1417_v7 = vld [vmem:[%s1981_s1 + $0x60] sm:$0xff]  ;;  %v1416_v9 = vld [vmem:[%s1981_s1 + $0x58] sm:$0xff]  ;;  %v1415_v11 = vld [vmem:[%s1981_s1 + $0x50] sm:$0xff] }
   0x5   :  { %v1406_v12 = vld [vmem:[%s1981_s1 + $0x8] sm:$0xff]  ;;  %v1405_v14 = vld [vmem:[%s1981_s1] sm:$0xff]  ;;  %v1223_v22 = vld [vmem:[%s1982_s0 + $0x10] sm:$0xf] }
   0x6   :  { %411 = vmatpush.bf16.msra.mxu0 %v1411_v2  ;;  %v1414_v13 = vld [vmem:[%s1981_s1 + $0x48] sm:$0xff]  ;;  %v1413_v15 = vld [vmem:[%s1981_s1 + $0x40] sm:$0xff]  ;;  %v1424_v23 = vld [vmem:[%s1982_s0 + $0x14] sm:$0xf0] }
   0x7   :  { %500 = vmatpush.bf16.msra.mxu1 %v1419_v3  ;;  %v1215_v16 = vld [vmem:[%s1982_s0] sm:$0xf]  ;;  %v1422_v17 = vld [vmem:[%s1982_s0 + $0x4] sm:$0xf0]  ;;  %v1421_v18 = vld [vmem:[%s1982_s0 + $0x4] sm:$0xf]  ;;  %v1224_v26 = vor.u32 %v1424_v23, %v1223_v22 }
   0x8   :  { %v1217_v19 = vld [vmem:[%s1982_s0 + $0x8] sm:$0xf0]  ;;  %v1216_v20 = vor.u32 %v1422_v17, %v1215_v16  ;;  %v1423_v24 = vld [vmem:[%s1982_s0 + $0x14] sm:$0xf]  ;;  %v1225_v25 = vld [vmem:[%s1982_s0 + $0x18] sm:$0xf0] }
   0x9   :  { %v1220_v21 = vor.u32 %v1421_v18, %v1217_v19  ;;  %v1228_v27 = vor.u32 %v1423_v24, %v1225_v25  ;;  %v1231_v28 = vld [vmem:[%s1982_s0 + $0x20] sm:$0xf]  ;;  %v1426_v29 = vld [vmem:[%s1982_s0 + $0x24] sm:$0xf0]  ;;  %v1425_v30 = vld [vmem:[%s1982_s0 + $0x24] sm:$0xf] }
   0xa   :  { %412 = vmatpush.bf16.msra.mxu0 %v1410_v4  ;;  %v1233_v31 = vld [vmem:[%s1982_s0 + $0x28] sm:$0xf0]  ;;  %v1232_v32 = vor.u32 %v1426_v29, %v1231_v28  ;;  %v1239_v34 = vld [vmem:[%s1982_s0 + $0x30] sm:$0xf]  ;;  %v1428_v35 = vld [vmem:[%s1982_s0 + $0x34] sm:$0xf0] }
   0xb   :  { %501 = vmatpush.bf16.msra.mxu1 %v1418_v5  ;;  %v1236_v33 = vor.u32 %v1425_v30, %v1233_v31  ;;  %v1427_v36 = vld [vmem:[%s1982_s0 + $0x34] sm:$0xf]  ;;  %v1241_v37 = vld [vmem:[%s1982_s0 + $0x38] sm:$0xf0]  ;;  %v1240_v38 = vor.u32 %v1428_v35, %v1239_v34  ;;  %v1247_v40 = vld [vmem:[%s1982_s0 + $0x40] sm:$0xf] }
   0xc   :  { %v1244_v39 = vor.u32 %v1427_v36, %v1241_v37  ;;  %v1430_v41 = vld [vmem:[%s1982_s0 + $0x44] sm:$0xf0]  ;;  %v1429_v42 = vld [vmem:[%s1982_s0 + $0x44] sm:$0xf]  ;;  %v1249_v43 = vld [vmem:[%s1982_s0 + $0x48] sm:$0xf0] }
   0xd   :  { %v1248_v44 = vor.u32 %v1430_v41, %v1247_v40  ;;  %v1252_v45 = vor.u32 %v1429_v42, %v1249_v43  ;;  %v717_v46 = vld [vmem:[%s1983_s2 + $0xf0] sm:$0xff]  ;;  %v718_v47 = vld [vmem:[%s1983_s2 + $0xf8] sm:$0xff]  ;;  %v715_v48 = vld [vmem:[%s1983_s2 + $0xe0] sm:$0xff] }
   0xe   :  { %413 = vmatpush.bf16.msra.mxu0 %v1409_v6  ;;  %725 = vmatpush.msra.mxu2 %v717_v46  ;;  %v716_v49 = vld [vmem:[%s1983_s2 + $0xe8] sm:$0xff]  ;;  %v713_v50 = vld [vmem:[%s1983_s2 + $0xd0] sm:$0xff]  ;;  %v714_v51 = vld [vmem:[%s1983_s2 + $0xd8] sm:$0xff] }
   0xf   :  { %502 = vmatpush.bf16.msra.mxu1 %v1417_v7  ;;  %838 = vmatpush.msra.mxu3 %v718_v47  ;;  %v711_v52 = vld [vmem:[%s1983_s2 + $0xc0] sm:$0xff]  ;;  %v712_v53 = vld [vmem:[%s1983_s2 + $0xc8] sm:$0xff]  ;;  %v709_v54 = vld [vmem:[%s1983_s2 + $0xb0] sm:$0xff] }
  0x10   :  { %726 = vmatpush.msra.mxu2 %v715_v48  ;;  %v710_v55 = vld [vmem:[%s1983_s2 + $0xb8] sm:$0xff]  ;;  %v1255_v56 = vld [vmem:[%s1982_s0 + $0x50] sm:$0xf]  ;;  %v707_v57 = vld [vmem:[%s1983_s2 + $0xa0] sm:$0xff] }
  0x11   :  { %839 = vmatpush.msra.mxu3 %v716_v49  ;;  %v708_v58 = vld [vmem:[%s1983_s2 + $0xa8] sm:$0xff]  ;;  %v1432_v59 = vld [vmem:[%s1982_s0 + $0x54] sm:$0xf0]  ;;  %v1431_v60 = vld [vmem:[%s1982_s0 + $0x54] sm:$0xf] }
  0x12   :  { %414 = vmatpush.bf16.msra.mxu0 %v1408_v8  ;;  %727 = vmatpush.msra.mxu2 %v713_v50  ;;  %v1257_v61 = vld [vmem:[%s1982_s0 + $0x58] sm:$0xf0]  ;;  %v705_v62 = vld [vmem:[%s1983_s2 + $0x90] sm:$0xff]  ;;  %v1256_v0 = vor.u32 %v1432_v59, %v1255_v56  ;;  %v703_v2 = vld [vmem:[%s1983_s2 + $0x80] sm:$0xff] }
  0x13   :  { %503 = vmatpush.bf16.msra.mxu1 %v1416_v9  ;;  %840 = vmatpush.msra.mxu3 %v714_v51  ;;  %v706_v63 = vld [vmem:[%s1983_s2 + $0x98] sm:$0xff]  ;;  %v1260_v1 = vor.u32 %v1431_v60, %v1257_v61  ;;  %v704_v3 = vld [vmem:[%s1983_s2 + $0x88] sm:$0xff]  ;;  %v701_v4 = vld [vmem:[%s1983_s2 + $0x70] sm:$0xff] }
  0x14   :  { %728 = vmatpush.msra.mxu2 %v711_v52  ;;  %v702_v5 = vld [vmem:[%s1983_s2 + $0x78] sm:$0xff]  ;;  %v699_v6 = vld [vmem:[%s1983_s2 + $0x60] sm:$0xff]  ;;  %v700_v7 = vld [vmem:[%s1983_s2 + $0x68] sm:$0xff] }
  0x15   :  { %841 = vmatpush.msra.mxu3 %v712_v53  ;;  %v697_v8 = vld [vmem:[%s1983_s2 + $0x50] sm:$0xff]  ;;  %v698_v9 = vld [vmem:[%s1983_s2 + $0x58] sm:$0xff]  ;;  %v692_v16 = vld [vmem:[%s1983_s2 + $0x28] sm:$0xff] }
  0x16   :  { %415 = vmatpush.bf16.msra.mxu0 %v1407_v10  ;;  %729 = vmatpush.msra.mxu2 %v709_v54  ;;  %v695_v10 = vld [vmem:[%s1983_s2 + $0x40] sm:$0xff]  ;;  %v1434_v17 = vld [vmem:[%s1982_s0 + $0x64] sm:$0xf0]  ;;  %v1265_v19 = vld [vmem:[%s1982_s0 + $0x68] sm:$0xf0] }
  0x17   :  { %504 = vmatpush.bf16.msra.mxu1 %v1415_v11  ;;  %842 = vmatpush.msra.mxu3 %v710_v55  ;;  %v696_v11 = vld [vmem:[%s1983_s2 + $0x48] sm:$0xff]  ;;  %v1433_v18 = vld [vmem:[%s1982_s0 + $0x64] sm:$0xf]  ;;  %v689_v22 = vld [vmem:[%s1983_s2 + $0x10] sm:$0xff] }
  0x18   :  { %730 = vmatpush.msra.mxu2 %v707_v57  ;;  %v690_v23 = vld [vmem:[%s1983_s2 + $0x18] sm:$0xff]  ;;  %v687_v24 = vld [vmem:[%s1983_s2] sm:$0xff]  ;;  %v688_v25 = vld [vmem:[%s1983_s2 + $0x8] sm:$0xff] }
  0x19   :  { %843 = vmatpush.msra.mxu3 %v708_v58  ;;  %v1435_v28 = vld [vmem:[%s1982_s0 + $0x74] sm:$0xf]  ;;  %v1273_v29 = vld [vmem:[%s1982_s0 + $0x78] sm:$0xf0]  ;;  %v1437_v34 = vld [vmem:[%s1982_s0 + $0x84] sm:$0xf] }
  0x1a   :  { %416 = vmatpush.bf16.msra.mxu0 %v1406_v12  ;;  %731 = vmatpush.msra.mxu2 %v705_v62  ;;  %v693_v12 = vld [vmem:[%s1983_s2 + $0x30] sm:$0xff]  ;;  %v1276_v31 = vor.u32 %v1435_v28, %v1273_v29  ;;  %v1281_v35 = vld [vmem:[%s1982_s0 + $0x88] sm:$0xf0]  ;;  %v1289_v47 = vld [vmem:[%s1982_s0 + $0x98] sm:$0xf0] }
  0x1b   :  { %505 = vmatpush.bf16.msra.mxu1 %v1414_v13  ;;  %844 = vmatpush.msra.mxu3 %v706_v63  ;;  %v694_v13 = vld [vmem:[%s1983_s2 + $0x38] sm:$0xff]  ;;  %v1284_v37 = vor.u32 %v1437_v34, %v1281_v35  ;;  %v1439_v46 = vld [vmem:[%s1982_s0 + $0x94] sm:$0xf]  ;;  %v1295_v56 = vld [vmem:[%s1982_s0 + $0xa0] sm:$0xf] }
  0x1c   :  { %732 = vmatpush.msra.mxu2 %v703_v2  ;;  %v1292_v49 = vor.u32 %v1439_v46, %v1289_v47  ;;  %v1442_v57 = vld [vmem:[%s1982_s0 + $0xa4] sm:$0xf0]  ;;  %v1441_v58 = vld [vmem:[%s1982_s0 + $0xa4] sm:$0xf]  ;;  %v1297_v59 = vld [vmem:[%s1982_s0 + $0xa8] sm:$0xf0] }
  0x1d   :  { %845 = vmatpush.msra.mxu3 %v704_v3  ;;  %v1296_v60 = vor.u32 %v1442_v57, %v1295_v56  ;;  %v1300_v61 = vor.u32 %v1441_v58, %v1297_v59  ;;  %v1319_v28 = vld [vmem:[%s1982_s0 + $0xd0] sm:$0xf]  ;;  %v1448_v29 = vld [vmem:[%s1982_s0 + $0xd4] sm:$0xf0] }
  0x1e   :  { %417 = vmatpush.bf16.msra.mxu0 %v1405_v14  ;;  %733 = vmatpush.msra.mxu2 %v701_v4  ;;  %v1263_v14 = vld [vmem:[%s1982_s0 + $0x60] sm:$0xf]  ;;  %v1303_v4 = vld [vmem:[%s1982_s0 + $0xb0] sm:$0xf] }
  0x1f   :  { %506 = vmatpush.bf16.msra.mxu1 %v1413_v15  ;;  %846 = vmatpush.msra.mxu3 %v702_v5  ;;  %v691_v15 = vld [vmem:[%s1983_s2 + $0x20] sm:$0xff]  ;;  %v1444_v5 = vld [vmem:[%s1982_s0 + $0xb4] sm:$0xf0] }
  0x20   :  { %734 = vmatpush.msra.mxu2 %v699_v6  ;;  %v1443_v6 = vld [vmem:[%s1982_s0 + $0xb4] sm:$0xf] }
  0x21   :  { %418 = vmatmul.bf16.vlgmr.msra.gmra.mxu0 %v1216_v20  ;;  %847 = vmatpush.msra.mxu3 %v700_v7  ;;  %v1264_v20 = vor.u32 %v1434_v17, %v1263_v14  ;;  %v1305_v7 = vld [vmem:[%s1982_s0 + $0xb8] sm:$0xf0]  ;;  %v1446_v17 = vld [vmem:[%s1982_s0 + $0xc4] sm:$0xf0] }
  0x22   :  { %507 = vmatmul.bf16.vlgmr.msra.gmra.mxu1 %v1220_v21  ;;  %735 = vmatpush.msra.mxu2 %v697_v8  ;;  %v1268_v21 = vor.u32 %v1433_v18, %v1265_v19  ;;  %v1304_v8 = vor.u32 %v1444_v5, %v1303_v4  ;;  %v1445_v18 = vld [vmem:[%s1982_s0 + $0xc4] sm:$0xf]  ;;  %v1313_v19 = vld [vmem:[%s1982_s0 + $0xc8] sm:$0xf0] }
  0x23   :  { %848 = vmatpush.msra.mxu3 %v698_v9  ;;  %v1308_v9 = vor.u32 %v1443_v6, %v1305_v7 }
  0x24   :  { %736 = vmatpush.msra.mxu2 %v695_v10 }
  0x25   :  { %849 = vmatpush.msra.mxu3 %v696_v11 }
  0x26   :  { %737 = vmatpush.msra.mxu2 %v693_v12 }
  0x27   :  { %850 = vmatpush.msra.mxu3 %v694_v13 }
  0x28   :  { %738 = vmatpush.msra.mxu2 %v691_v15 }
  0x29   :  { %851 = vmatpush.msra.mxu3 %v692_v16  ;;  %v1311_v16 = vld [vmem:[%s1982_s0 + $0xc0] sm:$0xf] }
  0x2a   :  { %739 = vmatpush.msra.mxu2 %v689_v22 }
  0x2b   :  { %852 = vmatpush.msra.mxu3 %v690_v23 }
  0x2c   :  { %740 = vmatpush.msra.mxu2 %v687_v24 }
  0x2d   :  { %853 = vmatpush.msra.mxu3 %v688_v25 }
  0x31   :  { %423 = vmatmul.bf16.gmra.mxu0 %v1224_v26  ;;  %v1271_v26 = vld [vmem:[%s1982_s0 + $0x70] sm:$0xf] }
  0x32   :  { %512 = vmatmul.bf16.gmra.mxu1 %v1228_v27  ;;  %v1436_v27 = vld [vmem:[%s1982_s0 + $0x74] sm:$0xf0] }
  0x33   :  { %v1272_v30 = vor.u32 %v1436_v27, %v1271_v26 }
  0x41   :  { %428 = vmatmul.bf16.gmra.mxu0 %v1232_v32  ;;  %v1279_v32 = vld [vmem:[%s1982_s0 + $0x80] sm:$0xf] }
  0x42   :  { %517 = vmatmul.bf16.gmra.mxu1 %v1236_v33  ;;  %v1438_v33 = vld [vmem:[%s1982_s0 + $0x84] sm:$0xf0] }
  0x43   :  { %v1280_v36 = vor.u32 %v1438_v33, %v1279_v32  ;;  %v1320_v32 = vor.u32 %v1448_v29, %v1319_v28 }
  0x51   :  { %433 = vmatmul.bf16.gmra.mxu0 %v1240_v38 }
  0x52   :  { %522 = vmatmul.bf16.gmra.mxu1 %v1244_v39 }
  0x61   :  { %438 = vmatmul.bf16.gmra.mxu0 %v1248_v44  ;;  %v1287_v44 = vld [vmem:[%s1982_s0 + $0x90] sm:$0xf] }
  0x62   :  { %527 = vmatmul.bf16.gmra.mxu1 %v1252_v45  ;;  %v1440_v45 = vld [vmem:[%s1982_s0 + $0x94] sm:$0xf0] }
  0x63   :  { %v1288_v48 = vor.u32 %v1440_v45, %v1287_v44 }
  0x71   :  { %443 = vmatmul.bf16.gmra.mxu0 %v1256_v0 }
  0x72   :  { %532 = vmatmul.bf16.gmra.mxu1 %v1260_v1 }
  0x81   :  { %448 = vmatmul.bf16.gmra.mxu0 %v1264_v20  ;;  %v1312_v20 = vor.u32 %v1446_v17, %v1311_v16 }
  0x82   :  { %537 = vmatmul.bf16.gmra.mxu1 %v1268_v21  ;;  %v1316_v21 = vor.u32 %v1445_v18, %v1313_v19 }
  0x91   :  { %453 = vmatmul.bf16.gmra.mxu0 %v1272_v30  ;;  %v1447_v30 = vld [vmem:[%s1982_s0 + $0xd4] sm:$0xf] }
  0x92   :  { %542 = vmatmul.bf16.gmra.mxu1 %v1276_v31  ;;  %v1321_v31 = vld [vmem:[%s1982_s0 + $0xd8] sm:$0xf0] }
  0x93   :  { %v1324_v33 = vor.u32 %v1447_v30, %v1321_v31 }
  0x9e   :  { %v419_v38 = vpop.f32.mrf.mxu0 }
  0x9f   :  { %v508_v39 = vpop.f32.mrf.mxu1 }
  0xa0   :  { %v509_v40 = vadd.f32 %v508_v39, %v419_v38 }
  0xa1   :  { %458 = vmatmul.bf16.gmra.mxu0 %v1280_v36 }
  0xa2   :  { %547 = vmatmul.bf16.gmra.mxu1 %v1284_v37  ;;  %741 = vmatmul.f32.vlgmr.msra.gmra.mxu2 %v509_v40 }
  0xa3   :  { %854 = vmatmul.f32.vlgmr.msra.gmra.mxu3 %v509_v40  ;;  %v1327_v40 = vld [vmem:[%s1982_s0 + $0xe0] sm:$0xf] }
  0xa6   :  { %v421_v41 = vpop.f32.mrf.mxu0 }
  0xa7   :  { %v510_v42 = vpop.f32.mrf.mxu1 }
  0xa8   :  { %v511_v43 = vadd.f32 %v510_v42, %v421_v41  ;;  %v1450_v41 = vld [vmem:[%s1982_s0 + $0xe4] sm:$0xf0]  ;;  %v1449_v42 = vld [vmem:[%s1982_s0 + $0xe4] sm:$0xf] }
  0xa9   :  { %v1328_v44 = vor.u32 %v1450_v41, %v1327_v40 }
  0xaa   :  { %744 = vmatmul.f32.gmra.mxu2 %v511_v43 }
  0xab   :  { %857 = vmatmul.f32.gmra.mxu3 %v511_v43  ;;  %v1329_v43 = vld [vmem:[%s1982_s0 + $0xe8] sm:$0xf0] }
  0xac   :  { %v1332_v45 = vor.u32 %v1449_v42, %v1329_v43 }
  0xae   :  { %v424_v50 = vpop.f32.mrf.mxu0 }
  0xaf   :  { %v513_v51 = vpop.f32.mrf.mxu1 }
  0xb0   :  { %v514_v52 = vadd.f32 %v513_v51, %v424_v50 }
  0xb1   :  { %463 = vmatmul.bf16.gmra.mxu0 %v1288_v48 }
  0xb2   :  { %552 = vmatmul.bf16.gmra.mxu1 %v1292_v49  ;;  %747 = vmatmul.f32.gmra.mxu2 %v514_v52 }
  0xb3   :  { %860 = vmatmul.f32.gmra.mxu3 %v514_v52  ;;  %v1335_v52 = vld [vmem:[%s1982_s0 + $0xf0] sm:$0xf] }
  0xb6   :  { %v426_v53 = vpop.f32.mrf.mxu0 }
  0xb7   :  { %v515_v54 = vpop.f32.mrf.mxu1 }
  0xb8   :  { %v516_v55 = vadd.f32 %v515_v54, %v426_v53  ;;  %v1452_v53 = vld [vmem:[%s1982_s0 + $0xf4] sm:$0xf0]  ;;  %v1451_v54 = vld [vmem:[%s1982_s0 + $0xf4] sm:$0xf] }
  0xb9   :  { %v1336_v56 = vor.u32 %v1452_v53, %v1335_v52 }
  0xba   :  { %750 = vmatmul.f32.gmra.mxu2 %v516_v55 }
  0xbb   :  { %863 = vmatmul.f32.gmra.mxu3 %v516_v55  ;;  %v1337_v55 = vld [vmem:[%s1982_s0 + $0xf8] sm:$0xf0] }
  0xbc   :  { %v1340_v57 = vor.u32 %v1451_v54, %v1337_v55 }
  0xbe   :  { %v429_v62 = vpop.f32.mrf.mxu0 }
  0xbf   :  { %v518_v63 = vpop.f32.mrf.mxu1 }
  0xc0   :  { %v519_v0 = vadd.f32 %v518_v63, %v429_v62 }
  0xc1   :  { %468 = vmatmul.bf16.gmra.mxu0 %v1296_v60 }
  0xc2   :  { %557 = vmatmul.bf16.gmra.mxu1 %v1300_v61  ;;  %753 = vmatmul.f32.gmra.mxu2 %v519_v0 }
  0xc3   :  { %866 = vmatmul.f32.gmra.mxu3 %v519_v0 }
  0xc6   :  { %v431_v1 = vpop.f32.mrf.mxu0 }
  0xc7   :  { %v520_v2 = vpop.f32.mrf.mxu1 }
  0xc8   :  { %v521_v3 = vadd.f32 %v520_v2, %v431_v1 }
  0xca   :  { %756 = vmatmul.f32.gmra.mxu2 %v521_v3 }
  0xcb   :  { %869 = vmatmul.f32.gmra.mxu3 %v521_v3  ;;  %v719_v3 = vld [vmem:[%s1984_s3] sm:$0x3] }
  0xcc   :  { %v1817_v4 = vperm.slane %v719_v3, 0  ;;  %v1819_v5 = vperm.slane %v719_v3, 1 }
  0xce   :  { %v434_v10 = vpop.f32.mrf.mxu0 }
  0xcf   :  { %v523_v11 = vpop.f32.mrf.mxu1 }
  0xd0   :  { %v524_v12 = vadd.f32 %v523_v11, %v434_v10 }
  0xd1   :  { %473 = vmatmul.bf16.gmra.mxu0 %v1304_v8 }
  0xd2   :  { %562 = vmatmul.bf16.gmra.mxu1 %v1308_v9  ;;  %759 = vmatmul.f32.gmra.mxu2 %v524_v12 }
  0xd3   :  { %872 = vmatmul.f32.gmra.mxu3 %v524_v12 }
  0xd6   :  { %v436_v13 = vpop.f32.mrf.mxu0 }
  0xd7   :  { %v525_v14 = vpop.f32.mrf.mxu1 }
  0xd8   :  { %v526_v15 = vadd.f32 %v525_v14, %v436_v13 }
  0xda   :  { %762 = vmatmul.f32.gmra.mxu2 %v526_v15 }
  0xdb   :  { %875 = vmatmul.f32.gmra.mxu3 %v526_v15 }
  0xde   :  { %v439_v22 = vpop.f32.mrf.mxu0 }
  0xdf   :  { %v528_v23 = vpop.f32.mrf.mxu1 }
  0xe0   :  { %v529_v24 = vadd.f32 %v528_v23, %v439_v22 }
  0xe1   :  { %478 = vmatmul.bf16.gmra.mxu0 %v1312_v20 }
  0xe2   :  { %567 = vmatmul.bf16.gmra.mxu1 %v1316_v21  ;;  %765 = vmatmul.f32.gmra.mxu2 %v529_v24 }
  0xe3   :  { %878 = vmatmul.f32.gmra.mxu3 %v529_v24 }
  0xe6   :  { %v441_v25 = vpop.f32.mrf.mxu0 }
  0xe7   :  { %v530_v26 = vpop.f32.mrf.mxu1 }
  0xe8   :  { %v531_v27 = vadd.f32 %v530_v26, %v441_v25 }
  0xea   :  { %768 = vmatmul.f32.gmra.mxu2 %v531_v27 }
  0xeb   :  { %881 = vmatmul.f32.gmra.mxu3 %v531_v27 }
  0xee   :  { %v444_v34 = vpop.f32.mrf.mxu0 }
  0xef   :  { %v533_v35 = vpop.f32.mrf.mxu1 }
  0xf0   :  { %v534_v36 = vadd.f32 %v533_v35, %v444_v34 }
  0xf1   :  { %483 = vmatmul.bf16.gmra.mxu0 %v1320_v32 }
  0xf2   :  { %572 = vmatmul.bf16.gmra.mxu1 %v1324_v33  ;;  %771 = vmatmul.f32.gmra.mxu2 %v534_v36 }
  0xf3   :  { %884 = vmatmul.f32.gmra.mxu3 %v534_v36 }
  0xf6   :  { %v446_v37 = vpop.f32.mrf.mxu0 }
  0xf7   :  { %v535_v38 = vpop.f32.mrf.mxu1 }
  0xf8   :  { %v536_v39 = vadd.f32 %v535_v38, %v446_v37 }
  0xfa   :  { %774 = vmatmul.f32.gmra.mxu2 %v536_v39 }
  0xfb   :  { %887 = vmatmul.f32.gmra.mxu3 %v536_v39 }
  0xfe   :  { %v449_v46 = vpop.f32.mrf.mxu0 }
  0xff   :  { %v538_v47 = vpop.f32.mrf.mxu1 }
 0x100   :  { %v539_v48 = vadd.f32 %v538_v47, %v449_v46 }
 0x101   :  { %488 = vmatmul.bf16.gmra.mxu0 %v1328_v44 }
 0x102   :  { %577 = vmatmul.bf16.gmra.mxu1 %v1332_v45  ;;  %777 = vmatmul.f32.gmra.mxu2 %v539_v48 }
 0x103   :  { %890 = vmatmul.f32.gmra.mxu3 %v539_v48 }
 0x106   :  { %v451_v49 = vpop.f32.mrf.mxu0 }
 0x107   :  { %v540_v50 = vpop.f32.mrf.mxu1 }
 0x108   :  { %v541_v51 = vadd.f32 %v540_v50, %v451_v49 }
 0x10a   :  { %780 = vmatmul.f32.gmra.mxu2 %v541_v51 }
 0x10b   :  { %893 = vmatmul.f32.gmra.mxu3 %v541_v51 }
 0x10e   :  { %v454_v58 = vpop.f32.mrf.mxu0 }
 0x10f   :  { %v543_v59 = vpop.f32.mrf.mxu1 }
 0x110   :  { %v544_v60 = vadd.f32 %v543_v59, %v454_v58 }
 0x111   :  { %493 = vmatmul.bf16.gmra.mxu0 %v1336_v56 }
 0x112   :  { %582 = vmatmul.bf16.gmra.mxu1 %v1340_v57  ;;  %783 = vmatmul.f32.gmra.mxu2 %v544_v60 }
 0x113   :  { %896 = vmatmul.f32.gmra.mxu3 %v544_v60 }
 0x116   :  { %v456_v61 = vpop.f32.mrf.mxu0 }
 0x117   :  { %v545_v62 = vpop.f32.mrf.mxu1 }
 0x118   :  { %v546_v63 = vadd.f32 %v545_v62, %v456_v61 }
 0x11a   :  { %786 = vmatmul.f32.gmra.mxu2 %v546_v63 }
 0x11b   :  { %899 = vmatmul.f32.gmra.mxu3 %v546_v63 }
 0x11e   :  { %v459_v0 = vpop.f32.mrf.mxu0 }
 0x11f   :  { %v548_v1 = vpop.f32.mrf.mxu1 }
 0x120   :  { %v549_v2 = vadd.f32 %v548_v1, %v459_v0 }
 0x122   :  { %789 = vmatmul.f32.gmra.mxu2 %v549_v2 }
 0x123   :  { %902 = vmatmul.f32.gmra.mxu3 %v549_v2 }
 0x125   :  { %v742_v6 = vpop.f32.mrf.mxu2 }
 0x126   :  { %v855_v7 = vpop.f32.mrf.mxu3  ;;  %v743_v8 = vadd.f32 %v742_v6, %v1817_v4  ;;  %v461_v10 = vpop.f32.mrf.mxu0 }
 0x127   :  { %v856_v9 = vadd.f32 %v855_v7, %v1819_v5  ;;  %v550_v11 = vpop.f32.mrf.mxu1 }
 0x128   :  { %v551_v12 = vadd.f32 %v550_v11, %v461_v10  ;;  %vm951_vm0 = vcmp.gt.f32.partialorder %v743_v8, 0.0  ;;  %v1015_v13 = vmul.f32 0.01, %v743_v8 }
 0x129   :  { %vm952_vm1 = vcmp.gt.f32.partialorder %v856_v9, 0.0  ;;  %v1016_v14 = vmul.f32 0.01, %v856_v9 }
 0x12a   :  { %v1079_v15 = vsel %vm951_vm0, %v743_v8, %v1015_v13  ;;  %792 = vmatmul.f32.gmra.mxu2 %v551_v12 }
 0x12b   :  { %v1080_v16 = vsel %vm952_vm1, %v856_v9, %v1016_v14  ;;  %905 = vmatmul.f32.gmra.mxu3 %v551_v12 }
 0x12c   :  { %v1143_v17 = vpack.c.bf16 %v1080_v16, %v1079_v15 }
 0x12d   :  { %v745_v18 = vpop.f32.mrf.mxu2 }
 0x12e   :  { %1175 = vst [vmem:[%s1985_s4] sm:$0xff] %v1143_v17  ;;  %v858_v19 = vpop.f32.mrf.mxu3  ;;  %v746_v20 = vadd.f32 %v745_v18, %v1817_v4  ;;  %v464_v22 = vpop.f32.mrf.mxu0 }
 0x12f   :  { %v859_v21 = vadd.f32 %v858_v19, %v1819_v5  ;;  %v553_v23 = vpop.f32.mrf.mxu1 }
 0x130   :  { %v554_v24 = vadd.f32 %v553_v23, %v464_v22  ;;  %vm953_vm2 = vcmp.gt.f32.partialorder %v746_v20, 0.0  ;;  %v1017_v25 = vmul.f32 0.01, %v746_v20 }
 0x131   :  { %vm954_vm3 = vcmp.gt.f32.partialorder %v859_v21, 0.0  ;;  %v1018_v26 = vmul.f32 0.01, %v859_v21 }
 0x132   :  { %v1081_v27 = vsel %vm953_vm2, %v746_v20, %v1017_v25  ;;  %795 = vmatmul.f32.gmra.mxu2 %v554_v24 }
 0x133   :  { %v1082_v28 = vsel %vm954_vm3, %v859_v21, %v1018_v26  ;;  %908 = vmatmul.f32.gmra.mxu3 %v554_v24 }
 0x134   :  { %v1144_v29 = vpack.c.bf16 %v1082_v28, %v1081_v27 }
 0x135   :  { %v748_v30 = vpop.f32.mrf.mxu2 }
 0x136   :  { %1176 = vst [vmem:[%s1985_s4 + $0x8] sm:$0xff] %v1144_v29  ;;  %v861_v31 = vpop.f32.mrf.mxu3  ;;  %v749_v32 = vadd.f32 %v748_v30, %v1817_v4  ;;  %v466_v34 = vpop.f32.mrf.mxu0 }
 0x137   :  { %v862_v33 = vadd.f32 %v861_v31, %v1819_v5  ;;  %v555_v35 = vpop.f32.mrf.mxu1 }
 0x138   :  { %v556_v36 = vadd.f32 %v555_v35, %v466_v34  ;;  %vm955_vm4 = vcmp.gt.f32.partialorder %v749_v32, 0.0  ;;  %v1019_v37 = vmul.f32 0.01, %v749_v32 }
 0x139   :  { %vm956_vm5 = vcmp.gt.f32.partialorder %v862_v33, 0.0  ;;  %v1020_v38 = vmul.f32 0.01, %v862_v33 }
 0x13a   :  { %v1083_v39 = vsel %vm955_vm4, %v749_v32, %v1019_v37  ;;  %798 = vmatmul.f32.gmra.mxu2 %v556_v36 }
 0x13b   :  { %v1084_v40 = vsel %vm956_vm5, %v862_v33, %v1020_v38  ;;  %911 = vmatmul.f32.gmra.mxu3 %v556_v36 }
 0x13c   :  { %v1145_v41 = vpack.c.bf16 %v1084_v40, %v1083_v39 }
 0x13d   :  { %v751_v42 = vpop.f32.mrf.mxu2 }
 0x13e   :  { %1177 = vst [vmem:[%s1985_s4 + $0x10] sm:$0xff] %v1145_v41  ;;  %v864_v43 = vpop.f32.mrf.mxu3  ;;  %v752_v44 = vadd.f32 %v751_v42, %v1817_v4  ;;  %v469_v46 = vpop.f32.mrf.mxu0 }
 0x13f   :  { %v865_v45 = vadd.f32 %v864_v43, %v1819_v5  ;;  %v558_v47 = vpop.f32.mrf.mxu1 }
 0x140   :  { %v559_v48 = vadd.f32 %v558_v47, %v469_v46  ;;  %vm957_vm6 = vcmp.gt.f32.partialorder %v752_v44, 0.0  ;;  %v1021_v49 = vmul.f32 0.01, %v752_v44 }
 0x141   :  { %vm958_vm7 = vcmp.gt.f32.partialorder %v865_v45, 0.0  ;;  %v1022_v50 = vmul.f32 0.01, %v865_v45 }
 0x142   :  { %v1085_v51 = vsel %vm957_vm6, %v752_v44, %v1021_v49  ;;  %801 = vmatmul.f32.gmra.mxu2 %v559_v48 }
 0x143   :  { %v1086_v52 = vsel %vm958_vm7, %v865_v45, %v1022_v50  ;;  %914 = vmatmul.f32.gmra.mxu3 %v559_v48 }
 0x144   :  { %v1146_v53 = vpack.c.bf16 %v1086_v52, %v1085_v51 }
 0x145   :  { %v754_v54 = vpop.f32.mrf.mxu2 }
 0x146   :  { %1178 = vst [vmem:[%s1985_s4 + $0x18] sm:$0xff] %v1146_v53  ;;  %v867_v55 = vpop.f32.mrf.mxu3  ;;  %v755_v56 = vadd.f32 %v754_v54, %v1817_v4  ;;  %v471_v58 = vpop.f32.mrf.mxu0 }
 0x147   :  { %v868_v57 = vadd.f32 %v867_v55, %v1819_v5  ;;  %v560_v59 = vpop.f32.mrf.mxu1 }
 0x148   :  { %v561_v60 = vadd.f32 %v560_v59, %v471_v58  ;;  %vm959_vm8 = vcmp.gt.f32.partialorder %v755_v56, 0.0  ;;  %v1023_v61 = vmul.f32 0.01, %v755_v56 }
 0x149   :  { %vm960_vm9 = vcmp.gt.f32.partialorder %v868_v57, 0.0  ;;  %v1024_v62 = vmul.f32 0.01, %v868_v57 }
 0x14a   :  { %v1087_v63 = vsel %vm959_vm8, %v755_v56, %v1023_v61  ;;  %804 = vmatmul.f32.gmra.mxu2 %v561_v60 }
 0x14b   :  { %v1088_v0 = vsel %vm960_vm9, %v868_v57, %v1024_v62  ;;  %917 = vmatmul.f32.gmra.mxu3 %v561_v60 }
 0x14c   :  { %v1147_v1 = vpack.c.bf16 %v1088_v0, %v1087_v63 }
 0x14d   :  { %v757_v2 = vpop.f32.mrf.mxu2 }
 0x14e   :  { %1179 = vst [vmem:[%s1985_s4 + $0x20] sm:$0xff] %v1147_v1  ;;  %v870_v3 = vpop.f32.mrf.mxu3  ;;  %v758_v6 = vadd.f32 %v757_v2, %v1817_v4  ;;  %v474_v8 = vpop.f32.mrf.mxu0 }
 0x14f   :  { %v871_v7 = vadd.f32 %v870_v3, %v1819_v5  ;;  %v563_v9 = vpop.f32.mrf.mxu1 }
 0x150   :  { %v564_v10 = vadd.f32 %v563_v9, %v474_v8  ;;  %vm961_vm10 = vcmp.gt.f32.partialorder %v758_v6, 0.0  ;;  %v1025_v11 = vmul.f32 0.01, %v758_v6 }
 0x151   :  { %vm962_vm11 = vcmp.gt.f32.partialorder %v871_v7, 0.0  ;;  %v1026_v12 = vmul.f32 0.01, %v871_v7 }
 0x152   :  { %v1089_v13 = vsel %vm961_vm10, %v758_v6, %v1025_v11  ;;  %807 = vmatmul.f32.gmra.mxu2 %v564_v10 }
 0x153   :  { %v1090_v14 = vsel %vm962_vm11, %v871_v7, %v1026_v12  ;;  %920 = vmatmul.f32.gmra.mxu3 %v564_v10 }
 0x154   :  { %v1148_v15 = vpack.c.bf16 %v1090_v14, %v1089_v13 }
 0x155   :  { %v760_v16 = vpop.f32.mrf.mxu2 }
 0x156   :  { %1180 = vst [vmem:[%s1985_s4 + $0x28] sm:$0xff] %v1148_v15  ;;  %v873_v17 = vpop.f32.mrf.mxu3  ;;  %v761_v18 = vadd.f32 %v760_v16, %v1817_v4  ;;  %v476_v20 = vpop.f32.mrf.mxu0 }
 0x157   :  { %v874_v19 = vadd.f32 %v873_v17, %v1819_v5  ;;  %v565_v21 = vpop.f32.mrf.mxu1 }
 0x158   :  { %v566_v22 = vadd.f32 %v565_v21, %v476_v20  ;;  %vm963_vm12 = vcmp.gt.f32.partialorder %v761_v18, 0.0  ;;  %v1027_v23 = vmul.f32 0.01, %v761_v18 }
 0x159   :  { %vm964_vm13 = vcmp.gt.f32.partialorder %v874_v19, 0.0  ;;  %v1028_v24 = vmul.f32 0.01, %v874_v19 }
 0x15a   :  { %v1091_v25 = vsel %vm963_vm12, %v761_v18, %v1027_v23  ;;  %810 = vmatmul.f32.gmra.mxu2 %v566_v22 }
 0x15b   :  { %v1092_v26 = vsel %vm964_vm13, %v874_v19, %v1028_v24  ;;  %923 = vmatmul.f32.gmra.mxu3 %v566_v22 }
 0x15c   :  { %v1149_v27 = vpack.c.bf16 %v1092_v26, %v1091_v25 }
 0x15d   :  { %v763_v28 = vpop.f32.mrf.mxu2 }
 0x15e   :  { %1181 = vst [vmem:[%s1985_s4 + $0x30] sm:$0xff] %v1149_v27  ;;  %v876_v29 = vpop.f32.mrf.mxu3  ;;  %v764_v30 = vadd.f32 %v763_v28, %v1817_v4  ;;  %v479_v32 = vpop.f32.mrf.mxu0 }
 0x15f   :  { %v877_v31 = vadd.f32 %v876_v29, %v1819_v5  ;;  %v568_v33 = vpop.f32.mrf.mxu1 }
 0x160   :  { %v569_v34 = vadd.f32 %v568_v33, %v479_v32  ;;  %vm965_vm14 = vcmp.gt.f32.partialorder %v764_v30, 0.0  ;;  %v1029_v35 = vmul.f32 0.01, %v764_v30 }
 0x161   :  { %vm966_vm15 = vcmp.gt.f32.partialorder %v877_v31, 0.0  ;;  %v1030_v36 = vmul.f32 0.01, %v877_v31 }
 0x162   :  { %v1093_v37 = vsel %vm965_vm14, %v764_v30, %v1029_v35  ;;  %813 = vmatmul.f32.gmra.mxu2 %v569_v34 }
 0x163   :  { %v1094_v38 = vsel %vm966_vm15, %v877_v31, %v1030_v36  ;;  %926 = vmatmul.f32.gmra.mxu3 %v569_v34 }
 0x164   :  { %v1150_v39 = vpack.c.bf16 %v1094_v38, %v1093_v37 }
 0x165   :  { %v766_v40 = vpop.f32.mrf.mxu2 }
 0x166   :  { %1182 = vst [vmem:[%s1985_s4 + $0x38] sm:$0xff] %v1150_v39  ;;  %v879_v41 = vpop.f32.mrf.mxu3  ;;  %v767_v42 = vadd.f32 %v766_v40, %v1817_v4  ;;  %v481_v44 = vpop.f32.mrf.mxu0 }
 0x167   :  { %v880_v43 = vadd.f32 %v879_v41, %v1819_v5  ;;  %v570_v45 = vpop.f32.mrf.mxu1 }
 0x168   :  { %v571_v46 = vadd.f32 %v570_v45, %v481_v44  ;;  %vm967_vm0 = vcmp.gt.f32.partialorder %v767_v42, 0.0  ;;  %v1031_v47 = vmul.f32 0.01, %v767_v42 }
 0x169   :  { %vm968_vm1 = vcmp.gt.f32.partialorder %v880_v43, 0.0  ;;  %v1032_v48 = vmul.f32 0.01, %v880_v43 }
 0x16a   :  { %v1095_v49 = vsel %vm967_vm0, %v767_v42, %v1031_v47  ;;  %816 = vmatmul.f32.gmra.mxu2 %v571_v46 }
 0x16b   :  { %v1096_v50 = vsel %vm968_vm1, %v880_v43, %v1032_v48  ;;  %929 = vmatmul.f32.gmra.mxu3 %v571_v46 }
 0x16c   :  { %v1151_v51 = vpack.c.bf16 %v1096_v50, %v1095_v49 }
 0x16d   :  { %v769_v52 = vpop.f32.mrf.mxu2 }
 0x16e   :  { %1183 = vst [vmem:[%s1985_s4 + $0x40] sm:$0xff] %v1151_v51  ;;  %v882_v53 = vpop.f32.mrf.mxu3  ;;  %v770_v54 = vadd.f32 %v769_v52, %v1817_v4  ;;  %v484_v56 = vpop.f32.mrf.mxu0 }
 0x16f   :  { %v883_v55 = vadd.f32 %v882_v53, %v1819_v5  ;;  %v573_v57 = vpop.f32.mrf.mxu1 }
 0x170   :  { %v574_v58 = vadd.f32 %v573_v57, %v484_v56  ;;  %vm969_vm2 = vcmp.gt.f32.partialorder %v770_v54, 0.0  ;;  %v1033_v59 = vmul.f32 0.01, %v770_v54 }
 0x171   :  { %vm970_vm3 = vcmp.gt.f32.partialorder %v883_v55, 0.0  ;;  %v1034_v60 = vmul.f32 0.01, %v883_v55 }
 0x172   :  { %v1097_v61 = vsel %vm969_vm2, %v770_v54, %v1033_v59  ;;  %819 = vmatmul.f32.gmra.mxu2 %v574_v58 }
 0x173   :  { %v1098_v62 = vsel %vm970_vm3, %v883_v55, %v1034_v60  ;;  %932 = vmatmul.f32.gmra.mxu3 %v574_v58 }
 0x174   :  { %v1152_v63 = vpack.c.bf16 %v1098_v62, %v1097_v61 }
 0x175   :  { %v772_v0 = vpop.f32.mrf.mxu2 }
 0x176   :  { %1184 = vst [vmem:[%s1985_s4 + $0x48] sm:$0xff] %v1152_v63  ;;  %v885_v1 = vpop.f32.mrf.mxu3  ;;  %v773_v2 = vadd.f32 %v772_v0, %v1817_v4  ;;  %v486_v6 = vpop.f32.mrf.mxu0 }
 0x177   :  { %v886_v3 = vadd.f32 %v885_v1, %v1819_v5  ;;  %v575_v7 = vpop.f32.mrf.mxu1 }
 0x178   :  { %v576_v8 = vadd.f32 %v575_v7, %v486_v6  ;;  %vm971_vm4 = vcmp.gt.f32.partialorder %v773_v2, 0.0  ;;  %v1035_v9 = vmul.f32 0.01, %v773_v2 }
 0x179   :  { %vm972_vm5 = vcmp.gt.f32.partialorder %v886_v3, 0.0  ;;  %v1036_v10 = vmul.f32 0.01, %v886_v3 }
 0x17a   :  { %v1099_v11 = vsel %vm971_vm4, %v773_v2, %v1035_v9  ;;  %822 = vmatmul.f32.gmra.mxu2 %v576_v8 }
 0x17b   :  { %v1100_v12 = vsel %vm972_vm5, %v886_v3, %v1036_v10  ;;  %935 = vmatmul.f32.gmra.mxu3 %v576_v8 }
 0x17c   :  { %v1153_v13 = vpack.c.bf16 %v1100_v12, %v1099_v11 }
 0x17d   :  { %v775_v14 = vpop.f32.mrf.mxu2 }
 0x17e   :  { %1185 = vst [vmem:[%s1985_s4 + $0x50] sm:$0xff] %v1153_v13  ;;  %v888_v15 = vpop.f32.mrf.mxu3  ;;  %v776_v16 = vadd.f32 %v775_v14, %v1817_v4  ;;  %v489_v18 = vpop.f32.mrf.mxu0 }
 0x17f   :  { %v889_v17 = vadd.f32 %v888_v15, %v1819_v5  ;;  %v578_v19 = vpop.f32.mrf.mxu1 }
 0x180   :  { %v579_v20 = vadd.f32 %v578_v19, %v489_v18  ;;  %vm973_vm6 = vcmp.gt.f32.partialorder %v776_v16, 0.0  ;;  %v1037_v21 = vmul.f32 0.01, %v776_v16 }
 0x181   :  { %vm974_vm7 = vcmp.gt.f32.partialorder %v889_v17, 0.0  ;;  %v1038_v22 = vmul.f32 0.01, %v889_v17 }
 0x182   :  { %v1101_v23 = vsel %vm973_vm6, %v776_v16, %v1037_v21  ;;  %825 = vmatmul.f32.gmra.mxu2 %v579_v20 }
 0x183   :  { %v1102_v24 = vsel %vm974_vm7, %v889_v17, %v1038_v22  ;;  %938 = vmatmul.f32.gmra.mxu3 %v579_v20 }
 0x184   :  { %v1154_v25 = vpack.c.bf16 %v1102_v24, %v1101_v23 }
 0x185   :  { %v778_v26 = vpop.f32.mrf.mxu2 }
 0x186   :  { %1186 = vst [vmem:[%s1985_s4 + $0x58] sm:$0xff] %v1154_v25  ;;  %v891_v27 = vpop.f32.mrf.mxu3  ;;  %v779_v28 = vadd.f32 %v778_v26, %v1817_v4  ;;  %v491_v30 = vpop.f32.mrf.mxu0 }
 0x187   :  { %v892_v29 = vadd.f32 %v891_v27, %v1819_v5  ;;  %v580_v31 = vpop.f32.mrf.mxu1 }
 0x188   :  { %v581_v32 = vadd.f32 %v580_v31, %v491_v30  ;;  %vm975_vm8 = vcmp.gt.f32.partialorder %v779_v28, 0.0  ;;  %v1039_v33 = vmul.f32 0.01, %v779_v28 }
 0x189   :  { %vm976_vm9 = vcmp.gt.f32.partialorder %v892_v29, 0.0  ;;  %v1040_v34 = vmul.f32 0.01, %v892_v29 }
 0x18a   :  { %v1103_v35 = vsel %vm975_vm8, %v779_v28, %v1039_v33  ;;  %828 = vmatmul.f32.gmra.mxu2 %v581_v32 }
 0x18b   :  { %v1104_v36 = vsel %vm976_vm9, %v892_v29, %v1040_v34  ;;  %941 = vmatmul.f32.gmra.mxu3 %v581_v32 }
 0x18c   :  { %v1155_v37 = vpack.c.bf16 %v1104_v36, %v1103_v35 }
 0x18d   :  { %v781_v38 = vpop.f32.mrf.mxu2 }
 0x18e   :  { %1187 = vst [vmem:[%s1985_s4 + $0x60] sm:$0xff] %v1155_v37  ;;  %v894_v39 = vpop.f32.mrf.mxu3  ;;  %v782_v40 = vadd.f32 %v781_v38, %v1817_v4  ;;  %v494_v42 = vpop.f32.mrf.mxu0 }
 0x18f   :  { %v895_v41 = vadd.f32 %v894_v39, %v1819_v5  ;;  %v583_v43 = vpop.f32.mrf.mxu1 }
 0x190   :  { %v584_v44 = vadd.f32 %v583_v43, %v494_v42  ;;  %vm977_vm10 = vcmp.gt.f32.partialorder %v782_v40, 0.0  ;;  %v1041_v45 = vmul.f32 0.01, %v782_v40 }
 0x191   :  { %vm978_vm11 = vcmp.gt.f32.partialorder %v895_v41, 0.0  ;;  %v1042_v46 = vmul.f32 0.01, %v895_v41 }
 0x192   :  { %v1105_v47 = vsel %vm977_vm10, %v782_v40, %v1041_v45  ;;  %831 = vmatmul.f32.gmra.mxu2 %v584_v44 }
 0x193   :  { %v1106_v48 = vsel %vm978_vm11, %v895_v41, %v1042_v46  ;;  %944 = vmatmul.f32.gmra.mxu3 %v584_v44 }
 0x194   :  { %v1156_v49 = vpack.c.bf16 %v1106_v48, %v1105_v47 }
 0x195   :  { %v784_v50 = vpop.f32.mrf.mxu2 }
 0x196   :  { %1188 = vst [vmem:[%s1985_s4 + $0x68] sm:$0xff] %v1156_v49  ;;  %v897_v51 = vpop.f32.mrf.mxu3  ;;  %v785_v52 = vadd.f32 %v784_v50, %v1817_v4  ;;  %v496_v54 = vpop.f32.mrf.mxu0 }
 0x197   :  { %v898_v53 = vadd.f32 %v897_v51, %v1819_v5  ;;  %v585_v55 = vpop.f32.mrf.mxu1 }
 0x198   :  { %v586_v56 = vadd.f32 %v585_v55, %v496_v54  ;;  %vm979_vm12 = vcmp.gt.f32.partialorder %v785_v52, 0.0  ;;  %v1043_v57 = vmul.f32 0.01, %v785_v52 }
 0x199   :  { %vm980_vm13 = vcmp.gt.f32.partialorder %v898_v53, 0.0  ;;  %v1044_v58 = vmul.f32 0.01, %v898_v53 }
 0x19a   :  { %v1107_v59 = vsel %vm979_vm12, %v785_v52, %v1043_v57  ;;  %834 = vmatmul.f32.gmra.mxu2 %v586_v56 }
 0x19b   :  { %v1108_v60 = vsel %vm980_vm13, %v898_v53, %v1044_v58  ;;  %947 = vmatmul.f32.gmra.mxu3 %v586_v56 }
 0x19c   :  { %v1157_v61 = vpack.c.bf16 %v1108_v60, %v1107_v59 }
 0x19d   :  { %v787_v62 = vpop.f32.mrf.mxu2 }
 0x19e   :  { %1189 = vst [vmem:[%s1985_s4 + $0x70] sm:$0xff] %v1157_v61  ;;  %v900_v63 = vpop.f32.mrf.mxu3  ;;  %v788_v0 = vadd.f32 %v787_v62, %v1817_v4 }
 0x19f   :  { %v901_v1 = vadd.f32 %v900_v63, %v1819_v5 }
 0x1a0   :  { %vm981_vm14 = vcmp.gt.f32.partialorder %v788_v0, 0.0  ;;  %v1045_v2 = vmul.f32 0.01, %v788_v0 }
 0x1a1   :  { %vm982_vm15 = vcmp.gt.f32.partialorder %v901_v1, 0.0  ;;  %v1046_v3 = vmul.f32 0.01, %v901_v1 }
 0x1a2   :  { %v1109_v6 = vsel %vm981_vm14, %v788_v0, %v1045_v2 }
 0x1a3   :  { %v1110_v7 = vsel %vm982_vm15, %v901_v1, %v1046_v3 }
 0x1a4   :  { %v1158_v8 = vpack.c.bf16 %v1110_v7, %v1109_v6 }
 0x1a5   :  { %v790_v9 = vpop.f32.mrf.mxu2 }
 0x1a6   :  { %1190 = vst [vmem:[%s1985_s4 + $0x78] sm:$0xff] %v1158_v8  ;;  %v903_v10 = vpop.f32.mrf.mxu3  ;;  %v791_v11 = vadd.f32 %v790_v9, %v1817_v4 }
 0x1a7   :  { %v904_v12 = vadd.f32 %v903_v10, %v1819_v5 }
 0x1a8   :  { %vm983_vm0 = vcmp.gt.f32.partialorder %v791_v11, 0.0  ;;  %v1047_v13 = vmul.f32 0.01, %v791_v11 }
 0x1a9   :  { %vm984_vm1 = vcmp.gt.f32.partialorder %v904_v12, 0.0  ;;  %v1048_v14 = vmul.f32 0.01, %v904_v12 }
 0x1aa   :  { %v1111_v15 = vsel %vm983_vm0, %v791_v11, %v1047_v13 }
 0x1ab   :  { %v1112_v16 = vsel %vm984_vm1, %v904_v12, %v1048_v14 }
 0x1ac   :  { %v1159_v17 = vpack.c.bf16 %v1112_v16, %v1111_v15 }
 0x1ad   :  { %v793_v18 = vpop.f32.mrf.mxu2 }
 0x1ae   :  { %1191 = vst [vmem:[%s1985_s4 + $0x80] sm:$0xff] %v1159_v17  ;;  %v906_v19 = vpop.f32.mrf.mxu3  ;;  %v794_v20 = vadd.f32 %v793_v18, %v1817_v4 }
 0x1af   :  { %v907_v21 = vadd.f32 %v906_v19, %v1819_v5 }
 0x1b0   :  { %vm985_vm2 = vcmp.gt.f32.partialorder %v794_v20, 0.0  ;;  %v1049_v22 = vmul.f32 0.01, %v794_v20 }
 0x1b1   :  { %vm986_vm3 = vcmp.gt.f32.partialorder %v907_v21, 0.0  ;;  %v1050_v23 = vmul.f32 0.01, %v907_v21 }
 0x1b2   :  { %v1113_v24 = vsel %vm985_vm2, %v794_v20, %v1049_v22 }
 0x1b3   :  { %v1114_v25 = vsel %vm986_vm3, %v907_v21, %v1050_v23 }
 0x1b4   :  { %v1160_v26 = vpack.c.bf16 %v1114_v25, %v1113_v24 }
 0x1b5   :  { %v796_v27 = vpop.f32.mrf.mxu2 }
 0x1b6   :  { %1192 = vst [vmem:[%s1985_s4 + $0x88] sm:$0xff] %v1160_v26  ;;  %v909_v28 = vpop.f32.mrf.mxu3  ;;  %v797_v29 = vadd.f32 %v796_v27, %v1817_v4 }
 0x1b7   :  { %v910_v30 = vadd.f32 %v909_v28, %v1819_v5 }
 0x1b8   :  { %vm987_vm4 = vcmp.gt.f32.partialorder %v797_v29, 0.0  ;;  %v1051_v31 = vmul.f32 0.01, %v797_v29 }
 0x1b9   :  { %vm988_vm5 = vcmp.gt.f32.partialorder %v910_v30, 0.0  ;;  %v1052_v32 = vmul.f32 0.01, %v910_v30 }
 0x1ba   :  { %v1115_v33 = vsel %vm987_vm4, %v797_v29, %v1051_v31 }
 0x1bb   :  { %v1116_v34 = vsel %vm988_vm5, %v910_v30, %v1052_v32 }
 0x1bc   :  { %v1161_v35 = vpack.c.bf16 %v1116_v34, %v1115_v33 }
 0x1bd   :  { %v799_v36 = vpop.f32.mrf.mxu2 }
 0x1be   :  { %1193 = vst [vmem:[%s1985_s4 + $0x90] sm:$0xff] %v1161_v35  ;;  %v912_v37 = vpop.f32.mrf.mxu3  ;;  %v800_v38 = vadd.f32 %v799_v36, %v1817_v4 }
 0x1bf   :  { %v913_v39 = vadd.f32 %v912_v37, %v1819_v5 }
 0x1c0   :  { %vm989_vm6 = vcmp.gt.f32.partialorder %v800_v38, 0.0  ;;  %v1053_v40 = vmul.f32 0.01, %v800_v38 }
 0x1c1   :  { %vm990_vm7 = vcmp.gt.f32.partialorder %v913_v39, 0.0  ;;  %v1054_v41 = vmul.f32 0.01, %v913_v39 }
 0x1c2   :  { %v1117_v42 = vsel %vm989_vm6, %v800_v38, %v1053_v40 }
 0x1c3   :  { %v1118_v43 = vsel %vm990_vm7, %v913_v39, %v1054_v41 }
 0x1c4   :  { %v1162_v44 = vpack.c.bf16 %v1118_v43, %v1117_v42 }
 0x1c5   :  { %v802_v45 = vpop.f32.mrf.mxu2 }
 0x1c6   :  { %1194 = vst [vmem:[%s1985_s4 + $0x98] sm:$0xff] %v1162_v44  ;;  %v915_v46 = vpop.f32.mrf.mxu3  ;;  %v803_v47 = vadd.f32 %v802_v45, %v1817_v4 }
 0x1c7   :  { %v916_v48 = vadd.f32 %v915_v46, %v1819_v5 }
 0x1c8   :  { %vm991_vm8 = vcmp.gt.f32.partialorder %v803_v47, 0.0  ;;  %v1055_v49 = vmul.f32 0.01, %v803_v47 }
 0x1c9   :  { %vm992_vm9 = vcmp.gt.f32.partialorder %v916_v48, 0.0  ;;  %v1056_v50 = vmul.f32 0.01, %v916_v48 }
 0x1ca   :  { %v1119_v51 = vsel %vm991_vm8, %v803_v47, %v1055_v49 }
 0x1cb   :  { %v1120_v52 = vsel %vm992_vm9, %v916_v48, %v1056_v50 }
 0x1cc   :  { %v1163_v53 = vpack.c.bf16 %v1120_v52, %v1119_v51 }
 0x1cd   :  { %v805_v54 = vpop.f32.mrf.mxu2 }
 0x1ce   :  { %1195 = vst [vmem:[%s1985_s4 + $0xa0] sm:$0xff] %v1163_v53  ;;  %v918_v55 = vpop.f32.mrf.mxu3  ;;  %v806_v56 = vadd.f32 %v805_v54, %v1817_v4 }
 0x1cf   :  { %v919_v57 = vadd.f32 %v918_v55, %v1819_v5 }
 0x1d0   :  { %vm993_vm10 = vcmp.gt.f32.partialorder %v806_v56, 0.0  ;;  %v1057_v58 = vmul.f32 0.01, %v806_v56 }
 0x1d1   :  { %vm994_vm11 = vcmp.gt.f32.partialorder %v919_v57, 0.0  ;;  %v1058_v59 = vmul.f32 0.01, %v919_v57 }
 0x1d2   :  { %v1121_v60 = vsel %vm993_vm10, %v806_v56, %v1057_v58 }
 0x1d3   :  { %v1122_v61 = vsel %vm994_vm11, %v919_v57, %v1058_v59 }
 0x1d4   :  { %v1164_v62 = vpack.c.bf16 %v1122_v61, %v1121_v60 }
 0x1d5   :  { %v808_v63 = vpop.f32.mrf.mxu2 }
 0x1d6   :  { %1196 = vst [vmem:[%s1985_s4 + $0xa8] sm:$0xff] %v1164_v62  ;;  %v921_v0 = vpop.f32.mrf.mxu3  ;;  %v809_v1 = vadd.f32 %v808_v63, %v1817_v4 }
 0x1d7   :  { %v922_v2 = vadd.f32 %v921_v0, %v1819_v5 }
 0x1d8   :  { %vm995_vm12 = vcmp.gt.f32.partialorder %v809_v1, 0.0  ;;  %v1059_v3 = vmul.f32 0.01, %v809_v1 }
 0x1d9   :  { %vm996_vm13 = vcmp.gt.f32.partialorder %v922_v2, 0.0  ;;  %v1060_v6 = vmul.f32 0.01, %v922_v2 }
 0x1da   :  { %v1123_v7 = vsel %vm995_vm12, %v809_v1, %v1059_v3 }
 0x1db   :  { %v1124_v8 = vsel %vm996_vm13, %v922_v2, %v1060_v6 }
 0x1dc   :  { %v1165_v9 = vpack.c.bf16 %v1124_v8, %v1123_v7 }
 0x1dd   :  { %v811_v10 = vpop.f32.mrf.mxu2 }
 0x1de   :  { %1197 = vst [vmem:[%s1985_s4 + $0xb0] sm:$0xff] %v1165_v9  ;;  %v924_v11 = vpop.f32.mrf.mxu3  ;;  %v812_v12 = vadd.f32 %v811_v10, %v1817_v4 }
 0x1df   :  { %v925_v13 = vadd.f32 %v924_v11, %v1819_v5 }
 0x1e0   :  { %vm997_vm14 = vcmp.gt.f32.partialorder %v812_v12, 0.0  ;;  %v1061_v14 = vmul.f32 0.01, %v812_v12 }
 0x1e1   :  { %vm998_vm15 = vcmp.gt.f32.partialorder %v925_v13, 0.0  ;;  %v1062_v15 = vmul.f32 0.01, %v925_v13 }
 0x1e2   :  { %v1125_v16 = vsel %vm997_vm14, %v812_v12, %v1061_v14 }
 0x1e3   :  { %v1126_v17 = vsel %vm998_vm15, %v925_v13, %v1062_v15 }
 0x1e4   :  { %v1166_v18 = vpack.c.bf16 %v1126_v17, %v1125_v16 }
 0x1e5   :  { %v814_v19 = vpop.f32.mrf.mxu2 }
 0x1e6   :  { %1198 = vst [vmem:[%s1985_s4 + $0xb8] sm:$0xff] %v1166_v18  ;;  %v927_v20 = vpop.f32.mrf.mxu3  ;;  %v815_v21 = vadd.f32 %v814_v19, %v1817_v4 }
 0x1e7   :  { %v928_v22 = vadd.f32 %v927_v20, %v1819_v5 }
 0x1e8   :  { %vm999_vm0 = vcmp.gt.f32.partialorder %v815_v21, 0.0  ;;  %v1063_v23 = vmul.f32 0.01, %v815_v21 }
 0x1e9   :  { %vm1000_vm1 = vcmp.gt.f32.partialorder %v928_v22, 0.0  ;;  %v1064_v24 = vmul.f32 0.01, %v928_v22 }
 0x1ea   :  { %v1127_v25 = vsel %vm999_vm0, %v815_v21, %v1063_v23 }
 0x1eb   :  { %v1128_v26 = vsel %vm1000_vm1, %v928_v22, %v1064_v24 }
 0x1ec   :  { %v1167_v27 = vpack.c.bf16 %v1128_v26, %v1127_v25 }
 0x1ed   :  { %v817_v28 = vpop.f32.mrf.mxu2 }
 0x1ee   :  { %1199 = vst [vmem:[%s1985_s4 + $0xc0] sm:$0xff] %v1167_v27  ;;  %v930_v29 = vpop.f32.mrf.mxu3  ;;  %v818_v30 = vadd.f32 %v817_v28, %v1817_v4 }
 0x1ef   :  { %v931_v31 = vadd.f32 %v930_v29, %v1819_v5 }
 0x1f0   :  { %vm1001_vm2 = vcmp.gt.f32.partialorder %v818_v30, 0.0  ;;  %v1065_v32 = vmul.f32 0.01, %v818_v30 }
 0x1f1   :  { %vm1002_vm3 = vcmp.gt.f32.partialorder %v931_v31, 0.0  ;;  %v1066_v33 = vmul.f32 0.01, %v931_v31 }
 0x1f2   :  { %v1129_v34 = vsel %vm1001_vm2, %v818_v30, %v1065_v32 }
 0x1f3   :  { %v1130_v35 = vsel %vm1002_vm3, %v931_v31, %v1066_v33 }
 0x1f4   :  { %v1168_v36 = vpack.c.bf16 %v1130_v35, %v1129_v34 }
 0x1f5   :  { %v820_v37 = vpop.f32.mrf.mxu2 }
 0x1f6   :  { %1200 = vst [vmem:[%s1985_s4 + $0xc8] sm:$0xff] %v1168_v36  ;;  %v933_v38 = vpop.f32.mrf.mxu3  ;;  %v821_v39 = vadd.f32 %v820_v37, %v1817_v4 }
 0x1f7   :  { %v934_v40 = vadd.f32 %v933_v38, %v1819_v5 }
 0x1f8   :  { %vm1003_vm4 = vcmp.gt.f32.partialorder %v821_v39, 0.0  ;;  %v1067_v41 = vmul.f32 0.01, %v821_v39 }
 0x1f9   :  { %vm1004_vm5 = vcmp.gt.f32.partialorder %v934_v40, 0.0  ;;  %v1068_v42 = vmul.f32 0.01, %v934_v40 }
 0x1fa   :  { %v1131_v43 = vsel %vm1003_vm4, %v821_v39, %v1067_v41 }
 0x1fb   :  { %v1132_v44 = vsel %vm1004_vm5, %v934_v40, %v1068_v42 }
 0x1fc   :  { %v1169_v45 = vpack.c.bf16 %v1132_v44, %v1131_v43 }
 0x1fd   :  { %v823_v46 = vpop.f32.mrf.mxu2 }
 0x1fe   :  { %1201 = vst [vmem:[%s1985_s4 + $0xd0] sm:$0xff] %v1169_v45  ;;  %v936_v47 = vpop.f32.mrf.mxu3  ;;  %v824_v48 = vadd.f32 %v823_v46, %v1817_v4 }
 0x1ff   :  { %v937_v49 = vadd.f32 %v936_v47, %v1819_v5 }
 0x200   :  { %vm1005_vm6 = vcmp.gt.f32.partialorder %v824_v48, 0.0  ;;  %v1069_v50 = vmul.f32 0.01, %v824_v48 }
 0x201   :  { %vm1006_vm7 = vcmp.gt.f32.partialorder %v937_v49, 0.0  ;;  %v1070_v51 = vmul.f32 0.01, %v937_v49 }
 0x202   :  { %v1133_v52 = vsel %vm1005_vm6, %v824_v48, %v1069_v50 }
 0x203   :  { %v1134_v53 = vsel %vm1006_vm7, %v937_v49, %v1070_v51 }
 0x204   :  { %v1170_v54 = vpack.c.bf16 %v1134_v53, %v1133_v52 }
 0x205   :  { %v826_v55 = vpop.f32.mrf.mxu2 }
 0x206   :  { %1202 = vst [vmem:[%s1985_s4 + $0xd8] sm:$0xff] %v1170_v54  ;;  %v939_v56 = vpop.f32.mrf.mxu3  ;;  %v827_v57 = vadd.f32 %v826_v55, %v1817_v4 }
 0x207   :  { %v940_v58 = vadd.f32 %v939_v56, %v1819_v5 }
 0x208   :  { %vm1007_vm8 = vcmp.gt.f32.partialorder %v827_v57, 0.0  ;;  %v1071_v59 = vmul.f32 0.01, %v827_v57 }
 0x209   :  { %vm1008_vm9 = vcmp.gt.f32.partialorder %v940_v58, 0.0  ;;  %v1072_v60 = vmul.f32 0.01, %v940_v58 }
 0x20a   :  { %v1135_v61 = vsel %vm1007_vm8, %v827_v57, %v1071_v59 }
 0x20b   :  { %v1136_v62 = vsel %vm1008_vm9, %v940_v58, %v1072_v60 }
 0x20c   :  { %v1171_v63 = vpack.c.bf16 %v1136_v62, %v1135_v61 }
 0x20d   :  { %v829_v0 = vpop.f32.mrf.mxu2 }
 0x20e   :  { %1203 = vst [vmem:[%s1985_s4 + $0xe0] sm:$0xff] %v1171_v63  ;;  %v942_v1 = vpop.f32.mrf.mxu3  ;;  %v830_v2 = vadd.f32 %v829_v0, %v1817_v4 }
 0x20f   :  { %v943_v3 = vadd.f32 %v942_v1, %v1819_v5 }
 0x210   :  { %vm1009_vm10 = vcmp.gt.f32.partialorder %v830_v2, 0.0  ;;  %v1073_v6 = vmul.f32 0.01, %v830_v2 }
 0x211   :  { %vm1010_vm11 = vcmp.gt.f32.partialorder %v943_v3, 0.0  ;;  %v1074_v7 = vmul.f32 0.01, %v943_v3 }
 0x212   :  { %v1137_v8 = vsel %vm1009_vm10, %v830_v2, %v1073_v6 }
 0x213   :  { %v1138_v9 = vsel %vm1010_vm11, %v943_v3, %v1074_v7 }
 0x214   :  { %v1172_v10 = vpack.c.bf16 %v1138_v9, %v1137_v8 }
 0x215   :  { %v832_v11 = vpop.f32.mrf.mxu2 }
 0x216   :  { %1204 = vst [vmem:[%s1985_s4 + $0xe8] sm:$0xff] %v1172_v10  ;;  %v945_v12 = vpop.f32.mrf.mxu3  ;;  %v833_v13 = vadd.f32 %v832_v11, %v1817_v4 }
 0x217   :  { %v946_v14 = vadd.f32 %v945_v12, %v1819_v5 }
 0x218   :  { %vm1011_vm12 = vcmp.gt.f32.partialorder %v833_v13, 0.0  ;;  %v1075_v15 = vmul.f32 0.01, %v833_v13 }
 0x219   :  { %vm1012_vm13 = vcmp.gt.f32.partialorder %v946_v14, 0.0  ;;  %v1076_v16 = vmul.f32 0.01, %v946_v14 }
 0x21a   :  { %v1139_v17 = vsel %vm1011_vm12, %v833_v13, %v1075_v15 }
 0x21b   :  { %v1140_v18 = vsel %vm1012_vm13, %v946_v14, %v1076_v16 }
 0x21c   :  { %v1173_v19 = vpack.c.bf16 %v1140_v18, %v1139_v17 }
 0x21d   :  { %v835_v20 = vpop.f32.mrf.mxu2 }
 0x21e   :  { %1205 = vst [vmem:[%s1985_s4 + $0xf0] sm:$0xff] %v1173_v19  ;;  %v948_v21 = vpop.f32.mrf.mxu3  ;;  %v836_v22 = vadd.f32 %v835_v20, %v1817_v4 }
 0x21f   :  { %v949_v23 = vadd.f32 %v948_v21, %v1819_v5 }
 0x220   :  { %vm1013_vm14 = vcmp.gt.f32.partialorder %v836_v22, 0.0  ;;  %v1077_v24 = vmul.f32 0.01, %v836_v22 }
 0x221   :  { %vm1014_vm15 = vcmp.gt.f32.partialorder %v949_v23, 0.0  ;;  %v1078_v25 = vmul.f32 0.01, %v949_v23 }
 0x222   :  { %v1141_v26 = vsel %vm1013_vm14, %v836_v22, %v1077_v24 }
 0x223   :  { %v1142_v27 = vsel %vm1014_vm15, %v949_v23, %v1078_v25 }
 0x224   :  { %v1174_v28 = vpack.c.bf16 %v1142_v27, %v1141_v26 }
 0x226   :  { %1206 = vst [vmem:[%s1985_s4 + $0xf8] sm:$0xff] %v1174_v28 }

// kernel: simple_gcn_forward.5
= control target key start
LH: loop header
LB: loop body
LE: loop exit
PB: predicated region body
PF: predicated region fallthrough
CT: control target
= control target key end

     0   :  { %s2214_s1 = inlined_call_operand.vmem [shape: bf16[256,256], index: 1, kind: input, shape index: {}]   ;;  %s2215_s0 = inlined_call_operand.vmem [shape: bf16[256,256], index: 0, kind: input, shape index: {}]   ;;  %s2216_s2 = inlined_call_operand.vmem [shape: f32[1,256], index: 2, kind: input, shape index: {}]   ;;  %s2217_s3 = inlined_call_operand.vmem [shape: f32[256,256], index: 3, kind: output, shape index: {}]  }
   0x1   :  { %v1413_v0 = vld [vmem:[%s2214_s1 + $0x70] sm:$0xf]  ;;  %v1498_v1 = vld [vmem:[%s2214_s1 + $0x74] sm:$0xf0]  ;;  %v1497_v5 = vld [vmem:[%s2214_s1 + $0x74] sm:$0xf] }
   0x2   :  { %v1477_v2 = vld [vmem:[%s2214_s1 + $0xf0] sm:$0xf]  ;;  %v1414_v3 = vor.u32 %v1498_v1, %v1413_v0  ;;  %v1514_v4 = vld [vmem:[%s2214_s1 + $0xf4] sm:$0xf0]  ;;  %v1415_v6 = vld [vmem:[%s2214_s1 + $0x78] sm:$0xf0] }
   0x3   :  { %v1478_v7 = vor.u32 %v1514_v4, %v1477_v2  ;;  %v1418_v8 = vor.u32 %v1497_v5, %v1415_v6  ;;  %v1513_v9 = vld [vmem:[%s2214_s1 + $0xf4] sm:$0xf]  ;;  %v1479_v10 = vld [vmem:[%s2214_s1 + $0xf8] sm:$0xf0]  ;;  %v1405_v11 = vld [vmem:[%s2214_s1 + $0x60] sm:$0xf] }
   0x4   :  { %536 = vmatpush.bf16.msra.mxu0 %v1414_v3  ;;  %v1482_v12 = vor.u32 %v1513_v9, %v1479_v10  ;;  %v1496_v13 = vld [vmem:[%s2214_s1 + $0x64] sm:$0xf0]  ;;  %v1469_v14 = vld [vmem:[%s2214_s1 + $0xe0] sm:$0xf]  ;;  %v1495_v18 = vld [vmem:[%s2214_s1 + $0x64] sm:$0xf] }
   0x5   :  { %v1512_v15 = vld [vmem:[%s2214_s1 + $0xe4] sm:$0xf0]  ;;  %625 = vmatpush.bf16.msra.mxu1 %v1478_v7  ;;  %714 = vmatpush.bf16.msra.mxu2 %v1418_v8  ;;  %v1406_v16 = vor.u32 %v1496_v13, %v1405_v11  ;;  %v1407_v19 = vld [vmem:[%s2214_s1 + $0x68] sm:$0xf0]  ;;  %v1511_v20 = vld [vmem:[%s2214_s1 + $0xe4] sm:$0xf] }
   0x6   :  { %v1470_v17 = vor.u32 %v1512_v15, %v1469_v14  ;;  %803 = vmatpush.bf16.msra.mxu3 %v1482_v12  ;;  %v1410_v21 = vor.u32 %v1495_v18, %v1407_v19  ;;  %v1471_v22 = vld [vmem:[%s2214_s1 + $0xe8] sm:$0xf0]  ;;  %v1397_v23 = vld [vmem:[%s2214_s1 + $0x50] sm:$0xf]  ;;  %v1494_v24 = vld [vmem:[%s2214_s1 + $0x54] sm:$0xf0] }
   0x7   :  { %v1474_v25 = vor.u32 %v1511_v20, %v1471_v22  ;;  %v1461_v26 = vld [vmem:[%s2214_s1 + $0xd0] sm:$0xf]  ;;  %v1510_v27 = vld [vmem:[%s2214_s1 + $0xd4] sm:$0xf0]  ;;  %v1493_v28 = vld [vmem:[%s2214_s1 + $0x54] sm:$0xf]  ;;  %v1398_v29 = vor.u32 %v1494_v24, %v1397_v23 }
   0x8   :  { %537 = vmatpush.bf16.msra.mxu0 %v1406_v16  ;;  %v1399_v30 = vld [vmem:[%s2214_s1 + $0x58] sm:$0xf0]  ;;  %v1509_v31 = vld [vmem:[%s2214_s1 + $0xd4] sm:$0xf]  ;;  %v1462_v33 = vor.u32 %v1510_v27, %v1461_v26  ;;  %v1389_v35 = vld [vmem:[%s2214_s1 + $0x40] sm:$0xf] }
   0x9   :  { %v1463_v32 = vld [vmem:[%s2214_s1 + $0xd8] sm:$0xf0]  ;;  %626 = vmatpush.bf16.msra.mxu1 %v1470_v17  ;;  %715 = vmatpush.bf16.msra.mxu2 %v1410_v21  ;;  %v1402_v34 = vor.u32 %v1493_v28, %v1399_v30  ;;  %v1492_v36 = vld [vmem:[%s2214_s1 + $0x44] sm:$0xf0]  ;;  %v1453_v37 = vld [vmem:[%s2214_s1 + $0xc0] sm:$0xf] }
   0xa   :  { %804 = vmatpush.bf16.msra.mxu3 %v1474_v25  ;;  %v1466_v38 = vor.u32 %v1509_v31, %v1463_v32  ;;  %v1508_v39 = vld [vmem:[%s2214_s1 + $0xc4] sm:$0xf0]  ;;  %v1491_v40 = vld [vmem:[%s2214_s1 + $0x44] sm:$0xf]  ;;  %v1391_v41 = vld [vmem:[%s2214_s1 + $0x48] sm:$0xf0]  ;;  %v1390_v44 = vor.u32 %v1492_v36, %v1389_v35 }
   0xb   :  { %v1507_v42 = vld [vmem:[%s2214_s1 + $0xc4] sm:$0xf]  ;;  %v1455_v43 = vld [vmem:[%s2214_s1 + $0xc8] sm:$0xf0]  ;;  %v1454_v45 = vor.u32 %v1508_v39, %v1453_v37  ;;  %v1394_v46 = vor.u32 %v1491_v40, %v1391_v41  ;;  %v1381_v47 = vld [vmem:[%s2214_s1 + $0x30] sm:$0xf] }
   0xc   :  { %538 = vmatpush.bf16.msra.mxu0 %v1398_v29  ;;  %v1490_v48 = vld [vmem:[%s2214_s1 + $0x34] sm:$0xf0]  ;;  %v1445_v49 = vld [vmem:[%s2214_s1 + $0xb0] sm:$0xf]  ;;  %v1458_v50 = vor.u32 %v1507_v42, %v1455_v43  ;;  %v1489_v52 = vld [vmem:[%s2214_s1 + $0x34] sm:$0xf] }
   0xd   :  { %627 = vmatpush.bf16.msra.mxu1 %v1462_v33  ;;  %716 = vmatpush.bf16.msra.mxu2 %v1402_v34  ;;  %v1506_v51 = vld [vmem:[%s2214_s1 + $0xb4] sm:$0xf0]  ;;  %v1383_v53 = vld [vmem:[%s2214_s1 + $0x38] sm:$0xf0]  ;;  %v1505_v54 = vld [vmem:[%s2214_s1 + $0xb4] sm:$0xf]  ;;  %v1382_v56 = vor.u32 %v1490_v48, %v1381_v47 }
   0xe   :  { %805 = vmatpush.bf16.msra.mxu3 %v1466_v38  ;;  %v1447_v55 = vld [vmem:[%s2214_s1 + $0xb8] sm:$0xf0]  ;;  %v1446_v57 = vor.u32 %v1506_v51, %v1445_v49  ;;  %v1386_v58 = vor.u32 %v1489_v52, %v1383_v53  ;;  %v1373_v59 = vld [vmem:[%s2214_s1 + $0x20] sm:$0xf]  ;;  %v1488_v60 = vld [vmem:[%s2214_s1 + $0x24] sm:$0xf0] }
   0xf   :  { %v1437_v61 = vld [vmem:[%s2214_s1 + $0xa0] sm:$0xf]  ;;  %v1450_v62 = vor.u32 %v1505_v54, %v1447_v55  ;;  %v1504_v63 = vld [vmem:[%s2214_s1 + $0xa4] sm:$0xf0]  ;;  %v1487_v0 = vld [vmem:[%s2214_s1 + $0x24] sm:$0xf]  ;;  %v1374_v4 = vor.u32 %v1488_v60, %v1373_v59 }
  0x10   :  { %539 = vmatpush.bf16.msra.mxu0 %v1390_v44  ;;  %v1375_v1 = vld [vmem:[%s2214_s1 + $0x28] sm:$0xf0]  ;;  %v1503_v2 = vld [vmem:[%s2214_s1 + $0xa4] sm:$0xf]  ;;  %v1438_v5 = vor.u32 %v1504_v63, %v1437_v61  ;;  %v1365_v7 = vld [vmem:[%s2214_s1 + $0x10] sm:$0xf] }
  0x11   :  { %628 = vmatpush.bf16.msra.mxu1 %v1454_v45  ;;  %717 = vmatpush.bf16.msra.mxu2 %v1394_v46  ;;  %v1439_v3 = vld [vmem:[%s2214_s1 + $0xa8] sm:$0xf0]  ;;  %v1378_v6 = vor.u32 %v1487_v0, %v1375_v1  ;;  %v1486_v8 = vld [vmem:[%s2214_s1 + $0x14] sm:$0xf0]  ;;  %v1429_v9 = vld [vmem:[%s2214_s1 + $0x90] sm:$0xf] }
  0x12   :  { %806 = vmatpush.bf16.msra.mxu3 %v1458_v50  ;;  %v1442_v10 = vor.u32 %v1503_v2, %v1439_v3  ;;  %v1502_v11 = vld [vmem:[%s2214_s1 + $0x94] sm:$0xf0]  ;;  %v1485_v12 = vld [vmem:[%s2214_s1 + $0x14] sm:$0xf]  ;;  %v1367_v13 = vld [vmem:[%s2214_s1 + $0x18] sm:$0xf0]  ;;  %v1366_v16 = vor.u32 %v1486_v8, %v1365_v7 }
  0x13   :  { %v1501_v14 = vld [vmem:[%s2214_s1 + $0x94] sm:$0xf]  ;;  %v1431_v15 = vld [vmem:[%s2214_s1 + $0x98] sm:$0xf0]  ;;  %v1430_v17 = vor.u32 %v1502_v11, %v1429_v9  ;;  %v1370_v18 = vor.u32 %v1485_v12, %v1367_v13  ;;  %v1357_v19 = vld [vmem:[%s2214_s1] sm:$0xf] }
  0x14   :  { %540 = vmatpush.bf16.msra.mxu0 %v1382_v56  ;;  %v1484_v20 = vld [vmem:[%s2214_s1 + $0x4] sm:$0xf0]  ;;  %v1421_v21 = vld [vmem:[%s2214_s1 + $0x80] sm:$0xf]  ;;  %v1434_v22 = vor.u32 %v1501_v14, %v1431_v15  ;;  %v1483_v24 = vld [vmem:[%s2214_s1 + $0x4] sm:$0xf] }
  0x15   :  { %629 = vmatpush.bf16.msra.mxu1 %v1446_v57  ;;  %718 = vmatpush.bf16.msra.mxu2 %v1386_v58  ;;  %v1500_v23 = vld [vmem:[%s2214_s1 + $0x84] sm:$0xf0]  ;;  %v1359_v25 = vld [vmem:[%s2214_s1 + $0x8] sm:$0xf0]  ;;  %v1499_v26 = vld [vmem:[%s2214_s1 + $0x84] sm:$0xf]  ;;  %v1358_v28 = vor.u32 %v1484_v20, %v1357_v19 }
  0x16   :  { %807 = vmatpush.bf16.msra.mxu3 %v1450_v62  ;;  %v1423_v27 = vld [vmem:[%s2214_s1 + $0x88] sm:$0xf0]  ;;  %v1229_v29 = vld [vmem:[%s2215_s0] sm:$0xf]  ;;  %v1516_v30 = vld [vmem:[%s2215_s0 + $0x4] sm:$0xf0]  ;;  %v1422_v31 = vor.u32 %v1500_v23, %v1421_v21  ;;  %v1362_v32 = vor.u32 %v1483_v24, %v1359_v25 }
  0x17   :  { %v1515_v33 = vld [vmem:[%s2215_s0 + $0x4] sm:$0xf]  ;;  %v1231_v34 = vld [vmem:[%s2215_s0 + $0x8] sm:$0xf0]  ;;  %v1426_v35 = vor.u32 %v1499_v26, %v1423_v27  ;;  %v1230_v36 = vor.u32 %v1516_v30, %v1229_v29  ;;  %v1237_v38 = vld [vmem:[%s2215_s0 + $0x10] sm:$0xf] }
  0x18   :  { %541 = vmatpush.bf16.msra.mxu0 %v1374_v4  ;;  %v1234_v37 = vor.u32 %v1515_v33, %v1231_v34  ;;  %v1518_v39 = vld [vmem:[%s2215_s0 + $0x14] sm:$0xf0]  ;;  %v1517_v40 = vld [vmem:[%s2215_s0 + $0x14] sm:$0xf]  ;;  %v1239_v41 = vld [vmem:[%s2215_s0 + $0x18] sm:$0xf0] }
  0x19   :  { %630 = vmatpush.bf16.msra.mxu1 %v1438_v5  ;;  %719 = vmatpush.bf16.msra.mxu2 %v1378_v6  ;;  %v1238_v42 = vor.u32 %v1518_v39, %v1237_v38  ;;  %v1242_v43 = vor.u32 %v1517_v40, %v1239_v41  ;;  %v1245_v44 = vld [vmem:[%s2215_s0 + $0x20] sm:$0xf]  ;;  %v1520_v45 = vld [vmem:[%s2215_s0 + $0x24] sm:$0xf0]  ;;  %v1519_v46 = vld [vmem:[%s2215_s0 + $0x24] sm:$0xf] }
  0x1a   :  { %808 = vmatpush.bf16.msra.mxu3 %v1442_v10  ;;  %v1247_v47 = vld [vmem:[%s2215_s0 + $0x28] sm:$0xf0]  ;;  %v1246_v48 = vor.u32 %v1520_v45, %v1245_v44  ;;  %v1253_v50 = vld [vmem:[%s2215_s0 + $0x30] sm:$0xf]  ;;  %v1522_v51 = vld [vmem:[%s2215_s0 + $0x34] sm:$0xf0] }
  0x1b   :  { %v1250_v49 = vor.u32 %v1519_v46, %v1247_v47  ;;  %v1521_v52 = vld [vmem:[%s2215_s0 + $0x34] sm:$0xf]  ;;  %v1255_v53 = vld [vmem:[%s2215_s0 + $0x38] sm:$0xf0]  ;;  %v1254_v54 = vor.u32 %v1522_v51, %v1253_v50  ;;  %v1261_v56 = vld [vmem:[%s2215_s0 + $0x40] sm:$0xf] }
  0x1c   :  { %542 = vmatpush.bf16.msra.mxu0 %v1366_v16  ;;  %v1258_v55 = vor.u32 %v1521_v52, %v1255_v53  ;;  %v1524_v57 = vld [vmem:[%s2215_s0 + $0x44] sm:$0xf0]  ;;  %v1523_v58 = vld [vmem:[%s2215_s0 + $0x44] sm:$0xf]  ;;  %v1263_v59 = vld [vmem:[%s2215_s0 + $0x48] sm:$0xf0] }
  0x1d   :  { %631 = vmatpush.bf16.msra.mxu1 %v1430_v17  ;;  %720 = vmatpush.bf16.msra.mxu2 %v1370_v18  ;;  %v1262_v60 = vor.u32 %v1524_v57, %v1261_v56  ;;  %v1266_v61 = vor.u32 %v1523_v58, %v1263_v59  ;;  %v1269_v62 = vld [vmem:[%s2215_s0 + $0x50] sm:$0xf]  ;;  %v1526_v63 = vld [vmem:[%s2215_s0 + $0x54] sm:$0xf0]  ;;  %v1525_v0 = vld [vmem:[%s2215_s0 + $0x54] sm:$0xf] }
  0x1e   :  { %809 = vmatpush.bf16.msra.mxu3 %v1434_v22  ;;  %v1271_v1 = vld [vmem:[%s2215_s0 + $0x58] sm:$0xf0]  ;;  %v1270_v2 = vor.u32 %v1526_v63, %v1269_v62  ;;  %v1277_v4 = vld [vmem:[%s2215_s0 + $0x60] sm:$0xf]  ;;  %v1528_v5 = vld [vmem:[%s2215_s0 + $0x64] sm:$0xf0] }
  0x1f   :  { %v1274_v3 = vor.u32 %v1525_v0, %v1271_v1  ;;  %v1527_v6 = vld [vmem:[%s2215_s0 + $0x64] sm:$0xf]  ;;  %v1279_v7 = vld [vmem:[%s2215_s0 + $0x68] sm:$0xf0]  ;;  %v1278_v8 = vor.u32 %v1528_v5, %v1277_v4  ;;  %v1285_v10 = vld [vmem:[%s2215_s0 + $0x70] sm:$0xf] }
  0x20   :  { %543 = vmatpush.bf16.msra.mxu0 %v1358_v28  ;;  %v1282_v9 = vor.u32 %v1527_v6, %v1279_v7  ;;  %v1530_v11 = vld [vmem:[%s2215_s0 + $0x74] sm:$0xf0]  ;;  %v1529_v12 = vld [vmem:[%s2215_s0 + $0x74] sm:$0xf]  ;;  %v1287_v13 = vld [vmem:[%s2215_s0 + $0x78] sm:$0xf0] }
  0x21   :  { %632 = vmatpush.bf16.msra.mxu1 %v1422_v31  ;;  %721 = vmatpush.bf16.msra.mxu2 %v1362_v32  ;;  %v1286_v14 = vor.u32 %v1530_v11, %v1285_v10  ;;  %v1290_v15 = vor.u32 %v1529_v12, %v1287_v13  ;;  %v1293_v16 = vld [vmem:[%s2215_s0 + $0x80] sm:$0xf]  ;;  %v1532_v17 = vld [vmem:[%s2215_s0 + $0x84] sm:$0xf0]  ;;  %v1531_v19 = vld [vmem:[%s2215_s0 + $0x84] sm:$0xf] }
  0x22   :  { %810 = vmatpush.bf16.msra.mxu3 %v1426_v35  ;;  %v1087_v18 = vld [vmem:[%s2216_s2] sm:$0x3]  ;;  %v1295_v20 = vld [vmem:[%s2215_s0 + $0x88] sm:$0xf0]  ;;  %v1294_v21 = vor.u32 %v1532_v17, %v1293_v16  ;;  %v1534_v38 = vld [vmem:[%s2215_s0 + $0x94] sm:$0xf0] }
  0x23   :  { %544 = vmatmul.bf16.vlgmr.msra.gmra.mxu0 %v1230_v36  ;;  %v1870_v23 = vperm.slane %v1087_v18, 0  ;;  %v1298_v24 = vor.u32 %v1531_v19, %v1295_v20  ;;  %v1876_v29 = vperm.slane %v1087_v18, 1  ;;  %v1533_v39 = vld [vmem:[%s2215_s0 + $0x94] sm:$0xf]  ;;  %v1303_v40 = vld [vmem:[%s2215_s0 + $0x98] sm:$0xf0] }
  0x24   :  { %633 = vmatmul.bf16.vlgmr.msra.gmra.mxu1 %v1234_v37  ;;  %722 = vmatmul.bf16.vlgmr.msra.gmra.mxu2 %v1230_v36  ;;  %v1306_v45 = vor.u32 %v1533_v39, %v1303_v40  ;;  %v1309_v59 = vld [vmem:[%s2215_s0 + $0xa0] sm:$0xf]  ;;  %v1311_v62 = vld [vmem:[%s2215_s0 + $0xa8] sm:$0xf0]  ;;  %v1317_v17 = vld [vmem:[%s2215_s0 + $0xb0] sm:$0xf] }
  0x25   :  { %811 = vmatmul.bf16.vlgmr.msra.gmra.mxu3 %v1234_v37  ;;  %v1301_v37 = vld [vmem:[%s2215_s0 + $0x90] sm:$0xf]  ;;  %v1538_v18 = vld [vmem:[%s2215_s0 + $0xb4] sm:$0xf0]  ;;  %v1537_v19 = vld [vmem:[%s2215_s0 + $0xb4] sm:$0xf] }
  0x26   :  { %v1319_v20 = vld [vmem:[%s2215_s0 + $0xb8] sm:$0xf0] }
  0x33   :  { %549 = vmatmul.bf16.gmra.mxu0 %v1238_v42 }
  0x34   :  { %638 = vmatmul.bf16.gmra.mxu1 %v1242_v43  ;;  %727 = vmatmul.bf16.gmra.mxu2 %v1238_v42  ;;  %v1302_v42 = vor.u32 %v1534_v38, %v1301_v37 }
  0x35   :  { %816 = vmatmul.bf16.gmra.mxu3 %v1242_v43 }
  0x43   :  { %554 = vmatmul.bf16.gmra.mxu0 %v1246_v48 }
  0x44   :  { %643 = vmatmul.bf16.gmra.mxu1 %v1250_v49  ;;  %732 = vmatmul.bf16.gmra.mxu2 %v1246_v48 }
  0x45   :  { %821 = vmatmul.bf16.gmra.mxu3 %v1250_v49 }
  0x53   :  { %559 = vmatmul.bf16.gmra.mxu0 %v1254_v54 }
  0x54   :  { %648 = vmatmul.bf16.gmra.mxu1 %v1258_v55  ;;  %737 = vmatmul.bf16.gmra.mxu2 %v1254_v54 }
  0x55   :  { %826 = vmatmul.bf16.gmra.mxu3 %v1258_v55 }
  0x63   :  { %564 = vmatmul.bf16.gmra.mxu0 %v1262_v60 }
  0x64   :  { %653 = vmatmul.bf16.gmra.mxu1 %v1266_v61  ;;  %742 = vmatmul.bf16.gmra.mxu2 %v1262_v60  ;;  %v1536_v60 = vld [vmem:[%s2215_s0 + $0xa4] sm:$0xf0] }
  0x65   :  { %831 = vmatmul.bf16.gmra.mxu3 %v1266_v61  ;;  %v1535_v61 = vld [vmem:[%s2215_s0 + $0xa4] sm:$0xf]  ;;  %v1310_v0 = vor.u32 %v1536_v60, %v1309_v59 }
  0x73   :  { %569 = vmatmul.bf16.gmra.mxu0 %v1270_v2 }
  0x74   :  { %658 = vmatmul.bf16.gmra.mxu1 %v1274_v3  ;;  %747 = vmatmul.bf16.gmra.mxu2 %v1270_v2 }
  0x75   :  { %836 = vmatmul.bf16.gmra.mxu3 %v1274_v3  ;;  %v1314_v3 = vor.u32 %v1535_v61, %v1311_v62 }
  0x83   :  { %574 = vmatmul.bf16.gmra.mxu0 %v1278_v8 }
  0x84   :  { %663 = vmatmul.bf16.gmra.mxu1 %v1282_v9  ;;  %752 = vmatmul.bf16.gmra.mxu2 %v1278_v8 }
  0x85   :  { %841 = vmatmul.bf16.gmra.mxu3 %v1282_v9 }
  0x93   :  { %579 = vmatmul.bf16.gmra.mxu0 %v1286_v14 }
  0x94   :  { %668 = vmatmul.bf16.gmra.mxu1 %v1290_v15  ;;  %757 = vmatmul.bf16.gmra.mxu2 %v1286_v14 }
  0x95   :  { %846 = vmatmul.bf16.gmra.mxu3 %v1290_v15 }
  0xa0   :  { %v545_v22 = vpop.f32.mrf.mxu0 }
  0xa1   :  { %v634_v25 = vpop.f32.mrf.mxu1 }
  0xa2   :  { %v635_v26 = vadd.f32 %v634_v25, %v545_v22  ;;  %v1318_v22 = vor.u32 %v1538_v18, %v1317_v17 }
  0xa3   :  { %584 = vmatmul.bf16.gmra.mxu0 %v1294_v21 }
  0xa4   :  { %v1093_v27 = vadd.f32 %v1870_v23, %v635_v26  ;;  %673 = vmatmul.bf16.gmra.mxu1 %v1298_v24  ;;  %762 = vmatmul.bf16.gmra.mxu2 %v1294_v21  ;;  %v1322_v26 = vor.u32 %v1537_v19, %v1319_v20 }
  0xa5   :  { %851 = vmatmul.bf16.gmra.mxu3 %v1298_v24 }
  0xa6   :  { %1157 = vst [vmem:[%s2217_s3] sm:$0xff] %v1093_v27 }
  0xa7   :  { %v723_v28 = vpop.f32.mrf.mxu2 }
  0xa8   :  { %v812_v30 = vpop.f32.mrf.mxu3  ;;  %v547_v31 = vpop.f32.mrf.mxu0 }
  0xa9   :  { %v813_v32 = vadd.f32 %v812_v30, %v723_v28  ;;  %v636_v33 = vpop.f32.mrf.mxu1 }
  0xaa   :  { %v637_v34 = vadd.f32 %v636_v33, %v547_v31 }
  0xab   :  { %v1094_v35 = vadd.f32 %v1876_v29, %v813_v32 }
  0xac   :  { %v1095_v36 = vadd.f32 %v1870_v23, %v637_v34 }
  0xad   :  { %1158 = vst [vmem:[%s2217_s3 + $0x8] sm:$0xff] %v1094_v35 }
  0xae   :  { %1159 = vst [vmem:[%s2217_s3 + $0x10] sm:$0xff] %v1095_v36 }
  0xaf   :  { %v725_v41 = vpop.f32.mrf.mxu2 }
  0xb0   :  { %v814_v43 = vpop.f32.mrf.mxu3  ;;  %v550_v44 = vpop.f32.mrf.mxu0 }
  0xb1   :  { %v815_v46 = vadd.f32 %v814_v43, %v725_v41  ;;  %v639_v47 = vpop.f32.mrf.mxu1  ;;  %v1325_v41 = vld [vmem:[%s2215_s0 + $0xc0] sm:$0xf]  ;;  %v1539_v43 = vld [vmem:[%s2215_s0 + $0xc4] sm:$0xf] }
  0xb2   :  { %v640_v48 = vadd.f32 %v639_v47, %v550_v44  ;;  %v1327_v44 = vld [vmem:[%s2215_s0 + $0xc8] sm:$0xf0] }
  0xb3   :  { %v1096_v49 = vadd.f32 %v1876_v29, %v815_v46  ;;  %589 = vmatmul.bf16.gmra.mxu0 %v1302_v42 }
  0xb4   :  { %v1097_v50 = vadd.f32 %v1870_v23, %v640_v48  ;;  %678 = vmatmul.bf16.gmra.mxu1 %v1306_v45  ;;  %767 = vmatmul.bf16.gmra.mxu2 %v1302_v42  ;;  %v1540_v42 = vld [vmem:[%s2215_s0 + $0xc4] sm:$0xf0] }
  0xb5   :  { %1160 = vst [vmem:[%s2217_s3 + $0x18] sm:$0xff] %v1096_v49  ;;  %856 = vmatmul.bf16.gmra.mxu3 %v1306_v45  ;;  %v1326_v46 = vor.u32 %v1540_v42, %v1325_v41  ;;  %v1330_v49 = vor.u32 %v1539_v43, %v1327_v44 }
  0xb6   :  { %1161 = vst [vmem:[%s2217_s3 + $0x20] sm:$0xff] %v1097_v50 }
  0xb7   :  { %v728_v51 = vpop.f32.mrf.mxu2 }
  0xb8   :  { %v817_v52 = vpop.f32.mrf.mxu3  ;;  %v552_v53 = vpop.f32.mrf.mxu0 }
  0xb9   :  { %v818_v54 = vadd.f32 %v817_v52, %v728_v51  ;;  %v641_v55 = vpop.f32.mrf.mxu1 }
  0xba   :  { %v642_v56 = vadd.f32 %v641_v55, %v552_v53 }
  0xbb   :  { %v1098_v57 = vadd.f32 %v1876_v29, %v818_v54 }
  0xbc   :  { %v1099_v58 = vadd.f32 %v1870_v23, %v642_v56 }
  0xbd   :  { %1162 = vst [vmem:[%s2217_s3 + $0x28] sm:$0xff] %v1098_v57 }
  0xbe   :  { %1163 = vst [vmem:[%s2217_s3 + $0x30] sm:$0xff] %v1099_v58 }
  0xbf   :  { %v730_v63 = vpop.f32.mrf.mxu2 }
  0xc0   :  { %v819_v1 = vpop.f32.mrf.mxu3  ;;  %v555_v2 = vpop.f32.mrf.mxu0 }
  0xc1   :  { %v820_v4 = vadd.f32 %v819_v1, %v730_v63  ;;  %v644_v5 = vpop.f32.mrf.mxu1  ;;  %v1333_v63 = vld [vmem:[%s2215_s0 + $0xd0] sm:$0xf]  ;;  %v1541_v1 = vld [vmem:[%s2215_s0 + $0xd4] sm:$0xf] }
  0xc2   :  { %v645_v6 = vadd.f32 %v644_v5, %v555_v2  ;;  %v1335_v2 = vld [vmem:[%s2215_s0 + $0xd8] sm:$0xf0] }
  0xc3   :  { %v1100_v7 = vadd.f32 %v1876_v29, %v820_v4  ;;  %594 = vmatmul.bf16.gmra.mxu0 %v1310_v0 }
  0xc4   :  { %v1101_v8 = vadd.f32 %v1870_v23, %v645_v6  ;;  %683 = vmatmul.bf16.gmra.mxu1 %v1314_v3  ;;  %772 = vmatmul.bf16.gmra.mxu2 %v1310_v0  ;;  %v1542_v0 = vld [vmem:[%s2215_s0 + $0xd4] sm:$0xf0] }
  0xc5   :  { %1164 = vst [vmem:[%s2217_s3 + $0x38] sm:$0xff] %v1100_v7  ;;  %861 = vmatmul.bf16.gmra.mxu3 %v1314_v3  ;;  %v1334_v4 = vor.u32 %v1542_v0, %v1333_v63  ;;  %v1338_v7 = vor.u32 %v1541_v1, %v1335_v2 }
  0xc6   :  { %1165 = vst [vmem:[%s2217_s3 + $0x40] sm:$0xff] %v1101_v8 }
  0xc7   :  { %v733_v9 = vpop.f32.mrf.mxu2 }
  0xc8   :  { %v822_v10 = vpop.f32.mrf.mxu3  ;;  %v557_v11 = vpop.f32.mrf.mxu0 }
  0xc9   :  { %v823_v12 = vadd.f32 %v822_v10, %v733_v9  ;;  %v646_v13 = vpop.f32.mrf.mxu1 }
  0xca   :  { %v647_v14 = vadd.f32 %v646_v13, %v557_v11 }
  0xcb   :  { %v1102_v15 = vadd.f32 %v1876_v29, %v823_v12 }
  0xcc   :  { %v1103_v16 = vadd.f32 %v1870_v23, %v647_v14 }
  0xcd   :  { %1166 = vst [vmem:[%s2217_s3 + $0x48] sm:$0xff] %v1102_v15 }
  0xce   :  { %1167 = vst [vmem:[%s2217_s3 + $0x50] sm:$0xff] %v1103_v16 }
  0xcf   :  { %v735_v21 = vpop.f32.mrf.mxu2 }
  0xd0   :  { %v824_v24 = vpop.f32.mrf.mxu3  ;;  %v560_v25 = vpop.f32.mrf.mxu0 }
  0xd1   :  { %v825_v27 = vadd.f32 %v824_v24, %v735_v21  ;;  %v649_v28 = vpop.f32.mrf.mxu1  ;;  %v1341_v21 = vld [vmem:[%s2215_s0 + $0xe0] sm:$0xf]  ;;  %v1543_v24 = vld [vmem:[%s2215_s0 + $0xe4] sm:$0xf] }
  0xd2   :  { %v650_v30 = vadd.f32 %v649_v28, %v560_v25  ;;  %v1343_v25 = vld [vmem:[%s2215_s0 + $0xe8] sm:$0xf0] }
  0xd3   :  { %v1104_v31 = vadd.f32 %v1876_v29, %v825_v27  ;;  %599 = vmatmul.bf16.gmra.mxu0 %v1318_v22 }
  0xd4   :  { %v1105_v32 = vadd.f32 %v1870_v23, %v650_v30  ;;  %688 = vmatmul.bf16.gmra.mxu1 %v1322_v26  ;;  %777 = vmatmul.bf16.gmra.mxu2 %v1318_v22  ;;  %v1544_v22 = vld [vmem:[%s2215_s0 + $0xe4] sm:$0xf0] }
  0xd5   :  { %1168 = vst [vmem:[%s2217_s3 + $0x58] sm:$0xff] %v1104_v31  ;;  %866 = vmatmul.bf16.gmra.mxu3 %v1322_v26  ;;  %v1342_v27 = vor.u32 %v1544_v22, %v1341_v21  ;;  %v1346_v31 = vor.u32 %v1543_v24, %v1343_v25 }
  0xd6   :  { %1169 = vst [vmem:[%s2217_s3 + $0x60] sm:$0xff] %v1105_v32 }
  0xd7   :  { %v738_v33 = vpop.f32.mrf.mxu2 }
  0xd8   :  { %v827_v34 = vpop.f32.mrf.mxu3  ;;  %v562_v35 = vpop.f32.mrf.mxu0 }
  0xd9   :  { %v828_v36 = vadd.f32 %v827_v34, %v738_v33  ;;  %v651_v37 = vpop.f32.mrf.mxu1 }
  0xda   :  { %v652_v38 = vadd.f32 %v651_v37, %v562_v35 }
  0xdb   :  { %v1106_v39 = vadd.f32 %v1876_v29, %v828_v36 }
  0xdc   :  { %v1107_v40 = vadd.f32 %v1870_v23, %v652_v38 }
  0xdd   :  { %1170 = vst [vmem:[%s2217_s3 + $0x68] sm:$0xff] %v1106_v39 }
  0xde   :  { %1171 = vst [vmem:[%s2217_s3 + $0x70] sm:$0xff] %v1107_v40 }
  0xdf   :  { %v740_v45 = vpop.f32.mrf.mxu2 }
  0xe0   :  { %v829_v47 = vpop.f32.mrf.mxu3  ;;  %v565_v48 = vpop.f32.mrf.mxu0 }
  0xe1   :  { %v830_v50 = vadd.f32 %v829_v47, %v740_v45  ;;  %v654_v51 = vpop.f32.mrf.mxu1  ;;  %v1349_v45 = vld [vmem:[%s2215_s0 + $0xf0] sm:$0xf]  ;;  %v1545_v47 = vld [vmem:[%s2215_s0 + $0xf4] sm:$0xf] }
  0xe2   :  { %v655_v52 = vadd.f32 %v654_v51, %v565_v48  ;;  %v1351_v48 = vld [vmem:[%s2215_s0 + $0xf8] sm:$0xf0] }
  0xe3   :  { %v1108_v53 = vadd.f32 %v1876_v29, %v830_v50  ;;  %604 = vmatmul.bf16.gmra.mxu0 %v1326_v46 }
  0xe4   :  { %v1109_v54 = vadd.f32 %v1870_v23, %v655_v52  ;;  %693 = vmatmul.bf16.gmra.mxu1 %v1330_v49  ;;  %782 = vmatmul.bf16.gmra.mxu2 %v1326_v46  ;;  %v1546_v46 = vld [vmem:[%s2215_s0 + $0xf4] sm:$0xf0] }
  0xe5   :  { %1172 = vst [vmem:[%s2217_s3 + $0x78] sm:$0xff] %v1108_v53  ;;  %871 = vmatmul.bf16.gmra.mxu3 %v1330_v49  ;;  %v1350_v50 = vor.u32 %v1546_v46, %v1349_v45  ;;  %v1354_v53 = vor.u32 %v1545_v47, %v1351_v48 }
  0xe6   :  { %1173 = vst [vmem:[%s2217_s3 + $0x80] sm:$0xff] %v1109_v54 }
  0xe7   :  { %v743_v55 = vpop.f32.mrf.mxu2 }
  0xe8   :  { %v832_v56 = vpop.f32.mrf.mxu3  ;;  %v567_v57 = vpop.f32.mrf.mxu0 }
  0xe9   :  { %v833_v58 = vadd.f32 %v832_v56, %v743_v55  ;;  %v656_v59 = vpop.f32.mrf.mxu1 }
  0xea   :  { %v657_v60 = vadd.f32 %v656_v59, %v567_v57 }
  0xeb   :  { %v1110_v61 = vadd.f32 %v1876_v29, %v833_v58 }
  0xec   :  { %v1111_v62 = vadd.f32 %v1870_v23, %v657_v60 }
  0xed   :  { %1174 = vst [vmem:[%s2217_s3 + $0x88] sm:$0xff] %v1110_v61 }
  0xee   :  { %1175 = vst [vmem:[%s2217_s3 + $0x90] sm:$0xff] %v1111_v62 }
  0xef   :  { %v745_v3 = vpop.f32.mrf.mxu2 }
  0xf0   :  { %v834_v5 = vpop.f32.mrf.mxu3  ;;  %v570_v6 = vpop.f32.mrf.mxu0 }
  0xf1   :  { %v835_v8 = vadd.f32 %v834_v5, %v745_v3  ;;  %v659_v9 = vpop.f32.mrf.mxu1 }
  0xf2   :  { %v660_v10 = vadd.f32 %v659_v9, %v570_v6 }
  0xf3   :  { %v1112_v11 = vadd.f32 %v1876_v29, %v835_v8  ;;  %609 = vmatmul.bf16.gmra.mxu0 %v1334_v4 }
  0xf4   :  { %v1113_v12 = vadd.f32 %v1870_v23, %v660_v10  ;;  %698 = vmatmul.bf16.gmra.mxu1 %v1338_v7  ;;  %787 = vmatmul.bf16.gmra.mxu2 %v1334_v4 }
  0xf5   :  { %1176 = vst [vmem:[%s2217_s3 + $0x98] sm:$0xff] %v1112_v11  ;;  %876 = vmatmul.bf16.gmra.mxu3 %v1338_v7 }
  0xf6   :  { %1177 = vst [vmem:[%s2217_s3 + $0xa0] sm:$0xff] %v1113_v12 }
  0xf7   :  { %v748_v13 = vpop.f32.mrf.mxu2 }
  0xf8   :  { %v837_v14 = vpop.f32.mrf.mxu3  ;;  %v572_v15 = vpop.f32.mrf.mxu0 }
  0xf9   :  { %v838_v16 = vadd.f32 %v837_v14, %v748_v13  ;;  %v661_v17 = vpop.f32.mrf.mxu1 }
  0xfa   :  { %v662_v18 = vadd.f32 %v661_v17, %v572_v15 }
  0xfb   :  { %v1114_v19 = vadd.f32 %v1876_v29, %v838_v16 }
  0xfc   :  { %v1115_v20 = vadd.f32 %v1870_v23, %v662_v18 }
  0xfd   :  { %1178 = vst [vmem:[%s2217_s3 + $0xa8] sm:$0xff] %v1114_v19 }
  0xfe   :  { %1179 = vst [vmem:[%s2217_s3 + $0xb0] sm:$0xff] %v1115_v20 }
  0xff   :  { %v750_v26 = vpop.f32.mrf.mxu2 }
 0x100   :  { %v839_v28 = vpop.f32.mrf.mxu3  ;;  %v575_v30 = vpop.f32.mrf.mxu0 }
 0x101   :  { %v840_v32 = vadd.f32 %v839_v28, %v750_v26  ;;  %v664_v33 = vpop.f32.mrf.mxu1 }
 0x102   :  { %v665_v34 = vadd.f32 %v664_v33, %v575_v30 }
 0x103   :  { %v1116_v35 = vadd.f32 %v1876_v29, %v840_v32  ;;  %614 = vmatmul.bf16.gmra.mxu0 %v1342_v27 }
 0x104   :  { %v1117_v36 = vadd.f32 %v1870_v23, %v665_v34  ;;  %703 = vmatmul.bf16.gmra.mxu1 %v1346_v31  ;;  %792 = vmatmul.bf16.gmra.mxu2 %v1342_v27 }
 0x105   :  { %1180 = vst [vmem:[%s2217_s3 + $0xb8] sm:$0xff] %v1116_v35  ;;  %881 = vmatmul.bf16.gmra.mxu3 %v1346_v31 }
 0x106   :  { %1181 = vst [vmem:[%s2217_s3 + $0xc0] sm:$0xff] %v1117_v36 }
 0x107   :  { %v753_v37 = vpop.f32.mrf.mxu2 }
 0x108   :  { %v842_v38 = vpop.f32.mrf.mxu3  ;;  %v577_v39 = vpop.f32.mrf.mxu0 }
 0x109   :  { %v843_v40 = vadd.f32 %v842_v38, %v753_v37  ;;  %v666_v41 = vpop.f32.mrf.mxu1 }
 0x10a   :  { %v667_v42 = vadd.f32 %v666_v41, %v577_v39 }
 0x10b   :  { %v1118_v43 = vadd.f32 %v1876_v29, %v843_v40 }
 0x10c   :  { %v1119_v44 = vadd.f32 %v1870_v23, %v667_v42 }
 0x10d   :  { %1182 = vst [vmem:[%s2217_s3 + $0xc8] sm:$0xff] %v1118_v43 }
 0x10e   :  { %1183 = vst [vmem:[%s2217_s3 + $0xd0] sm:$0xff] %v1119_v44 }
 0x10f   :  { %v755_v49 = vpop.f32.mrf.mxu2 }
 0x110   :  { %v844_v51 = vpop.f32.mrf.mxu3  ;;  %v580_v52 = vpop.f32.mrf.mxu0 }
 0x111   :  { %v845_v54 = vadd.f32 %v844_v51, %v755_v49  ;;  %v669_v55 = vpop.f32.mrf.mxu1 }
 0x112   :  { %v670_v56 = vadd.f32 %v669_v55, %v580_v52 }
 0x113   :  { %v1120_v57 = vadd.f32 %v1876_v29, %v845_v54  ;;  %619 = vmatmul.bf16.gmra.mxu0 %v1350_v50 }
 0x114   :  { %v1121_v58 = vadd.f32 %v1870_v23, %v670_v56  ;;  %708 = vmatmul.bf16.gmra.mxu1 %v1354_v53  ;;  %797 = vmatmul.bf16.gmra.mxu2 %v1350_v50 }
 0x115   :  { %1184 = vst [vmem:[%s2217_s3 + $0xd8] sm:$0xff] %v1120_v57  ;;  %886 = vmatmul.bf16.gmra.mxu3 %v1354_v53 }
 0x116   :  { %1185 = vst [vmem:[%s2217_s3 + $0xe0] sm:$0xff] %v1121_v58 }
 0x117   :  { %v758_v59 = vpop.f32.mrf.mxu2 }
 0x118   :  { %v847_v60 = vpop.f32.mrf.mxu3  ;;  %v582_v61 = vpop.f32.mrf.mxu0 }
 0x119   :  { %v848_v62 = vadd.f32 %v847_v60, %v758_v59  ;;  %v671_v63 = vpop.f32.mrf.mxu1 }
 0x11a   :  { %v672_v0 = vadd.f32 %v671_v63, %v582_v61 }
 0x11b   :  { %v1122_v1 = vadd.f32 %v1876_v29, %v848_v62 }
 0x11c   :  { %v1123_v2 = vadd.f32 %v1870_v23, %v672_v0 }
 0x11d   :  { %1186 = vst [vmem:[%s2217_s3 + $0xe8] sm:$0xff] %v1122_v1 }
 0x11e   :  { %1187 = vst [vmem:[%s2217_s3 + $0xf0] sm:$0xff] %v1123_v2 }
 0x11f   :  { %v760_v3 = vpop.f32.mrf.mxu2 }
 0x120   :  { %v849_v4 = vpop.f32.mrf.mxu3  ;;  %v585_v5 = vpop.f32.mrf.mxu0 }
 0x121   :  { %v850_v6 = vadd.f32 %v849_v4, %v760_v3  ;;  %v674_v7 = vpop.f32.mrf.mxu1 }
 0x122   :  { %v675_v8 = vadd.f32 %v674_v7, %v585_v5 }
 0x123   :  { %v1124_v9 = vadd.f32 %v1876_v29, %v850_v6 }
 0x124   :  { %v1125_v10 = vadd.f32 %v1870_v23, %v675_v8 }
 0x125   :  { %1188 = vst [vmem:[%s2217_s3 + $0xf8] sm:$0xff] %v1124_v9 }
 0x126   :  { %1189 = vst [vmem:[%s2217_s3 + $0x100] sm:$0xff] %v1125_v10 }
 0x127   :  { %v763_v11 = vpop.f32.mrf.mxu2 }
 0x128   :  { %v852_v12 = vpop.f32.mrf.mxu3  ;;  %v587_v13 = vpop.f32.mrf.mxu0 }
 0x129   :  { %v853_v14 = vadd.f32 %v852_v12, %v763_v11  ;;  %v676_v15 = vpop.f32.mrf.mxu1 }
 0x12a   :  { %v677_v16 = vadd.f32 %v676_v15, %v587_v13 }
 0x12b   :  { %v1126_v17 = vadd.f32 %v1876_v29, %v853_v14 }
 0x12c   :  { %v1127_v18 = vadd.f32 %v1870_v23, %v677_v16 }
 0x12d   :  { %1190 = vst [vmem:[%s2217_s3 + $0x108] sm:$0xff] %v1126_v17 }
 0x12e   :  { %1191 = vst [vmem:[%s2217_s3 + $0x110] sm:$0xff] %v1127_v18 }
 0x12f   :  { %v765_v19 = vpop.f32.mrf.mxu2 }
 0x130   :  { %v854_v20 = vpop.f32.mrf.mxu3  ;;  %v590_v21 = vpop.f32.mrf.mxu0 }
 0x131   :  { %v855_v22 = vadd.f32 %v854_v20, %v765_v19  ;;  %v679_v24 = vpop.f32.mrf.mxu1 }
 0x132   :  { %v680_v25 = vadd.f32 %v679_v24, %v590_v21 }
 0x133   :  { %v1128_v26 = vadd.f32 %v1876_v29, %v855_v22 }
 0x134   :  { %v1129_v27 = vadd.f32 %v1870_v23, %v680_v25 }
 0x135   :  { %1192 = vst [vmem:[%s2217_s3 + $0x118] sm:$0xff] %v1128_v26 }
 0x136   :  { %1193 = vst [vmem:[%s2217_s3 + $0x120] sm:$0xff] %v1129_v27 }
 0x137   :  { %v768_v28 = vpop.f32.mrf.mxu2 }
 0x138   :  { %v857_v30 = vpop.f32.mrf.mxu3  ;;  %v592_v31 = vpop.f32.mrf.mxu0 }
 0x139   :  { %v858_v32 = vadd.f32 %v857_v30, %v768_v28  ;;  %v681_v33 = vpop.f32.mrf.mxu1 }
 0x13a   :  { %v682_v34 = vadd.f32 %v681_v33, %v592_v31 }
 0x13b   :  { %v1130_v35 = vadd.f32 %v1876_v29, %v858_v32 }
 0x13c   :  { %v1131_v36 = vadd.f32 %v1870_v23, %v682_v34 }
 0x13d   :  { %1194 = vst [vmem:[%s2217_s3 + $0x128] sm:$0xff] %v1130_v35 }
 0x13e   :  { %1195 = vst [vmem:[%s2217_s3 + $0x130] sm:$0xff] %v1131_v36 }
 0x13f   :  { %v770_v37 = vpop.f32.mrf.mxu2 }
 0x140   :  { %v859_v38 = vpop.f32.mrf.mxu3  ;;  %v595_v39 = vpop.f32.mrf.mxu0 }
 0x141   :  { %v860_v40 = vadd.f32 %v859_v38, %v770_v37  ;;  %v684_v41 = vpop.f32.mrf.mxu1 }
 0x142   :  { %v685_v42 = vadd.f32 %v684_v41, %v595_v39 }
 0x143   :  { %v1132_v43 = vadd.f32 %v1876_v29, %v860_v40 }
 0x144   :  { %v1133_v44 = vadd.f32 %v1870_v23, %v685_v42 }
 0x145   :  { %1196 = vst [vmem:[%s2217_s3 + $0x138] sm:$0xff] %v1132_v43 }
 0x146   :  { %1197 = vst [vmem:[%s2217_s3 + $0x140] sm:$0xff] %v1133_v44 }
 0x147   :  { %v773_v45 = vpop.f32.mrf.mxu2 }
 0x148   :  { %v862_v46 = vpop.f32.mrf.mxu3  ;;  %v597_v47 = vpop.f32.mrf.mxu0 }
 0x149   :  { %v863_v48 = vadd.f32 %v862_v46, %v773_v45  ;;  %v686_v49 = vpop.f32.mrf.mxu1 }
 0x14a   :  { %v687_v50 = vadd.f32 %v686_v49, %v597_v47 }
 0x14b   :  { %v1134_v51 = vadd.f32 %v1876_v29, %v863_v48 }
 0x14c   :  { %v1135_v52 = vadd.f32 %v1870_v23, %v687_v50 }
 0x14d   :  { %1198 = vst [vmem:[%s2217_s3 + $0x148] sm:$0xff] %v1134_v51 }
 0x14e   :  { %1199 = vst [vmem:[%s2217_s3 + $0x150] sm:$0xff] %v1135_v52 }
 0x14f   :  { %v775_v53 = vpop.f32.mrf.mxu2 }
 0x150   :  { %v864_v54 = vpop.f32.mrf.mxu3  ;;  %v600_v55 = vpop.f32.mrf.mxu0 }
 0x151   :  { %v865_v56 = vadd.f32 %v864_v54, %v775_v53  ;;  %v689_v57 = vpop.f32.mrf.mxu1 }
 0x152   :  { %v690_v58 = vadd.f32 %v689_v57, %v600_v55 }
 0x153   :  { %v1136_v59 = vadd.f32 %v1876_v29, %v865_v56 }
 0x154   :  { %v1137_v60 = vadd.f32 %v1870_v23, %v690_v58 }
 0x155   :  { %1200 = vst [vmem:[%s2217_s3 + $0x158] sm:$0xff] %v1136_v59 }
 0x156   :  { %1201 = vst [vmem:[%s2217_s3 + $0x160] sm:$0xff] %v1137_v60 }
 0x157   :  { %v778_v61 = vpop.f32.mrf.mxu2 }
 0x158   :  { %v867_v62 = vpop.f32.mrf.mxu3  ;;  %v602_v63 = vpop.f32.mrf.mxu0 }
 0x159   :  { %v868_v0 = vadd.f32 %v867_v62, %v778_v61  ;;  %v691_v1 = vpop.f32.mrf.mxu1 }
 0x15a   :  { %v692_v2 = vadd.f32 %v691_v1, %v602_v63 }
 0x15b   :  { %v1138_v3 = vadd.f32 %v1876_v29, %v868_v0 }
 0x15c   :  { %v1139_v4 = vadd.f32 %v1870_v23, %v692_v2 }
 0x15d   :  { %1202 = vst [vmem:[%s2217_s3 + $0x168] sm:$0xff] %v1138_v3 }
 0x15e   :  { %1203 = vst [vmem:[%s2217_s3 + $0x170] sm:$0xff] %v1139_v4 }
 0x15f   :  { %v780_v5 = vpop.f32.mrf.mxu2 }
 0x160   :  { %v869_v6 = vpop.f32.mrf.mxu3  ;;  %v605_v7 = vpop.f32.mrf.mxu0 }
 0x161   :  { %v870_v8 = vadd.f32 %v869_v6, %v780_v5  ;;  %v694_v9 = vpop.f32.mrf.mxu1 }
 0x162   :  { %v695_v10 = vadd.f32 %v694_v9, %v605_v7 }
 0x163   :  { %v1140_v11 = vadd.f32 %v1876_v29, %v870_v8 }
 0x164   :  { %v1141_v12 = vadd.f32 %v1870_v23, %v695_v10 }
 0x165   :  { %1204 = vst [vmem:[%s2217_s3 + $0x178] sm:$0xff] %v1140_v11 }
 0x166   :  { %1205 = vst [vmem:[%s2217_s3 + $0x180] sm:$0xff] %v1141_v12 }
 0x167   :  { %v783_v13 = vpop.f32.mrf.mxu2 }
 0x168   :  { %v872_v14 = vpop.f32.mrf.mxu3  ;;  %v607_v15 = vpop.f32.mrf.mxu0 }
 0x169   :  { %v873_v16 = vadd.f32 %v872_v14, %v783_v13  ;;  %v696_v17 = vpop.f32.mrf.mxu1 }
 0x16a   :  { %v697_v18 = vadd.f32 %v696_v17, %v607_v15 }
 0x16b   :  { %v1142_v19 = vadd.f32 %v1876_v29, %v873_v16 }
 0x16c   :  { %v1143_v20 = vadd.f32 %v1870_v23, %v697_v18 }
 0x16d   :  { %1206 = vst [vmem:[%s2217_s3 + $0x188] sm:$0xff] %v1142_v19 }
 0x16e   :  { %1207 = vst [vmem:[%s2217_s3 + $0x190] sm:$0xff] %v1143_v20 }
 0x16f   :  { %v785_v21 = vpop.f32.mrf.mxu2 }
 0x170   :  { %v874_v22 = vpop.f32.mrf.mxu3  ;;  %v610_v24 = vpop.f32.mrf.mxu0 }
 0x171   :  { %v875_v25 = vadd.f32 %v874_v22, %v785_v21  ;;  %v699_v26 = vpop.f32.mrf.mxu1 }
 0x172   :  { %v700_v27 = vadd.f32 %v699_v26, %v610_v24 }
 0x173   :  { %v1144_v28 = vadd.f32 %v1876_v29, %v875_v25 }
 0x174   :  { %v1145_v30 = vadd.f32 %v1870_v23, %v700_v27 }
 0x175   :  { %1208 = vst [vmem:[%s2217_s3 + $0x198] sm:$0xff] %v1144_v28 }
 0x176   :  { %1209 = vst [vmem:[%s2217_s3 + $0x1a0] sm:$0xff] %v1145_v30 }
 0x177   :  { %v788_v31 = vpop.f32.mrf.mxu2 }
 0x178   :  { %v877_v32 = vpop.f32.mrf.mxu3  ;;  %v612_v33 = vpop.f32.mrf.mxu0 }
 0x179   :  { %v878_v34 = vadd.f32 %v877_v32, %v788_v31  ;;  %v701_v35 = vpop.f32.mrf.mxu1 }
 0x17a   :  { %v702_v36 = vadd.f32 %v701_v35, %v612_v33 }
 0x17b   :  { %v1146_v37 = vadd.f32 %v1876_v29, %v878_v34 }
 0x17c   :  { %v1147_v38 = vadd.f32 %v1870_v23, %v702_v36 }
 0x17d   :  { %1210 = vst [vmem:[%s2217_s3 + $0x1a8] sm:$0xff] %v1146_v37 }
 0x17e   :  { %1211 = vst [vmem:[%s2217_s3 + $0x1b0] sm:$0xff] %v1147_v38 }
 0x17f   :  { %v790_v39 = vpop.f32.mrf.mxu2 }
 0x180   :  { %v879_v40 = vpop.f32.mrf.mxu3  ;;  %v615_v41 = vpop.f32.mrf.mxu0 }
 0x181   :  { %v880_v42 = vadd.f32 %v879_v40, %v790_v39  ;;  %v704_v43 = vpop.f32.mrf.mxu1 }
 0x182   :  { %v705_v44 = vadd.f32 %v704_v43, %v615_v41 }
 0x183   :  { %v1148_v45 = vadd.f32 %v1876_v29, %v880_v42 }
 0x184   :  { %v1149_v46 = vadd.f32 %v1870_v23, %v705_v44 }
 0x185   :  { %1212 = vst [vmem:[%s2217_s3 + $0x1b8] sm:$0xff] %v1148_v45 }
 0x186   :  { %1213 = vst [vmem:[%s2217_s3 + $0x1c0] sm:$0xff] %v1149_v46 }
 0x187   :  { %v793_v47 = vpop.f32.mrf.mxu2 }
 0x188   :  { %v882_v48 = vpop.f32.mrf.mxu3  ;;  %v617_v49 = vpop.f32.mrf.mxu0 }
 0x189   :  { %v883_v50 = vadd.f32 %v882_v48, %v793_v47  ;;  %v706_v51 = vpop.f32.mrf.mxu1 }
 0x18a   :  { %v707_v52 = vadd.f32 %v706_v51, %v617_v49 }
 0x18b   :  { %v1150_v53 = vadd.f32 %v1876_v29, %v883_v50 }
 0x18c   :  { %v1151_v54 = vadd.f32 %v1870_v23, %v707_v52 }
 0x18d   :  { %1214 = vst [vmem:[%s2217_s3 + $0x1c8] sm:$0xff] %v1150_v53 }
 0x18e   :  { %1215 = vst [vmem:[%s2217_s3 + $0x1d0] sm:$0xff] %v1151_v54 }
 0x18f   :  { %v795_v55 = vpop.f32.mrf.mxu2 }
 0x190   :  { %v884_v56 = vpop.f32.mrf.mxu3  ;;  %v620_v57 = vpop.f32.mrf.mxu0 }
 0x191   :  { %v885_v58 = vadd.f32 %v884_v56, %v795_v55  ;;  %v709_v59 = vpop.f32.mrf.mxu1 }
 0x192   :  { %v710_v60 = vadd.f32 %v709_v59, %v620_v57 }
 0x193   :  { %v1152_v61 = vadd.f32 %v1876_v29, %v885_v58 }
 0x194   :  { %v1153_v62 = vadd.f32 %v1870_v23, %v710_v60 }
 0x195   :  { %1216 = vst [vmem:[%s2217_s3 + $0x1d8] sm:$0xff] %v1152_v61 }
 0x196   :  { %1217 = vst [vmem:[%s2217_s3 + $0x1e0] sm:$0xff] %v1153_v62 }
 0x197   :  { %v798_v63 = vpop.f32.mrf.mxu2 }
 0x198   :  { %v887_v0 = vpop.f32.mrf.mxu3  ;;  %v622_v1 = vpop.f32.mrf.mxu0 }
 0x199   :  { %v888_v2 = vadd.f32 %v887_v0, %v798_v63  ;;  %v711_v3 = vpop.f32.mrf.mxu1 }
 0x19a   :  { %v712_v4 = vadd.f32 %v711_v3, %v622_v1 }
 0x19b   :  { %v1154_v5 = vadd.f32 %v1876_v29, %v888_v2 }
 0x19c   :  { %v1155_v6 = vadd.f32 %v1870_v23, %v712_v4 }
 0x19d   :  { %1218 = vst [vmem:[%s2217_s3 + $0x1e8] sm:$0xff] %v1154_v5 }
 0x19e   :  { %1219 = vst [vmem:[%s2217_s3 + $0x1f0] sm:$0xff] %v1155_v6 }
 0x19f   :  { %v800_v7 = vpop.f32.mrf.mxu2 }
 0x1a0   :  { %v889_v8 = vpop.f32.mrf.mxu3 }
 0x1a1   :  { %v890_v9 = vadd.f32 %v889_v8, %v800_v7 }
 0x1a3   :  { %v1156_v10 = vadd.f32 %v1876_v29, %v890_v9 }
 0x1a5   :  { %1220 = vst [vmem:[%s2217_s3 + $0x1f8] sm:$0xff] %v1156_v10 }

// kernel: simple_gcn_forward.4
= control target key start
LH: loop header
LB: loop body
LE: loop exit
PB: predicated region body
PF: predicated region fallthrough
CT: control target
= control target key end

     0   :  { %s2310_s1 = inlined_call_operand.vmem [shape: bf16[256,256], index: 1, kind: input, shape index: {}]   ;;  %s2311_s0 = inlined_call_operand.vmem [shape: bf16[256,256], index: 0, kind: input, shape index: {}]   ;;  %s2312_s2 = inlined_call_operand.vmem [shape: f32[1,256], index: 2, kind: input, shape index: {}]   ;;  %s2313_s3 = inlined_call_operand.vmem [shape: bf16[256,256], index: 3, kind: output, shape index: {}]  }
   0x1   :  { %v1605_v0 = vld [vmem:[%s2310_s1 + $0x70] sm:$0xf]  ;;  %v1690_v1 = vld [vmem:[%s2310_s1 + $0x74] sm:$0xf0]  ;;  %v1689_v5 = vld [vmem:[%s2310_s1 + $0x74] sm:$0xf] }
   0x2   :  { %v1669_v2 = vld [vmem:[%s2310_s1 + $0xf0] sm:$0xf]  ;;  %v1606_v3 = vor.u32 %v1690_v1, %v1605_v0  ;;  %v1706_v4 = vld [vmem:[%s2310_s1 + $0xf4] sm:$0xf0]  ;;  %v1607_v6 = vld [vmem:[%s2310_s1 + $0x78] sm:$0xf0] }
   0x3   :  { %v1670_v7 = vor.u32 %v1706_v4, %v1669_v2  ;;  %v1610_v8 = vor.u32 %v1689_v5, %v1607_v6  ;;  %v1705_v9 = vld [vmem:[%s2310_s1 + $0xf4] sm:$0xf]  ;;  %v1671_v10 = vld [vmem:[%s2310_s1 + $0xf8] sm:$0xf0]  ;;  %v1597_v11 = vld [vmem:[%s2310_s1 + $0x60] sm:$0xf] }
   0x4   :  { %536 = vmatpush.bf16.msra.mxu0 %v1606_v3  ;;  %v1674_v12 = vor.u32 %v1705_v9, %v1671_v10  ;;  %v1688_v13 = vld [vmem:[%s2310_s1 + $0x64] sm:$0xf0]  ;;  %v1661_v14 = vld [vmem:[%s2310_s1 + $0xe0] sm:$0xf]  ;;  %v1687_v18 = vld [vmem:[%s2310_s1 + $0x64] sm:$0xf] }
   0x5   :  { %v1704_v15 = vld [vmem:[%s2310_s1 + $0xe4] sm:$0xf0]  ;;  %625 = vmatpush.bf16.msra.mxu1 %v1670_v7  ;;  %714 = vmatpush.bf16.msra.mxu2 %v1610_v8  ;;  %v1598_v16 = vor.u32 %v1688_v13, %v1597_v11  ;;  %v1599_v19 = vld [vmem:[%s2310_s1 + $0x68] sm:$0xf0]  ;;  %v1703_v20 = vld [vmem:[%s2310_s1 + $0xe4] sm:$0xf] }
   0x6   :  { %v1662_v17 = vor.u32 %v1704_v15, %v1661_v14  ;;  %803 = vmatpush.bf16.msra.mxu3 %v1674_v12  ;;  %v1602_v21 = vor.u32 %v1687_v18, %v1599_v19  ;;  %v1663_v22 = vld [vmem:[%s2310_s1 + $0xe8] sm:$0xf0]  ;;  %v1589_v23 = vld [vmem:[%s2310_s1 + $0x50] sm:$0xf]  ;;  %v1686_v24 = vld [vmem:[%s2310_s1 + $0x54] sm:$0xf0] }
   0x7   :  { %v1666_v25 = vor.u32 %v1703_v20, %v1663_v22  ;;  %v1653_v26 = vld [vmem:[%s2310_s1 + $0xd0] sm:$0xf]  ;;  %v1702_v27 = vld [vmem:[%s2310_s1 + $0xd4] sm:$0xf0]  ;;  %v1685_v28 = vld [vmem:[%s2310_s1 + $0x54] sm:$0xf]  ;;  %v1590_v29 = vor.u32 %v1686_v24, %v1589_v23 }
   0x8   :  { %537 = vmatpush.bf16.msra.mxu0 %v1598_v16  ;;  %v1591_v30 = vld [vmem:[%s2310_s1 + $0x58] sm:$0xf0]  ;;  %v1701_v31 = vld [vmem:[%s2310_s1 + $0xd4] sm:$0xf]  ;;  %v1654_v33 = vor.u32 %v1702_v27, %v1653_v26  ;;  %v1581_v35 = vld [vmem:[%s2310_s1 + $0x40] sm:$0xf] }
   0x9   :  { %v1655_v32 = vld [vmem:[%s2310_s1 + $0xd8] sm:$0xf0]  ;;  %626 = vmatpush.bf16.msra.mxu1 %v1662_v17  ;;  %715 = vmatpush.bf16.msra.mxu2 %v1602_v21  ;;  %v1594_v34 = vor.u32 %v1685_v28, %v1591_v30  ;;  %v1684_v36 = vld [vmem:[%s2310_s1 + $0x44] sm:$0xf0]  ;;  %v1645_v37 = vld [vmem:[%s2310_s1 + $0xc0] sm:$0xf] }
   0xa   :  { %804 = vmatpush.bf16.msra.mxu3 %v1666_v25  ;;  %v1658_v38 = vor.u32 %v1701_v31, %v1655_v32  ;;  %v1700_v39 = vld [vmem:[%s2310_s1 + $0xc4] sm:$0xf0]  ;;  %v1683_v40 = vld [vmem:[%s2310_s1 + $0x44] sm:$0xf]  ;;  %v1583_v41 = vld [vmem:[%s2310_s1 + $0x48] sm:$0xf0]  ;;  %v1582_v44 = vor.u32 %v1684_v36, %v1581_v35 }
   0xb   :  { %v1699_v42 = vld [vmem:[%s2310_s1 + $0xc4] sm:$0xf]  ;;  %v1647_v43 = vld [vmem:[%s2310_s1 + $0xc8] sm:$0xf0]  ;;  %v1646_v45 = vor.u32 %v1700_v39, %v1645_v37  ;;  %v1586_v46 = vor.u32 %v1683_v40, %v1583_v41  ;;  %v1573_v47 = vld [vmem:[%s2310_s1 + $0x30] sm:$0xf] }
   0xc   :  { %538 = vmatpush.bf16.msra.mxu0 %v1590_v29  ;;  %v1682_v48 = vld [vmem:[%s2310_s1 + $0x34] sm:$0xf0]  ;;  %v1637_v49 = vld [vmem:[%s2310_s1 + $0xb0] sm:$0xf]  ;;  %v1650_v50 = vor.u32 %v1699_v42, %v1647_v43  ;;  %v1681_v52 = vld [vmem:[%s2310_s1 + $0x34] sm:$0xf] }
   0xd   :  { %627 = vmatpush.bf16.msra.mxu1 %v1654_v33  ;;  %716 = vmatpush.bf16.msra.mxu2 %v1594_v34  ;;  %v1698_v51 = vld [vmem:[%s2310_s1 + $0xb4] sm:$0xf0]  ;;  %v1575_v53 = vld [vmem:[%s2310_s1 + $0x38] sm:$0xf0]  ;;  %v1697_v54 = vld [vmem:[%s2310_s1 + $0xb4] sm:$0xf]  ;;  %v1574_v56 = vor.u32 %v1682_v48, %v1573_v47 }
   0xe   :  { %805 = vmatpush.bf16.msra.mxu3 %v1658_v38  ;;  %v1639_v55 = vld [vmem:[%s2310_s1 + $0xb8] sm:$0xf0]  ;;  %v1638_v57 = vor.u32 %v1698_v51, %v1637_v49  ;;  %v1578_v58 = vor.u32 %v1681_v52, %v1575_v53  ;;  %v1565_v59 = vld [vmem:[%s2310_s1 + $0x20] sm:$0xf]  ;;  %v1680_v60 = vld [vmem:[%s2310_s1 + $0x24] sm:$0xf0] }
   0xf   :  { %v1629_v61 = vld [vmem:[%s2310_s1 + $0xa0] sm:$0xf]  ;;  %v1642_v62 = vor.u32 %v1697_v54, %v1639_v55  ;;  %v1696_v63 = vld [vmem:[%s2310_s1 + $0xa4] sm:$0xf0]  ;;  %v1679_v0 = vld [vmem:[%s2310_s1 + $0x24] sm:$0xf]  ;;  %v1566_v4 = vor.u32 %v1680_v60, %v1565_v59 }
  0x10   :  { %539 = vmatpush.bf16.msra.mxu0 %v1582_v44  ;;  %v1567_v1 = vld [vmem:[%s2310_s1 + $0x28] sm:$0xf0]  ;;  %v1695_v2 = vld [vmem:[%s2310_s1 + $0xa4] sm:$0xf]  ;;  %v1630_v5 = vor.u32 %v1696_v63, %v1629_v61  ;;  %v1557_v7 = vld [vmem:[%s2310_s1 + $0x10] sm:$0xf] }
  0x11   :  { %628 = vmatpush.bf16.msra.mxu1 %v1646_v45  ;;  %717 = vmatpush.bf16.msra.mxu2 %v1586_v46  ;;  %v1631_v3 = vld [vmem:[%s2310_s1 + $0xa8] sm:$0xf0]  ;;  %v1570_v6 = vor.u32 %v1679_v0, %v1567_v1  ;;  %v1678_v8 = vld [vmem:[%s2310_s1 + $0x14] sm:$0xf0]  ;;  %v1621_v9 = vld [vmem:[%s2310_s1 + $0x90] sm:$0xf] }
  0x12   :  { %806 = vmatpush.bf16.msra.mxu3 %v1650_v50  ;;  %v1634_v10 = vor.u32 %v1695_v2, %v1631_v3  ;;  %v1694_v11 = vld [vmem:[%s2310_s1 + $0x94] sm:$0xf0]  ;;  %v1677_v12 = vld [vmem:[%s2310_s1 + $0x14] sm:$0xf]  ;;  %v1559_v13 = vld [vmem:[%s2310_s1 + $0x18] sm:$0xf0]  ;;  %v1558_v16 = vor.u32 %v1678_v8, %v1557_v7 }
  0x13   :  { %v1693_v14 = vld [vmem:[%s2310_s1 + $0x94] sm:$0xf]  ;;  %v1623_v15 = vld [vmem:[%s2310_s1 + $0x98] sm:$0xf0]  ;;  %v1622_v17 = vor.u32 %v1694_v11, %v1621_v9  ;;  %v1562_v18 = vor.u32 %v1677_v12, %v1559_v13  ;;  %v1549_v19 = vld [vmem:[%s2310_s1] sm:$0xf] }
  0x14   :  { %540 = vmatpush.bf16.msra.mxu0 %v1574_v56  ;;  %v1676_v20 = vld [vmem:[%s2310_s1 + $0x4] sm:$0xf0]  ;;  %v1613_v21 = vld [vmem:[%s2310_s1 + $0x80] sm:$0xf]  ;;  %v1626_v22 = vor.u32 %v1693_v14, %v1623_v15  ;;  %v1675_v24 = vld [vmem:[%s2310_s1 + $0x4] sm:$0xf] }
  0x15   :  { %629 = vmatpush.bf16.msra.mxu1 %v1638_v57  ;;  %718 = vmatpush.bf16.msra.mxu2 %v1578_v58  ;;  %v1692_v23 = vld [vmem:[%s2310_s1 + $0x84] sm:$0xf0]  ;;  %v1551_v25 = vld [vmem:[%s2310_s1 + $0x8] sm:$0xf0]  ;;  %v1691_v26 = vld [vmem:[%s2310_s1 + $0x84] sm:$0xf]  ;;  %v1550_v28 = vor.u32 %v1676_v20, %v1549_v19 }
  0x16   :  { %807 = vmatpush.bf16.msra.mxu3 %v1642_v62  ;;  %v1615_v27 = vld [vmem:[%s2310_s1 + $0x88] sm:$0xf0]  ;;  %v1421_v29 = vld [vmem:[%s2311_s0] sm:$0xf]  ;;  %v1708_v30 = vld [vmem:[%s2311_s0 + $0x4] sm:$0xf0]  ;;  %v1614_v31 = vor.u32 %v1692_v23, %v1613_v21  ;;  %v1554_v32 = vor.u32 %v1675_v24, %v1551_v25 }
  0x17   :  { %v1707_v33 = vld [vmem:[%s2311_s0 + $0x4] sm:$0xf]  ;;  %v1423_v34 = vld [vmem:[%s2311_s0 + $0x8] sm:$0xf0]  ;;  %v1618_v35 = vor.u32 %v1691_v26, %v1615_v27  ;;  %v1422_v36 = vor.u32 %v1708_v30, %v1421_v29  ;;  %v1429_v38 = vld [vmem:[%s2311_s0 + $0x10] sm:$0xf] }
  0x18   :  { %541 = vmatpush.bf16.msra.mxu0 %v1566_v4  ;;  %v1426_v37 = vor.u32 %v1707_v33, %v1423_v34  ;;  %v1710_v39 = vld [vmem:[%s2311_s0 + $0x14] sm:$0xf0]  ;;  %v1709_v40 = vld [vmem:[%s2311_s0 + $0x14] sm:$0xf]  ;;  %v1431_v41 = vld [vmem:[%s2311_s0 + $0x18] sm:$0xf0] }
  0x19   :  { %630 = vmatpush.bf16.msra.mxu1 %v1630_v5  ;;  %719 = vmatpush.bf16.msra.mxu2 %v1570_v6  ;;  %v1430_v42 = vor.u32 %v1710_v39, %v1429_v38  ;;  %v1434_v43 = vor.u32 %v1709_v40, %v1431_v41  ;;  %v1437_v44 = vld [vmem:[%s2311_s0 + $0x20] sm:$0xf]  ;;  %v1712_v45 = vld [vmem:[%s2311_s0 + $0x24] sm:$0xf0]  ;;  %v1711_v46 = vld [vmem:[%s2311_s0 + $0x24] sm:$0xf] }
  0x1a   :  { %808 = vmatpush.bf16.msra.mxu3 %v1634_v10  ;;  %v1439_v47 = vld [vmem:[%s2311_s0 + $0x28] sm:$0xf0]  ;;  %v1438_v48 = vor.u32 %v1712_v45, %v1437_v44  ;;  %v1445_v50 = vld [vmem:[%s2311_s0 + $0x30] sm:$0xf]  ;;  %v1714_v51 = vld [vmem:[%s2311_s0 + $0x34] sm:$0xf0] }
  0x1b   :  { %v1442_v49 = vor.u32 %v1711_v46, %v1439_v47  ;;  %v1713_v52 = vld [vmem:[%s2311_s0 + $0x34] sm:$0xf]  ;;  %v1447_v53 = vld [vmem:[%s2311_s0 + $0x38] sm:$0xf0]  ;;  %v1446_v54 = vor.u32 %v1714_v51, %v1445_v50  ;;  %v1453_v56 = vld [vmem:[%s2311_s0 + $0x40] sm:$0xf] }
  0x1c   :  { %542 = vmatpush.bf16.msra.mxu0 %v1558_v16  ;;  %v1450_v55 = vor.u32 %v1713_v52, %v1447_v53  ;;  %v1716_v57 = vld [vmem:[%s2311_s0 + $0x44] sm:$0xf0]  ;;  %v1715_v58 = vld [vmem:[%s2311_s0 + $0x44] sm:$0xf]  ;;  %v1455_v59 = vld [vmem:[%s2311_s0 + $0x48] sm:$0xf0] }
  0x1d   :  { %631 = vmatpush.bf16.msra.mxu1 %v1622_v17  ;;  %720 = vmatpush.bf16.msra.mxu2 %v1562_v18  ;;  %v1454_v60 = vor.u32 %v1716_v57, %v1453_v56  ;;  %v1458_v61 = vor.u32 %v1715_v58, %v1455_v59  ;;  %v1461_v62 = vld [vmem:[%s2311_s0 + $0x50] sm:$0xf]  ;;  %v1718_v63 = vld [vmem:[%s2311_s0 + $0x54] sm:$0xf0]  ;;  %v1717_v0 = vld [vmem:[%s2311_s0 + $0x54] sm:$0xf] }
  0x1e   :  { %809 = vmatpush.bf16.msra.mxu3 %v1626_v22  ;;  %v1463_v1 = vld [vmem:[%s2311_s0 + $0x58] sm:$0xf0]  ;;  %v1462_v2 = vor.u32 %v1718_v63, %v1461_v62  ;;  %v1469_v4 = vld [vmem:[%s2311_s0 + $0x60] sm:$0xf]  ;;  %v1720_v5 = vld [vmem:[%s2311_s0 + $0x64] sm:$0xf0] }
  0x1f   :  { %v1466_v3 = vor.u32 %v1717_v0, %v1463_v1  ;;  %v1719_v6 = vld [vmem:[%s2311_s0 + $0x64] sm:$0xf]  ;;  %v1471_v7 = vld [vmem:[%s2311_s0 + $0x68] sm:$0xf0]  ;;  %v1470_v8 = vor.u32 %v1720_v5, %v1469_v4  ;;  %v1477_v10 = vld [vmem:[%s2311_s0 + $0x70] sm:$0xf] }
  0x20   :  { %543 = vmatpush.bf16.msra.mxu0 %v1550_v28  ;;  %v1474_v9 = vor.u32 %v1719_v6, %v1471_v7  ;;  %v1722_v11 = vld [vmem:[%s2311_s0 + $0x74] sm:$0xf0]  ;;  %v1721_v12 = vld [vmem:[%s2311_s0 + $0x74] sm:$0xf]  ;;  %v1479_v13 = vld [vmem:[%s2311_s0 + $0x78] sm:$0xf0] }
  0x21   :  { %632 = vmatpush.bf16.msra.mxu1 %v1614_v31  ;;  %721 = vmatpush.bf16.msra.mxu2 %v1554_v32  ;;  %v1478_v14 = vor.u32 %v1722_v11, %v1477_v10  ;;  %v1482_v15 = vor.u32 %v1721_v12, %v1479_v13  ;;  %v1485_v16 = vld [vmem:[%s2311_s0 + $0x80] sm:$0xf]  ;;  %v1724_v17 = vld [vmem:[%s2311_s0 + $0x84] sm:$0xf0]  ;;  %v1723_v18 = vld [vmem:[%s2311_s0 + $0x84] sm:$0xf] }
  0x22   :  { %810 = vmatpush.bf16.msra.mxu3 %v1618_v35  ;;  %v1487_v19 = vld [vmem:[%s2311_s0 + $0x88] sm:$0xf0]  ;;  %v1486_v20 = vor.u32 %v1724_v17, %v1485_v16  ;;  %v1087_v22 = vld [vmem:[%s2312_s2] sm:$0x3]  ;;  %v1726_v38 = vld [vmem:[%s2311_s0 + $0x94] sm:$0xf0] }
  0x23   :  { %544 = vmatmul.bf16.vlgmr.msra.gmra.mxu0 %v1422_v36  ;;  %v1490_v23 = vor.u32 %v1723_v18, %v1487_v19  ;;  %v2062_v26 = vperm.slane %v1087_v22, 0  ;;  %v2065_v29 = vperm.slane %v1087_v22, 1  ;;  %v1725_v39 = vld [vmem:[%s2311_s0 + $0x94] sm:$0xf]  ;;  %v1495_v41 = vld [vmem:[%s2311_s0 + $0x98] sm:$0xf0] }
  0x24   :  { %633 = vmatmul.bf16.vlgmr.msra.gmra.mxu1 %v1426_v37  ;;  %722 = vmatmul.bf16.vlgmr.msra.gmra.mxu2 %v1422_v36  ;;  %v1498_v50 = vor.u32 %v1725_v39, %v1495_v41  ;;  %v1501_v5 = vld [vmem:[%s2311_s0 + $0xa0] sm:$0xf]  ;;  %v1728_v6 = vld [vmem:[%s2311_s0 + $0xa4] sm:$0xf0]  ;;  %v1727_v7 = vld [vmem:[%s2311_s0 + $0xa4] sm:$0xf] }
  0x25   :  { %811 = vmatmul.bf16.vlgmr.msra.gmra.mxu3 %v1426_v37  ;;  %v1493_v37 = vld [vmem:[%s2311_s0 + $0x90] sm:$0xf]  ;;  %v1729_v41 = vld [vmem:[%s2311_s0 + $0xb4] sm:$0xf] }
  0x26   :  { %v1494_v46 = vor.u32 %v1726_v38, %v1493_v37  ;;  %v1509_v39 = vld [vmem:[%s2311_s0 + $0xb0] sm:$0xf] }
  0x33   :  { %549 = vmatmul.bf16.gmra.mxu0 %v1430_v42 }
  0x34   :  { %638 = vmatmul.bf16.gmra.mxu1 %v1434_v43  ;;  %727 = vmatmul.bf16.gmra.mxu2 %v1430_v42 }
  0x35   :  { %816 = vmatmul.bf16.gmra.mxu3 %v1434_v43 }
  0x43   :  { %554 = vmatmul.bf16.gmra.mxu0 %v1438_v48 }
  0x44   :  { %643 = vmatmul.bf16.gmra.mxu1 %v1442_v49  ;;  %732 = vmatmul.bf16.gmra.mxu2 %v1438_v48 }
  0x45   :  { %821 = vmatmul.bf16.gmra.mxu3 %v1442_v49 }
  0x53   :  { %559 = vmatmul.bf16.gmra.mxu0 %v1446_v54 }
  0x54   :  { %648 = vmatmul.bf16.gmra.mxu1 %v1450_v55  ;;  %737 = vmatmul.bf16.gmra.mxu2 %v1446_v54 }
  0x55   :  { %826 = vmatmul.bf16.gmra.mxu3 %v1450_v55 }
  0x63   :  { %564 = vmatmul.bf16.gmra.mxu0 %v1454_v60 }
  0x64   :  { %653 = vmatmul.bf16.gmra.mxu1 %v1458_v61  ;;  %742 = vmatmul.bf16.gmra.mxu2 %v1454_v60 }
  0x65   :  { %831 = vmatmul.bf16.gmra.mxu3 %v1458_v61 }
  0x73   :  { %569 = vmatmul.bf16.gmra.mxu0 %v1462_v2 }
  0x74   :  { %658 = vmatmul.bf16.gmra.mxu1 %v1466_v3  ;;  %747 = vmatmul.bf16.gmra.mxu2 %v1462_v2 }
  0x75   :  { %836 = vmatmul.bf16.gmra.mxu3 %v1466_v3 }
  0x83   :  { %574 = vmatmul.bf16.gmra.mxu0 %v1470_v8 }
  0x84   :  { %663 = vmatmul.bf16.gmra.mxu1 %v1474_v9  ;;  %752 = vmatmul.bf16.gmra.mxu2 %v1470_v8 }
  0x85   :  { %841 = vmatmul.bf16.gmra.mxu3 %v1474_v9  ;;  %v1503_v9 = vld [vmem:[%s2311_s0 + $0xa8] sm:$0xf0] }
  0x86   :  { %v1506_v18 = vor.u32 %v1727_v7, %v1503_v9  ;;  %v1517_v7 = vld [vmem:[%s2311_s0 + $0xc0] sm:$0xf]  ;;  %v1731_v9 = vld [vmem:[%s2311_s0 + $0xc4] sm:$0xf] }
  0x93   :  { %579 = vmatmul.bf16.gmra.mxu0 %v1478_v14 }
  0x94   :  { %668 = vmatmul.bf16.gmra.mxu1 %v1482_v15  ;;  %757 = vmatmul.bf16.gmra.mxu2 %v1478_v14  ;;  %v1502_v14 = vor.u32 %v1728_v6, %v1501_v5 }
  0x95   :  { %846 = vmatmul.bf16.gmra.mxu3 %v1482_v15 }
  0xa0   :  { %v545_v21 = vpop.f32.mrf.mxu0 }
  0xa1   :  { %v634_v24 = vpop.f32.mrf.mxu1 }
  0xa2   :  { %v635_v25 = vadd.f32 %v634_v24, %v545_v21 }
  0xa3   :  { %584 = vmatmul.bf16.gmra.mxu0 %v1486_v20 }
  0xa4   :  { %673 = vmatmul.bf16.gmra.mxu1 %v1490_v23  ;;  %762 = vmatmul.bf16.gmra.mxu2 %v1486_v20  ;;  %v1093_v27 = vadd.f32 %v2062_v26, %v635_v25 }
  0xa5   :  { %851 = vmatmul.bf16.gmra.mxu3 %v1490_v23 }
  0xa6   :  { %v1221_v34 = vmul.f32 0.01, %v1093_v27  ;;  %vm1157_vm0 = vcmp.gt.f32.partialorder %v1093_v27, 0.0 }
  0xa7   :  { %v723_v28 = vpop.f32.mrf.mxu2 }
  0xa8   :  { %v812_v30 = vpop.f32.mrf.mxu3  ;;  %v547_v31 = vpop.f32.mrf.mxu0  ;;  %v1285_v42 = vsel %vm1157_vm0, %v1093_v27, %v1221_v34 }
  0xa9   :  { %v813_v32 = vadd.f32 %v812_v30, %v723_v28  ;;  %v636_v33 = vpop.f32.mrf.mxu1 }
  0xaa   :  { %v637_v36 = vadd.f32 %v636_v33, %v547_v31 }
  0xab   :  { %v1094_v35 = vadd.f32 %v2065_v29, %v813_v32 }
  0xac   :  { %v1095_v44 = vadd.f32 %v2062_v26, %v637_v36 }
  0xad   :  { %vm1158_vm1 = vcmp.gt.f32.partialorder %v1094_v35, 0.0  ;;  %v1222_v40 = vmul.f32 0.01, %v1094_v35 }
  0xae   :  { %v1223_v53 = vmul.f32 0.01, %v1095_v44  ;;  %vm1159_vm2 = vcmp.gt.f32.partialorder %v1095_v44, 0.0 }
  0xaf   :  { %v1286_v43 = vsel %vm1158_vm1, %v1094_v35, %v1222_v40  ;;  %v725_v45 = vpop.f32.mrf.mxu2  ;;  %v1730_v40 = vld [vmem:[%s2311_s0 + $0xb4] sm:$0xf0] }
  0xb0   :  { %v1349_v47 = vpack.c.bf16 %v1286_v43, %v1285_v42  ;;  %v814_v48 = vpop.f32.mrf.mxu3  ;;  %v550_v49 = vpop.f32.mrf.mxu0  ;;  %v1287_v57 = vsel %vm1159_vm2, %v1095_v44, %v1223_v53  ;;  %v1511_v43 = vld [vmem:[%s2311_s0 + $0xb8] sm:$0xf0] }
  0xb1   :  { %v815_v51 = vadd.f32 %v814_v48, %v725_v45  ;;  %v639_v52 = vpop.f32.mrf.mxu1  ;;  %v1510_v48 = vor.u32 %v1730_v40, %v1509_v39 }
  0xb2   :  { %1381 = vst [vmem:[%s2313_s3] sm:$0xff] %v1349_v47  ;;  %v640_v55 = vadd.f32 %v639_v52, %v550_v49  ;;  %v1514_v52 = vor.u32 %v1729_v41, %v1511_v43  ;;  %v1525_v41 = vld [vmem:[%s2311_s0 + $0xd0] sm:$0xf]  ;;  %v1733_v43 = vld [vmem:[%s2311_s0 + $0xd4] sm:$0xf] }
  0xb3   :  { %v1096_v54 = vadd.f32 %v2065_v29, %v815_v51  ;;  %589 = vmatmul.bf16.gmra.mxu0 %v1494_v46 }
  0xb4   :  { %678 = vmatmul.bf16.gmra.mxu1 %v1498_v50  ;;  %767 = vmatmul.bf16.gmra.mxu2 %v1494_v46  ;;  %v1097_v59 = vadd.f32 %v2062_v26, %v640_v55 }
  0xb5   :  { %vm1160_vm3 = vcmp.gt.f32.partialorder %v1096_v54, 0.0  ;;  %v1224_v56 = vmul.f32 0.01, %v1096_v54  ;;  %856 = vmatmul.bf16.gmra.mxu3 %v1498_v50 }
  0xb6   :  { %v1225_v2 = vmul.f32 0.01, %v1097_v59  ;;  %vm1161_vm4 = vcmp.gt.f32.partialorder %v1097_v59, 0.0 }
  0xb7   :  { %v1288_v58 = vsel %vm1160_vm3, %v1096_v54, %v1224_v56  ;;  %v728_v60 = vpop.f32.mrf.mxu2 }
  0xb8   :  { %v1350_v61 = vpack.c.bf16 %v1288_v58, %v1287_v57  ;;  %v817_v62 = vpop.f32.mrf.mxu3  ;;  %v552_v63 = vpop.f32.mrf.mxu0  ;;  %v1289_v10 = vsel %vm1161_vm4, %v1097_v59, %v1225_v2 }
  0xb9   :  { %v818_v0 = vadd.f32 %v817_v62, %v728_v60  ;;  %v641_v1 = vpop.f32.mrf.mxu1 }
  0xba   :  { %1382 = vst [vmem:[%s2313_s3 + $0x8] sm:$0xff] %v1350_v61  ;;  %v642_v4 = vadd.f32 %v641_v1, %v552_v63 }
  0xbb   :  { %v1098_v3 = vadd.f32 %v2065_v29, %v818_v0 }
  0xbc   :  { %v1099_v12 = vadd.f32 %v2062_v26, %v642_v4 }
  0xbd   :  { %vm1162_vm5 = vcmp.gt.f32.partialorder %v1098_v3, 0.0  ;;  %v1226_v8 = vmul.f32 0.01, %v1098_v3 }
  0xbe   :  { %v1227_v21 = vmul.f32 0.01, %v1099_v12  ;;  %vm1163_vm6 = vcmp.gt.f32.partialorder %v1099_v12, 0.0 }
  0xbf   :  { %v1290_v11 = vsel %vm1162_vm5, %v1098_v3, %v1226_v8  ;;  %v730_v13 = vpop.f32.mrf.mxu2  ;;  %v1732_v8 = vld [vmem:[%s2311_s0 + $0xc4] sm:$0xf0] }
  0xc0   :  { %v1351_v15 = vpack.c.bf16 %v1290_v11, %v1289_v10  ;;  %v819_v16 = vpop.f32.mrf.mxu3  ;;  %v555_v17 = vpop.f32.mrf.mxu0  ;;  %v1291_v25 = vsel %vm1163_vm6, %v1099_v12, %v1227_v21  ;;  %v1519_v11 = vld [vmem:[%s2311_s0 + $0xc8] sm:$0xf0] }
  0xc1   :  { %v820_v19 = vadd.f32 %v819_v16, %v730_v13  ;;  %v644_v20 = vpop.f32.mrf.mxu1  ;;  %v1518_v16 = vor.u32 %v1732_v8, %v1517_v7 }
  0xc2   :  { %1383 = vst [vmem:[%s2313_s3 + $0x10] sm:$0xff] %v1351_v15  ;;  %v645_v23 = vadd.f32 %v644_v20, %v555_v17  ;;  %v1522_v20 = vor.u32 %v1731_v9, %v1519_v11  ;;  %v1533_v9 = vld [vmem:[%s2311_s0 + $0xe0] sm:$0xf]  ;;  %v1735_v11 = vld [vmem:[%s2311_s0 + $0xe4] sm:$0xf] }
  0xc3   :  { %v1100_v22 = vadd.f32 %v2065_v29, %v820_v19  ;;  %594 = vmatmul.bf16.gmra.mxu0 %v1502_v14 }
  0xc4   :  { %683 = vmatmul.bf16.gmra.mxu1 %v1506_v18  ;;  %772 = vmatmul.bf16.gmra.mxu2 %v1502_v14  ;;  %v1101_v28 = vadd.f32 %v2062_v26, %v645_v23 }
  0xc5   :  { %vm1164_vm7 = vcmp.gt.f32.partialorder %v1100_v22, 0.0  ;;  %v1228_v24 = vmul.f32 0.01, %v1100_v22  ;;  %861 = vmatmul.bf16.gmra.mxu3 %v1506_v18 }
  0xc6   :  { %v1229_v36 = vmul.f32 0.01, %v1101_v28  ;;  %vm1165_vm8 = vcmp.gt.f32.partialorder %v1101_v28, 0.0 }
  0xc7   :  { %v1292_v27 = vsel %vm1164_vm7, %v1100_v22, %v1228_v24  ;;  %v733_v30 = vpop.f32.mrf.mxu2 }
  0xc8   :  { %v1352_v31 = vpack.c.bf16 %v1292_v27, %v1291_v25  ;;  %v822_v32 = vpop.f32.mrf.mxu3  ;;  %v557_v33 = vpop.f32.mrf.mxu0  ;;  %v1293_v44 = vsel %vm1165_vm8, %v1101_v28, %v1229_v36 }
  0xc9   :  { %v823_v34 = vadd.f32 %v822_v32, %v733_v30  ;;  %v646_v35 = vpop.f32.mrf.mxu1 }
  0xca   :  { %1384 = vst [vmem:[%s2313_s3 + $0x18] sm:$0xff] %v1352_v31  ;;  %v647_v38 = vadd.f32 %v646_v35, %v557_v33 }
  0xcb   :  { %v1102_v37 = vadd.f32 %v2065_v29, %v823_v34 }
  0xcc   :  { %v1103_v46 = vadd.f32 %v2062_v26, %v647_v38 }
  0xcd   :  { %vm1166_vm9 = vcmp.gt.f32.partialorder %v1102_v37, 0.0  ;;  %v1230_v42 = vmul.f32 0.01, %v1102_v37 }
  0xce   :  { %v1231_v55 = vmul.f32 0.01, %v1103_v46  ;;  %vm1167_vm10 = vcmp.gt.f32.partialorder %v1103_v46, 0.0 }
  0xcf   :  { %v1294_v45 = vsel %vm1166_vm9, %v1102_v37, %v1230_v42  ;;  %v735_v47 = vpop.f32.mrf.mxu2  ;;  %v1734_v42 = vld [vmem:[%s2311_s0 + $0xd4] sm:$0xf0] }
  0xd0   :  { %v1353_v49 = vpack.c.bf16 %v1294_v45, %v1293_v44  ;;  %v824_v50 = vpop.f32.mrf.mxu3  ;;  %v560_v51 = vpop.f32.mrf.mxu0  ;;  %v1295_v59 = vsel %vm1167_vm10, %v1103_v46, %v1231_v55  ;;  %v1527_v45 = vld [vmem:[%s2311_s0 + $0xd8] sm:$0xf0] }
  0xd1   :  { %v825_v53 = vadd.f32 %v824_v50, %v735_v47  ;;  %v649_v54 = vpop.f32.mrf.mxu1  ;;  %v1526_v50 = vor.u32 %v1734_v42, %v1525_v41 }
  0xd2   :  { %1385 = vst [vmem:[%s2313_s3 + $0x20] sm:$0xff] %v1353_v49  ;;  %v650_v57 = vadd.f32 %v649_v54, %v560_v51  ;;  %v1530_v54 = vor.u32 %v1733_v43, %v1527_v45  ;;  %v1541_v43 = vld [vmem:[%s2311_s0 + $0xf0] sm:$0xf]  ;;  %v1737_v45 = vld [vmem:[%s2311_s0 + $0xf4] sm:$0xf] }
  0xd3   :  { %v1104_v56 = vadd.f32 %v2065_v29, %v825_v53  ;;  %599 = vmatmul.bf16.gmra.mxu0 %v1510_v48 }
  0xd4   :  { %688 = vmatmul.bf16.gmra.mxu1 %v1514_v52  ;;  %777 = vmatmul.bf16.gmra.mxu2 %v1510_v48  ;;  %v1105_v61 = vadd.f32 %v2062_v26, %v650_v57 }
  0xd5   :  { %vm1168_vm11 = vcmp.gt.f32.partialorder %v1104_v56, 0.0  ;;  %v1232_v58 = vmul.f32 0.01, %v1104_v56  ;;  %866 = vmatmul.bf16.gmra.mxu3 %v1514_v52 }
  0xd6   :  { %v1233_v4 = vmul.f32 0.01, %v1105_v61  ;;  %vm1169_vm12 = vcmp.gt.f32.partialorder %v1105_v61, 0.0 }
  0xd7   :  { %v1296_v60 = vsel %vm1168_vm11, %v1104_v56, %v1232_v58  ;;  %v738_v62 = vpop.f32.mrf.mxu2 }
  0xd8   :  { %v1354_v63 = vpack.c.bf16 %v1296_v60, %v1295_v59  ;;  %v827_v0 = vpop.f32.mrf.mxu3  ;;  %v562_v1 = vpop.f32.mrf.mxu0  ;;  %v1297_v12 = vsel %vm1169_vm12, %v1105_v61, %v1233_v4 }
  0xd9   :  { %v828_v2 = vadd.f32 %v827_v0, %v738_v62  ;;  %v651_v3 = vpop.f32.mrf.mxu1 }
  0xda   :  { %1386 = vst [vmem:[%s2313_s3 + $0x28] sm:$0xff] %v1354_v63  ;;  %v652_v6 = vadd.f32 %v651_v3, %v562_v1 }
  0xdb   :  { %v1106_v5 = vadd.f32 %v2065_v29, %v828_v2 }
  0xdc   :  { %v1107_v14 = vadd.f32 %v2062_v26, %v652_v6 }
  0xdd   :  { %vm1170_vm13 = vcmp.gt.f32.partialorder %v1106_v5, 0.0  ;;  %v1234_v10 = vmul.f32 0.01, %v1106_v5 }
  0xde   :  { %v1235_v23 = vmul.f32 0.01, %v1107_v14  ;;  %vm1171_vm14 = vcmp.gt.f32.partialorder %v1107_v14, 0.0 }
  0xdf   :  { %v1298_v13 = vsel %vm1170_vm13, %v1106_v5, %v1234_v10  ;;  %v740_v15 = vpop.f32.mrf.mxu2  ;;  %v1736_v10 = vld [vmem:[%s2311_s0 + $0xe4] sm:$0xf0] }
  0xe0   :  { %v1355_v17 = vpack.c.bf16 %v1298_v13, %v1297_v12  ;;  %v829_v18 = vpop.f32.mrf.mxu3  ;;  %v565_v19 = vpop.f32.mrf.mxu0  ;;  %v1299_v28 = vsel %vm1171_vm14, %v1107_v14, %v1235_v23  ;;  %v1535_v13 = vld [vmem:[%s2311_s0 + $0xe8] sm:$0xf0] }
  0xe1   :  { %v830_v21 = vadd.f32 %v829_v18, %v740_v15  ;;  %v654_v22 = vpop.f32.mrf.mxu1  ;;  %v1534_v18 = vor.u32 %v1736_v10, %v1533_v9 }
  0xe2   :  { %1387 = vst [vmem:[%s2313_s3 + $0x30] sm:$0xff] %v1355_v17  ;;  %v655_v25 = vadd.f32 %v654_v22, %v565_v19  ;;  %v1538_v22 = vor.u32 %v1735_v11, %v1535_v13 }
  0xe3   :  { %v1108_v24 = vadd.f32 %v2065_v29, %v830_v21  ;;  %604 = vmatmul.bf16.gmra.mxu0 %v1518_v16 }
  0xe4   :  { %693 = vmatmul.bf16.gmra.mxu1 %v1522_v20  ;;  %782 = vmatmul.bf16.gmra.mxu2 %v1518_v16  ;;  %v1109_v31 = vadd.f32 %v2062_v26, %v655_v25 }
  0xe5   :  { %vm1172_vm15 = vcmp.gt.f32.partialorder %v1108_v24, 0.0  ;;  %v1236_v27 = vmul.f32 0.01, %v1108_v24  ;;  %871 = vmatmul.bf16.gmra.mxu3 %v1522_v20 }
  0xe6   :  { %v1237_v38 = vmul.f32 0.01, %v1109_v31  ;;  %vm1173_vm0 = vcmp.gt.f32.partialorder %v1109_v31, 0.0 }
  0xe7   :  { %v1300_v30 = vsel %vm1172_vm15, %v1108_v24, %v1236_v27  ;;  %v743_v32 = vpop.f32.mrf.mxu2 }
  0xe8   :  { %v1356_v33 = vpack.c.bf16 %v1300_v30, %v1299_v28  ;;  %v832_v34 = vpop.f32.mrf.mxu3  ;;  %v567_v35 = vpop.f32.mrf.mxu0  ;;  %v1301_v46 = vsel %vm1173_vm0, %v1109_v31, %v1237_v38 }
  0xe9   :  { %v833_v36 = vadd.f32 %v832_v34, %v743_v32  ;;  %v656_v37 = vpop.f32.mrf.mxu1 }
  0xea   :  { %1388 = vst [vmem:[%s2313_s3 + $0x38] sm:$0xff] %v1356_v33  ;;  %v657_v40 = vadd.f32 %v656_v37, %v567_v35 }
  0xeb   :  { %v1110_v39 = vadd.f32 %v2065_v29, %v833_v36 }
  0xec   :  { %v1111_v48 = vadd.f32 %v2062_v26, %v657_v40 }
  0xed   :  { %vm1174_vm1 = vcmp.gt.f32.partialorder %v1110_v39, 0.0  ;;  %v1238_v44 = vmul.f32 0.01, %v1110_v39 }
  0xee   :  { %v1239_v57 = vmul.f32 0.01, %v1111_v48  ;;  %vm1175_vm2 = vcmp.gt.f32.partialorder %v1111_v48, 0.0 }
  0xef   :  { %v1302_v47 = vsel %vm1174_vm1, %v1110_v39, %v1238_v44  ;;  %v745_v49 = vpop.f32.mrf.mxu2  ;;  %v1738_v44 = vld [vmem:[%s2311_s0 + $0xf4] sm:$0xf0] }
  0xf0   :  { %v1357_v51 = vpack.c.bf16 %v1302_v47, %v1301_v46  ;;  %v834_v52 = vpop.f32.mrf.mxu3  ;;  %v570_v53 = vpop.f32.mrf.mxu0  ;;  %v1303_v61 = vsel %vm1175_vm2, %v1111_v48, %v1239_v57  ;;  %v1543_v47 = vld [vmem:[%s2311_s0 + $0xf8] sm:$0xf0] }
  0xf1   :  { %v835_v55 = vadd.f32 %v834_v52, %v745_v49  ;;  %v659_v56 = vpop.f32.mrf.mxu1  ;;  %v1542_v52 = vor.u32 %v1738_v44, %v1541_v43 }
  0xf2   :  { %1389 = vst [vmem:[%s2313_s3 + $0x40] sm:$0xff] %v1357_v51  ;;  %v660_v59 = vadd.f32 %v659_v56, %v570_v53  ;;  %v1546_v56 = vor.u32 %v1737_v45, %v1543_v47 }
  0xf3   :  { %v1112_v58 = vadd.f32 %v2065_v29, %v835_v55  ;;  %609 = vmatmul.bf16.gmra.mxu0 %v1526_v50 }
  0xf4   :  { %698 = vmatmul.bf16.gmra.mxu1 %v1530_v54  ;;  %787 = vmatmul.bf16.gmra.mxu2 %v1526_v50  ;;  %v1113_v63 = vadd.f32 %v2062_v26, %v660_v59 }
  0xf5   :  { %vm1176_vm3 = vcmp.gt.f32.partialorder %v1112_v58, 0.0  ;;  %v1240_v60 = vmul.f32 0.01, %v1112_v58  ;;  %876 = vmatmul.bf16.gmra.mxu3 %v1530_v54 }
  0xf6   :  { %v1241_v6 = vmul.f32 0.01, %v1113_v63  ;;  %vm1177_vm4 = vcmp.gt.f32.partialorder %v1113_v63, 0.0 }
  0xf7   :  { %v1304_v62 = vsel %vm1176_vm3, %v1112_v58, %v1240_v60  ;;  %v748_v0 = vpop.f32.mrf.mxu2 }
  0xf8   :  { %v1358_v1 = vpack.c.bf16 %v1304_v62, %v1303_v61  ;;  %v837_v2 = vpop.f32.mrf.mxu3  ;;  %v572_v3 = vpop.f32.mrf.mxu0  ;;  %v1305_v14 = vsel %vm1177_vm4, %v1113_v63, %v1241_v6 }
  0xf9   :  { %v838_v4 = vadd.f32 %v837_v2, %v748_v0  ;;  %v661_v5 = vpop.f32.mrf.mxu1 }
  0xfa   :  { %1390 = vst [vmem:[%s2313_s3 + $0x48] sm:$0xff] %v1358_v1  ;;  %v662_v8 = vadd.f32 %v661_v5, %v572_v3 }
  0xfb   :  { %v1114_v7 = vadd.f32 %v2065_v29, %v838_v4 }
  0xfc   :  { %v1115_v16 = vadd.f32 %v2062_v26, %v662_v8 }
  0xfd   :  { %vm1178_vm5 = vcmp.gt.f32.partialorder %v1114_v7, 0.0  ;;  %v1242_v12 = vmul.f32 0.01, %v1114_v7 }
  0xfe   :  { %v1243_v25 = vmul.f32 0.01, %v1115_v16  ;;  %vm1179_vm6 = vcmp.gt.f32.partialorder %v1115_v16, 0.0 }
  0xff   :  { %v1306_v15 = vsel %vm1178_vm5, %v1114_v7, %v1242_v12  ;;  %v750_v17 = vpop.f32.mrf.mxu2 }
 0x100   :  { %v1359_v19 = vpack.c.bf16 %v1306_v15, %v1305_v14  ;;  %v839_v20 = vpop.f32.mrf.mxu3  ;;  %v575_v21 = vpop.f32.mrf.mxu0  ;;  %v1307_v31 = vsel %vm1179_vm6, %v1115_v16, %v1243_v25 }
 0x101   :  { %v840_v23 = vadd.f32 %v839_v20, %v750_v17  ;;  %v664_v24 = vpop.f32.mrf.mxu1 }
 0x102   :  { %1391 = vst [vmem:[%s2313_s3 + $0x50] sm:$0xff] %v1359_v19  ;;  %v665_v28 = vadd.f32 %v664_v24, %v575_v21 }
 0x103   :  { %v1116_v27 = vadd.f32 %v2065_v29, %v840_v23  ;;  %614 = vmatmul.bf16.gmra.mxu0 %v1534_v18 }
 0x104   :  { %703 = vmatmul.bf16.gmra.mxu1 %v1538_v22  ;;  %792 = vmatmul.bf16.gmra.mxu2 %v1534_v18  ;;  %v1117_v33 = vadd.f32 %v2062_v26, %v665_v28 }
 0x105   :  { %vm1180_vm7 = vcmp.gt.f32.partialorder %v1116_v27, 0.0  ;;  %v1244_v30 = vmul.f32 0.01, %v1116_v27  ;;  %881 = vmatmul.bf16.gmra.mxu3 %v1538_v22 }
 0x106   :  { %v1245_v40 = vmul.f32 0.01, %v1117_v33  ;;  %vm1181_vm8 = vcmp.gt.f32.partialorder %v1117_v33, 0.0 }
 0x107   :  { %v1308_v32 = vsel %vm1180_vm7, %v1116_v27, %v1244_v30  ;;  %v753_v34 = vpop.f32.mrf.mxu2 }
 0x108   :  { %v1360_v35 = vpack.c.bf16 %v1308_v32, %v1307_v31  ;;  %v842_v36 = vpop.f32.mrf.mxu3  ;;  %v577_v37 = vpop.f32.mrf.mxu0  ;;  %v1309_v48 = vsel %vm1181_vm8, %v1117_v33, %v1245_v40 }
 0x109   :  { %v843_v38 = vadd.f32 %v842_v36, %v753_v34  ;;  %v666_v39 = vpop.f32.mrf.mxu1 }
 0x10a   :  { %1392 = vst [vmem:[%s2313_s3 + $0x58] sm:$0xff] %v1360_v35  ;;  %v667_v42 = vadd.f32 %v666_v39, %v577_v37 }
 0x10b   :  { %v1118_v41 = vadd.f32 %v2065_v29, %v843_v38 }
 0x10c   :  { %v1119_v50 = vadd.f32 %v2062_v26, %v667_v42 }
 0x10d   :  { %vm1182_vm9 = vcmp.gt.f32.partialorder %v1118_v41, 0.0  ;;  %v1246_v46 = vmul.f32 0.01, %v1118_v41 }
 0x10e   :  { %v1247_v59 = vmul.f32 0.01, %v1119_v50  ;;  %vm1183_vm10 = vcmp.gt.f32.partialorder %v1119_v50, 0.0 }
 0x10f   :  { %v1310_v49 = vsel %vm1182_vm9, %v1118_v41, %v1246_v46  ;;  %v755_v51 = vpop.f32.mrf.mxu2 }
 0x110   :  { %v1361_v53 = vpack.c.bf16 %v1310_v49, %v1309_v48  ;;  %v844_v54 = vpop.f32.mrf.mxu3  ;;  %v580_v55 = vpop.f32.mrf.mxu0  ;;  %v1311_v63 = vsel %vm1183_vm10, %v1119_v50, %v1247_v59 }
 0x111   :  { %v845_v57 = vadd.f32 %v844_v54, %v755_v51  ;;  %v669_v58 = vpop.f32.mrf.mxu1 }
 0x112   :  { %1393 = vst [vmem:[%s2313_s3 + $0x60] sm:$0xff] %v1361_v53  ;;  %v670_v61 = vadd.f32 %v669_v58, %v580_v55 }
 0x113   :  { %v1120_v60 = vadd.f32 %v2065_v29, %v845_v57  ;;  %619 = vmatmul.bf16.gmra.mxu0 %v1542_v52 }
 0x114   :  { %708 = vmatmul.bf16.gmra.mxu1 %v1546_v56  ;;  %797 = vmatmul.bf16.gmra.mxu2 %v1542_v52  ;;  %v1121_v1 = vadd.f32 %v2062_v26, %v670_v61 }
 0x115   :  { %vm1184_vm11 = vcmp.gt.f32.partialorder %v1120_v60, 0.0  ;;  %v1248_v62 = vmul.f32 0.01, %v1120_v60  ;;  %886 = vmatmul.bf16.gmra.mxu3 %v1546_v56 }
 0x116   :  { %v1249_v8 = vmul.f32 0.01, %v1121_v1  ;;  %vm1185_vm12 = vcmp.gt.f32.partialorder %v1121_v1, 0.0 }
 0x117   :  { %v1312_v0 = vsel %vm1184_vm11, %v1120_v60, %v1248_v62  ;;  %v758_v2 = vpop.f32.mrf.mxu2 }
 0x118   :  { %v1362_v3 = vpack.c.bf16 %v1312_v0, %v1311_v63  ;;  %v847_v4 = vpop.f32.mrf.mxu3  ;;  %v582_v5 = vpop.f32.mrf.mxu0  ;;  %v1313_v12 = vsel %vm1185_vm12, %v1121_v1, %v1249_v8 }
 0x119   :  { %v848_v6 = vadd.f32 %v847_v4, %v758_v2  ;;  %v671_v7 = vpop.f32.mrf.mxu1 }
 0x11a   :  { %1394 = vst [vmem:[%s2313_s3 + $0x68] sm:$0xff] %v1362_v3  ;;  %v672_v10 = vadd.f32 %v671_v7, %v582_v5 }
 0x11b   :  { %v1122_v9 = vadd.f32 %v2065_v29, %v848_v6 }
 0x11c   :  { %v1123_v14 = vadd.f32 %v2062_v26, %v672_v10 }
 0x11d   :  { %vm1186_vm13 = vcmp.gt.f32.partialorder %v1122_v9, 0.0  ;;  %v1250_v11 = vmul.f32 0.01, %v1122_v9 }
 0x11e   :  { %v1251_v21 = vmul.f32 0.01, %v1123_v14  ;;  %vm1187_vm14 = vcmp.gt.f32.partialorder %v1123_v14, 0.0 }
 0x11f   :  { %v1314_v13 = vsel %vm1186_vm13, %v1122_v9, %v1250_v11  ;;  %v760_v15 = vpop.f32.mrf.mxu2 }
 0x120   :  { %v1363_v16 = vpack.c.bf16 %v1314_v13, %v1313_v12  ;;  %v849_v17 = vpop.f32.mrf.mxu3  ;;  %v585_v18 = vpop.f32.mrf.mxu0  ;;  %v1315_v25 = vsel %vm1187_vm14, %v1123_v14, %v1251_v21 }
 0x121   :  { %v850_v19 = vadd.f32 %v849_v17, %v760_v15  ;;  %v674_v20 = vpop.f32.mrf.mxu1 }
 0x122   :  { %1395 = vst [vmem:[%s2313_s3 + $0x70] sm:$0xff] %v1363_v16  ;;  %v675_v23 = vadd.f32 %v674_v20, %v585_v18 }
 0x123   :  { %v1124_v22 = vadd.f32 %v2065_v29, %v850_v19 }
 0x124   :  { %v1125_v28 = vadd.f32 %v2062_v26, %v675_v23 }
 0x125   :  { %vm1188_vm15 = vcmp.gt.f32.partialorder %v1124_v22, 0.0  ;;  %v1252_v24 = vmul.f32 0.01, %v1124_v22 }
 0x126   :  { %v1253_v36 = vmul.f32 0.01, %v1125_v28  ;;  %vm1189_vm0 = vcmp.gt.f32.partialorder %v1125_v28, 0.0 }
 0x127   :  { %v1316_v27 = vsel %vm1188_vm15, %v1124_v22, %v1252_v24  ;;  %v763_v30 = vpop.f32.mrf.mxu2 }
 0x128   :  { %v1364_v31 = vpack.c.bf16 %v1316_v27, %v1315_v25  ;;  %v852_v32 = vpop.f32.mrf.mxu3  ;;  %v587_v33 = vpop.f32.mrf.mxu0  ;;  %v1317_v40 = vsel %vm1189_vm0, %v1125_v28, %v1253_v36 }
 0x129   :  { %v853_v34 = vadd.f32 %v852_v32, %v763_v30  ;;  %v676_v35 = vpop.f32.mrf.mxu1 }
 0x12a   :  { %1396 = vst [vmem:[%s2313_s3 + $0x78] sm:$0xff] %v1364_v31  ;;  %v677_v38 = vadd.f32 %v676_v35, %v587_v33 }
 0x12b   :  { %v1126_v37 = vadd.f32 %v2065_v29, %v853_v34 }
 0x12c   :  { %v1127_v42 = vadd.f32 %v2062_v26, %v677_v38 }
 0x12d   :  { %vm1190_vm1 = vcmp.gt.f32.partialorder %v1126_v37, 0.0  ;;  %v1254_v39 = vmul.f32 0.01, %v1126_v37 }
 0x12e   :  { %v1255_v49 = vmul.f32 0.01, %v1127_v42  ;;  %vm1191_vm2 = vcmp.gt.f32.partialorder %v1127_v42, 0.0 }
 0x12f   :  { %v1318_v41 = vsel %vm1190_vm1, %v1126_v37, %v1254_v39  ;;  %v765_v43 = vpop.f32.mrf.mxu2 }
 0x130   :  { %v1365_v44 = vpack.c.bf16 %v1318_v41, %v1317_v40  ;;  %v854_v45 = vpop.f32.mrf.mxu3  ;;  %v590_v46 = vpop.f32.mrf.mxu0  ;;  %v1319_v53 = vsel %vm1191_vm2, %v1127_v42, %v1255_v49 }
 0x131   :  { %v855_v47 = vadd.f32 %v854_v45, %v765_v43  ;;  %v679_v48 = vpop.f32.mrf.mxu1 }
 0x132   :  { %1397 = vst [vmem:[%s2313_s3 + $0x80] sm:$0xff] %v1365_v44  ;;  %v680_v51 = vadd.f32 %v679_v48, %v590_v46 }
 0x133   :  { %v1128_v50 = vadd.f32 %v2065_v29, %v855_v47 }
 0x134   :  { %v1129_v55 = vadd.f32 %v2062_v26, %v680_v51 }
 0x135   :  { %vm1192_vm3 = vcmp.gt.f32.partialorder %v1128_v50, 0.0  ;;  %v1256_v52 = vmul.f32 0.01, %v1128_v50 }
 0x136   :  { %v1257_v62 = vmul.f32 0.01, %v1129_v55  ;;  %vm1193_vm4 = vcmp.gt.f32.partialorder %v1129_v55, 0.0 }
 0x137   :  { %v1320_v54 = vsel %vm1192_vm3, %v1128_v50, %v1256_v52  ;;  %v768_v56 = vpop.f32.mrf.mxu2 }
 0x138   :  { %v1366_v57 = vpack.c.bf16 %v1320_v54, %v1319_v53  ;;  %v857_v58 = vpop.f32.mrf.mxu3  ;;  %v592_v59 = vpop.f32.mrf.mxu0  ;;  %v1321_v2 = vsel %vm1193_vm4, %v1129_v55, %v1257_v62 }
 0x139   :  { %v858_v60 = vadd.f32 %v857_v58, %v768_v56  ;;  %v681_v61 = vpop.f32.mrf.mxu1 }
 0x13a   :  { %1398 = vst [vmem:[%s2313_s3 + $0x88] sm:$0xff] %v1366_v57  ;;  %v682_v0 = vadd.f32 %v681_v61, %v592_v59 }
 0x13b   :  { %v1130_v63 = vadd.f32 %v2065_v29, %v858_v60 }
 0x13c   :  { %v1131_v4 = vadd.f32 %v2062_v26, %v682_v0 }
 0x13d   :  { %vm1194_vm5 = vcmp.gt.f32.partialorder %v1130_v63, 0.0  ;;  %v1258_v1 = vmul.f32 0.01, %v1130_v63 }
 0x13e   :  { %v1259_v11 = vmul.f32 0.01, %v1131_v4  ;;  %vm1195_vm6 = vcmp.gt.f32.partialorder %v1131_v4, 0.0 }
 0x13f   :  { %v1322_v3 = vsel %vm1194_vm5, %v1130_v63, %v1258_v1  ;;  %v770_v5 = vpop.f32.mrf.mxu2 }
 0x140   :  { %v1367_v6 = vpack.c.bf16 %v1322_v3, %v1321_v2  ;;  %v859_v7 = vpop.f32.mrf.mxu3  ;;  %v595_v8 = vpop.f32.mrf.mxu0  ;;  %v1323_v15 = vsel %vm1195_vm6, %v1131_v4, %v1259_v11 }
 0x141   :  { %v860_v9 = vadd.f32 %v859_v7, %v770_v5  ;;  %v684_v10 = vpop.f32.mrf.mxu1 }
 0x142   :  { %1399 = vst [vmem:[%s2313_s3 + $0x90] sm:$0xff] %v1367_v6  ;;  %v685_v13 = vadd.f32 %v684_v10, %v595_v8 }
 0x143   :  { %v1132_v12 = vadd.f32 %v2065_v29, %v860_v9 }
 0x144   :  { %v1133_v17 = vadd.f32 %v2062_v26, %v685_v13 }
 0x145   :  { %vm1196_vm7 = vcmp.gt.f32.partialorder %v1132_v12, 0.0  ;;  %v1260_v14 = vmul.f32 0.01, %v1132_v12 }
 0x146   :  { %v1261_v24 = vmul.f32 0.01, %v1133_v17  ;;  %vm1197_vm8 = vcmp.gt.f32.partialorder %v1133_v17, 0.0 }
 0x147   :  { %v1324_v16 = vsel %vm1196_vm7, %v1132_v12, %v1260_v14  ;;  %v773_v18 = vpop.f32.mrf.mxu2 }
 0x148   :  { %v1368_v19 = vpack.c.bf16 %v1324_v16, %v1323_v15  ;;  %v862_v20 = vpop.f32.mrf.mxu3  ;;  %v597_v21 = vpop.f32.mrf.mxu0  ;;  %v1325_v30 = vsel %vm1197_vm8, %v1133_v17, %v1261_v24 }
 0x149   :  { %v863_v22 = vadd.f32 %v862_v20, %v773_v18  ;;  %v686_v23 = vpop.f32.mrf.mxu1 }
 0x14a   :  { %1400 = vst [vmem:[%s2313_s3 + $0x98] sm:$0xff] %v1368_v19  ;;  %v687_v27 = vadd.f32 %v686_v23, %v597_v21 }
 0x14b   :  { %v1134_v25 = vadd.f32 %v2065_v29, %v863_v22 }
 0x14c   :  { %v1135_v32 = vadd.f32 %v2062_v26, %v687_v27 }
 0x14d   :  { %vm1198_vm9 = vcmp.gt.f32.partialorder %v1134_v25, 0.0  ;;  %v1262_v28 = vmul.f32 0.01, %v1134_v25 }
 0x14e   :  { %v1263_v39 = vmul.f32 0.01, %v1135_v32  ;;  %vm1199_vm10 = vcmp.gt.f32.partialorder %v1135_v32, 0.0 }
 0x14f   :  { %v1326_v31 = vsel %vm1198_vm9, %v1134_v25, %v1262_v28  ;;  %v775_v33 = vpop.f32.mrf.mxu2 }
 0x150   :  { %v1369_v34 = vpack.c.bf16 %v1326_v31, %v1325_v30  ;;  %v864_v35 = vpop.f32.mrf.mxu3  ;;  %v600_v36 = vpop.f32.mrf.mxu0  ;;  %v1327_v43 = vsel %vm1199_vm10, %v1135_v32, %v1263_v39 }
 0x151   :  { %v865_v37 = vadd.f32 %v864_v35, %v775_v33  ;;  %v689_v38 = vpop.f32.mrf.mxu1 }
 0x152   :  { %1401 = vst [vmem:[%s2313_s3 + $0xa0] sm:$0xff] %v1369_v34  ;;  %v690_v41 = vadd.f32 %v689_v38, %v600_v36 }
 0x153   :  { %v1136_v40 = vadd.f32 %v2065_v29, %v865_v37 }
 0x154   :  { %v1137_v45 = vadd.f32 %v2062_v26, %v690_v41 }
 0x155   :  { %vm1200_vm11 = vcmp.gt.f32.partialorder %v1136_v40, 0.0  ;;  %v1264_v42 = vmul.f32 0.01, %v1136_v40 }
 0x156   :  { %v1265_v52 = vmul.f32 0.01, %v1137_v45  ;;  %vm1201_vm12 = vcmp.gt.f32.partialorder %v1137_v45, 0.0 }
 0x157   :  { %v1328_v44 = vsel %vm1200_vm11, %v1136_v40, %v1264_v42  ;;  %v778_v46 = vpop.f32.mrf.mxu2 }
 0x158   :  { %v1370_v47 = vpack.c.bf16 %v1328_v44, %v1327_v43  ;;  %v867_v48 = vpop.f32.mrf.mxu3  ;;  %v602_v49 = vpop.f32.mrf.mxu0  ;;  %v1329_v56 = vsel %vm1201_vm12, %v1137_v45, %v1265_v52 }
 0x159   :  { %v868_v50 = vadd.f32 %v867_v48, %v778_v46  ;;  %v691_v51 = vpop.f32.mrf.mxu1 }
 0x15a   :  { %1402 = vst [vmem:[%s2313_s3 + $0xa8] sm:$0xff] %v1370_v47  ;;  %v692_v54 = vadd.f32 %v691_v51, %v602_v49 }
 0x15b   :  { %v1138_v53 = vadd.f32 %v2065_v29, %v868_v50 }
 0x15c   :  { %v1139_v58 = vadd.f32 %v2062_v26, %v692_v54 }
 0x15d   :  { %vm1202_vm13 = vcmp.gt.f32.partialorder %v1138_v53, 0.0  ;;  %v1266_v55 = vmul.f32 0.01, %v1138_v53 }
 0x15e   :  { %v1267_v1 = vmul.f32 0.01, %v1139_v58  ;;  %vm1203_vm14 = vcmp.gt.f32.partialorder %v1139_v58, 0.0 }
 0x15f   :  { %v1330_v57 = vsel %vm1202_vm13, %v1138_v53, %v1266_v55  ;;  %v780_v59 = vpop.f32.mrf.mxu2 }
 0x160   :  { %v1371_v60 = vpack.c.bf16 %v1330_v57, %v1329_v56  ;;  %v869_v61 = vpop.f32.mrf.mxu3  ;;  %v605_v62 = vpop.f32.mrf.mxu0  ;;  %v1331_v5 = vsel %vm1203_vm14, %v1139_v58, %v1267_v1 }
 0x161   :  { %v870_v63 = vadd.f32 %v869_v61, %v780_v59  ;;  %v694_v0 = vpop.f32.mrf.mxu1 }
 0x162   :  { %1403 = vst [vmem:[%s2313_s3 + $0xb0] sm:$0xff] %v1371_v60  ;;  %v695_v3 = vadd.f32 %v694_v0, %v605_v62 }
 0x163   :  { %v1140_v2 = vadd.f32 %v2065_v29, %v870_v63 }
 0x164   :  { %v1141_v7 = vadd.f32 %v2062_v26, %v695_v3 }
 0x165   :  { %vm1204_vm15 = vcmp.gt.f32.partialorder %v1140_v2, 0.0  ;;  %v1268_v4 = vmul.f32 0.01, %v1140_v2 }
 0x166   :  { %v1269_v14 = vmul.f32 0.01, %v1141_v7  ;;  %vm1205_vm0 = vcmp.gt.f32.partialorder %v1141_v7, 0.0 }
 0x167   :  { %v1332_v6 = vsel %vm1204_vm15, %v1140_v2, %v1268_v4  ;;  %v783_v8 = vpop.f32.mrf.mxu2 }
 0x168   :  { %v1372_v9 = vpack.c.bf16 %v1332_v6, %v1331_v5  ;;  %v872_v10 = vpop.f32.mrf.mxu3  ;;  %v607_v11 = vpop.f32.mrf.mxu0  ;;  %v1333_v18 = vsel %vm1205_vm0, %v1141_v7, %v1269_v14 }
 0x169   :  { %v873_v12 = vadd.f32 %v872_v10, %v783_v8  ;;  %v696_v13 = vpop.f32.mrf.mxu1 }
 0x16a   :  { %1404 = vst [vmem:[%s2313_s3 + $0xb8] sm:$0xff] %v1372_v9  ;;  %v697_v16 = vadd.f32 %v696_v13, %v607_v11 }
 0x16b   :  { %v1142_v15 = vadd.f32 %v2065_v29, %v873_v12 }
 0x16c   :  { %v1143_v20 = vadd.f32 %v2062_v26, %v697_v16 }
 0x16d   :  { %vm1206_vm1 = vcmp.gt.f32.partialorder %v1142_v15, 0.0  ;;  %v1270_v17 = vmul.f32 0.01, %v1142_v15 }
 0x16e   :  { %v1271_v28 = vmul.f32 0.01, %v1143_v20  ;;  %vm1207_vm2 = vcmp.gt.f32.partialorder %v1143_v20, 0.0 }
 0x16f   :  { %v1334_v19 = vsel %vm1206_vm1, %v1142_v15, %v1270_v17  ;;  %v785_v21 = vpop.f32.mrf.mxu2 }
 0x170   :  { %v1373_v22 = vpack.c.bf16 %v1334_v19, %v1333_v18  ;;  %v874_v23 = vpop.f32.mrf.mxu3  ;;  %v610_v24 = vpop.f32.mrf.mxu0  ;;  %v1335_v33 = vsel %vm1207_vm2, %v1143_v20, %v1271_v28 }
 0x171   :  { %v875_v25 = vadd.f32 %v874_v23, %v785_v21  ;;  %v699_v27 = vpop.f32.mrf.mxu1 }
 0x172   :  { %1405 = vst [vmem:[%s2313_s3 + $0xc0] sm:$0xff] %v1373_v22  ;;  %v700_v31 = vadd.f32 %v699_v27, %v610_v24 }
 0x173   :  { %v1144_v30 = vadd.f32 %v2065_v29, %v875_v25 }
 0x174   :  { %v1145_v35 = vadd.f32 %v2062_v26, %v700_v31 }
 0x175   :  { %vm1208_vm3 = vcmp.gt.f32.partialorder %v1144_v30, 0.0  ;;  %v1272_v32 = vmul.f32 0.01, %v1144_v30 }
 0x176   :  { %v1273_v42 = vmul.f32 0.01, %v1145_v35  ;;  %vm1209_vm4 = vcmp.gt.f32.partialorder %v1145_v35, 0.0 }
 0x177   :  { %v1336_v34 = vsel %vm1208_vm3, %v1144_v30, %v1272_v32  ;;  %v788_v36 = vpop.f32.mrf.mxu2 }
 0x178   :  { %v1374_v37 = vpack.c.bf16 %v1336_v34, %v1335_v33  ;;  %v877_v38 = vpop.f32.mrf.mxu3  ;;  %v612_v39 = vpop.f32.mrf.mxu0  ;;  %v1337_v46 = vsel %vm1209_vm4, %v1145_v35, %v1273_v42 }
 0x179   :  { %v878_v40 = vadd.f32 %v877_v38, %v788_v36  ;;  %v701_v41 = vpop.f32.mrf.mxu1 }
 0x17a   :  { %1406 = vst [vmem:[%s2313_s3 + $0xc8] sm:$0xff] %v1374_v37  ;;  %v702_v44 = vadd.f32 %v701_v41, %v612_v39 }
 0x17b   :  { %v1146_v43 = vadd.f32 %v2065_v29, %v878_v40 }
 0x17c   :  { %v1147_v48 = vadd.f32 %v2062_v26, %v702_v44 }
 0x17d   :  { %vm1210_vm5 = vcmp.gt.f32.partialorder %v1146_v43, 0.0  ;;  %v1274_v45 = vmul.f32 0.01, %v1146_v43 }
 0x17e   :  { %v1275_v55 = vmul.f32 0.01, %v1147_v48  ;;  %vm1211_vm6 = vcmp.gt.f32.partialorder %v1147_v48, 0.0 }
 0x17f   :  { %v1338_v47 = vsel %vm1210_vm5, %v1146_v43, %v1274_v45  ;;  %v790_v49 = vpop.f32.mrf.mxu2 }
 0x180   :  { %v1375_v50 = vpack.c.bf16 %v1338_v47, %v1337_v46  ;;  %v879_v51 = vpop.f32.mrf.mxu3  ;;  %v615_v52 = vpop.f32.mrf.mxu0  ;;  %v1339_v59 = vsel %vm1211_vm6, %v1147_v48, %v1275_v55 }
 0x181   :  { %v880_v53 = vadd.f32 %v879_v51, %v790_v49  ;;  %v704_v54 = vpop.f32.mrf.mxu1 }
 0x182   :  { %1407 = vst [vmem:[%s2313_s3 + $0xd0] sm:$0xff] %v1375_v50  ;;  %v705_v57 = vadd.f32 %v704_v54, %v615_v52 }
 0x183   :  { %v1148_v56 = vadd.f32 %v2065_v29, %v880_v53 }
 0x184   :  { %v1149_v61 = vadd.f32 %v2062_v26, %v705_v57 }
 0x185   :  { %vm1212_vm7 = vcmp.gt.f32.partialorder %v1148_v56, 0.0  ;;  %v1276_v58 = vmul.f32 0.01, %v1148_v56 }
 0x186   :  { %v1277_v4 = vmul.f32 0.01, %v1149_v61  ;;  %vm1213_vm8 = vcmp.gt.f32.partialorder %v1149_v61, 0.0 }
 0x187   :  { %v1340_v60 = vsel %vm1212_vm7, %v1148_v56, %v1276_v58  ;;  %v793_v62 = vpop.f32.mrf.mxu2 }
 0x188   :  { %v1376_v63 = vpack.c.bf16 %v1340_v60, %v1339_v59  ;;  %v882_v0 = vpop.f32.mrf.mxu3  ;;  %v617_v1 = vpop.f32.mrf.mxu0  ;;  %v1341_v8 = vsel %vm1213_vm8, %v1149_v61, %v1277_v4 }
 0x189   :  { %v883_v2 = vadd.f32 %v882_v0, %v793_v62  ;;  %v706_v3 = vpop.f32.mrf.mxu1 }
 0x18a   :  { %1408 = vst [vmem:[%s2313_s3 + $0xd8] sm:$0xff] %v1376_v63  ;;  %v707_v6 = vadd.f32 %v706_v3, %v617_v1 }
 0x18b   :  { %v1150_v5 = vadd.f32 %v2065_v29, %v883_v2 }
 0x18c   :  { %v1151_v10 = vadd.f32 %v2062_v26, %v707_v6 }
 0x18d   :  { %vm1214_vm9 = vcmp.gt.f32.partialorder %v1150_v5, 0.0  ;;  %v1278_v7 = vmul.f32 0.01, %v1150_v5 }
 0x18e   :  { %v1279_v17 = vmul.f32 0.01, %v1151_v10  ;;  %vm1215_vm10 = vcmp.gt.f32.partialorder %v1151_v10, 0.0 }
 0x18f   :  { %v1342_v9 = vsel %vm1214_vm9, %v1150_v5, %v1278_v7  ;;  %v795_v11 = vpop.f32.mrf.mxu2 }
 0x190   :  { %v1377_v12 = vpack.c.bf16 %v1342_v9, %v1341_v8  ;;  %v884_v13 = vpop.f32.mrf.mxu3  ;;  %v620_v14 = vpop.f32.mrf.mxu0  ;;  %v1343_v21 = vsel %vm1215_vm10, %v1151_v10, %v1279_v17 }
 0x191   :  { %v885_v15 = vadd.f32 %v884_v13, %v795_v11  ;;  %v709_v16 = vpop.f32.mrf.mxu1 }
 0x192   :  { %1409 = vst [vmem:[%s2313_s3 + $0xe0] sm:$0xff] %v1377_v12  ;;  %v710_v19 = vadd.f32 %v709_v16, %v620_v14 }
 0x193   :  { %v1152_v18 = vadd.f32 %v2065_v29, %v885_v15 }
 0x194   :  { %v1153_v23 = vadd.f32 %v2062_v26, %v710_v19 }
 0x195   :  { %vm1216_vm11 = vcmp.gt.f32.partialorder %v1152_v18, 0.0  ;;  %v1280_v20 = vmul.f32 0.01, %v1152_v18 }
 0x196   :  { %v1281_v32 = vmul.f32 0.01, %v1153_v23  ;;  %vm1217_vm12 = vcmp.gt.f32.partialorder %v1153_v23, 0.0 }
 0x197   :  { %v1344_v22 = vsel %vm1216_vm11, %v1152_v18, %v1280_v20  ;;  %v798_v24 = vpop.f32.mrf.mxu2 }
 0x198   :  { %v1378_v25 = vpack.c.bf16 %v1344_v22, %v1343_v21  ;;  %v887_v27 = vpop.f32.mrf.mxu3  ;;  %v622_v28 = vpop.f32.mrf.mxu0  ;;  %v1345_v36 = vsel %vm1217_vm12, %v1153_v23, %v1281_v32 }
 0x199   :  { %v888_v30 = vadd.f32 %v887_v27, %v798_v24  ;;  %v711_v31 = vpop.f32.mrf.mxu1 }
 0x19a   :  { %1410 = vst [vmem:[%s2313_s3 + $0xe8] sm:$0xff] %v1378_v25  ;;  %v712_v34 = vadd.f32 %v711_v31, %v622_v28 }
 0x19b   :  { %v1154_v33 = vadd.f32 %v2065_v29, %v888_v30 }
 0x19c   :  { %v1155_v38 = vadd.f32 %v2062_v26, %v712_v34 }
 0x19d   :  { %vm1218_vm13 = vcmp.gt.f32.partialorder %v1154_v33, 0.0  ;;  %v1282_v35 = vmul.f32 0.01, %v1154_v33 }
 0x19e   :  { %v1283_v43 = vmul.f32 0.01, %v1155_v38  ;;  %vm1219_vm14 = vcmp.gt.f32.partialorder %v1155_v38, 0.0 }
 0x19f   :  { %v1346_v37 = vsel %vm1218_vm13, %v1154_v33, %v1282_v35  ;;  %v800_v39 = vpop.f32.mrf.mxu2 }
 0x1a0   :  { %v1379_v40 = vpack.c.bf16 %v1346_v37, %v1345_v36  ;;  %v889_v41 = vpop.f32.mrf.mxu3  ;;  %v1347_v46 = vsel %vm1219_vm14, %v1155_v38, %v1283_v43 }
 0x1a1   :  { %v890_v42 = vadd.f32 %v889_v41, %v800_v39 }
 0x1a2   :  { %1411 = vst [vmem:[%s2313_s3 + $0xf0] sm:$0xff] %v1379_v40 }
 0x1a3   :  { %v1156_v44 = vadd.f32 %v2065_v29, %v890_v42 }
 0x1a5   :  { %vm1220_vm15 = vcmp.gt.f32.partialorder %v1156_v44, 0.0  ;;  %v1284_v45 = vmul.f32 0.01, %v1156_v44 }
 0x1a7   :  { %v1348_v47 = vsel %vm1220_vm15, %v1156_v44, %v1284_v45 }
 0x1a8   :  { %v1380_v48 = vpack.c.bf16 %v1348_v47, %v1347_v46 }
 0x1aa   :  { %1412 = vst [vmem:[%s2313_s3 + $0xf8] sm:$0xff] %v1380_v48 }

</bundles_post_ra>
